<compile_context>
chip_gen: v7x
topology: tpu7x:2x2x1
jax: 0.10.0
libtpu: 0.0.40
codegen_flags: <defaults>
</compile_context>

<pallas_src>
import math
import functools

import jax
import jax.numpy as jnp
from jax import lax
from jax.experimental import pallas as pl
from jax.experimental.pallas import tpu as pltpu


def _attention_block_kernel(x_ref, gamma_ref, beta_ref,
                            wq_ref, bq_ref, wk_ref, bk_ref,
                            wv_ref, bv_ref, wp_ref, bp_ref,
                            out_ref,
                            xn_scratch, k_scratch, v_scratch,
                            *, groups, block_q, block_kv,
                            compute_dtype, approx_recip):
    """Grid = (B, S // block_q).

    x_ref      : (1, S, C) f32 flattened NHWC input for this batch element
    gamma/beta : (1, C)    GroupNorm affine params (f32)
    w*_ref     : (C, C)    linear weights, pre-transposed (y = x @ W + b), compute dtype
    b*_ref     : (1, C)    linear biases (f32)
    out_ref    : (1, block_q, C) f32
    xn_scratch : (S, C) f32           GroupNorm output (residual + q source)
    k_scratch  : (S, C) compute_dtype key projection
    v_scratch  : (S, C) compute_dtype value projection
    """
    qi = pl.program_id(1)
    S, C = xn_scratch.shape
    Cg = C // groups
    eps = 1e-5                      # PyTorch GroupNorm default
    scale = C ** (-0.5)

    # -------- once per batch element: GroupNorm + k/v projections into scratch ----
    @pl.when(qi == 0)
    def _():
        x = x_ref[0]                                       # (S, C) f32
        n = float(S * Cg)
        ch = lax.broadcasted_iota(jnp.int32, (1, C), 1)    # (1, C) channel ids
        masks = [
            jnp.logical_and(ch >= g * Cg, ch < (g + 1) * Cg).astype(jnp.float32)
            for g in range(groups)
        ]

        # group mean (broadcast back per channel)
        s1 = jnp.sum(x, axis=0, keepdims=True)             # (1, C)
        mean_c = jnp.zeros((1, C), jnp.float32)
        for m in masks:
            mean_c = mean_c + m * (jnp.sum(s1 * m, keepdims=True) / n)

        # two-pass (mean-subtracted) group variance
        d = x - mean_c                                     # (S, C)
        s2 = jnp.sum(d * d, axis=0, keepdims=True)         # (1, C)
        var_c = jnp.zeros((1, C), jnp.float32)
        for m in masks:
            var_c = var_c + m * (jnp.sum(s2 * m, keepdims=True) / n)

        xn = d * lax.rsqrt(var_c + eps) * gamma_ref[...] + beta_ref[...]
        xn_scratch[...] = xn

        xn_c = xn.astype(compute_dtype)
        k_scratch[...] = (jnp.dot(xn_c, wk_ref[...],
                                  preferred_element_type=jnp.float32)
                          + bk_ref[...]).astype(compute_dtype)
        v_scratch[...] = (jnp.dot(xn_c, wv_ref[...],
                                  preferred_element_type=jnp.float32)
                          + bv_ref[...]).astype(compute_dtype)

    # -------- per q-tile: q projection + flash attention over KV tiles ------------
    q_start = pl.multiple_of(qi * block_q, block_q)
    xn_q = xn_scratch[pl.ds(q_start, block_q), :]          # (TQ, C) f32
    q = (jnp.dot(xn_q.astype(compute_dtype), wq_ref[...],
                 preferred_element_type=jnp.float32) + bq_ref[...]) * scale
    q_c = q.astype(compute_dtype)                          # scale folded into q

    num_kv = S // block_kv

    def kv_body(kv, carry):
        m_i, l_i, acc = carry
        kv_start = pl.multiple_of(kv * block_kv, block_kv)
        k_t = k_scratch[pl.ds(kv_start, block_kv), :]      # (TK, C)
        v_t = v_scratch[pl.ds(kv_start, block_kv), :]      # (TK, C)
        # scores: contract C on both operands (no k.T materialization)
        s = lax.dot_general(q_c, k_t, (((1,), (1,)), ((), ())),
                            preferred_element_type=jnp.float32)  # (TQ, TK) f32
        m_new = jnp.maximum(m_i, jnp.max(s, axis=-1, keepdims=True))
        alpha = jnp.exp(m_i - m_new)
        p = jnp.exp(s - m_new)
        l_new = alpha * l_i + jnp.sum(p, axis=-1, keepdims=True)
        acc_new = alpha * acc + jnp.dot(p.astype(compute_dtype), v_t,
                                        preferred_element_type=jnp.float32)
        return m_new, l_new, acc_new

    m0 = jnp.full((block_q, 1), -jnp.inf, jnp.float32)
    l0 = jnp.zeros((block_q, 1), jnp.float32)
    a0 = jnp.zeros((block_q, C), jnp.float32)
    m_i, l_i, acc = lax.fori_loop(0, num_kv, kv_body, (m0, l0, a0))

    # deferred softmax normalization on the (TQ, C) output, not the (TQ, TK) scores
    if approx_recip:
        inv_l = pl.reciprocal(l_i, approx=True)
    else:
        inv_l = 1.0 / l_i
    o = (acc * inv_l).astype(compute_dtype)

    proj = jnp.dot(o, wp_ref[...], preferred_element_type=jnp.float32) + bp_ref[...]
    out_ref[0] = (xn_q + proj).astype(out_ref.dtype)


def attention_block(x_nchw, params, groups, *,
                    block_q=128, block_kv=128, compute_dtype=jnp.bfloat16):
    """Forward pass matching the PyTorch AttentionBlock. x_nchw: (B, C, H, W) f32."""
    B, C, H, W = x_nchw.shape
    S = H * W
    block_q = min(block_q, S)
    block_kv = min(block_kv, S)
    assert S % block_q == 0 and S % block_kv == 0, "S must be divisible by tile sizes"

    # NCHW -> (B, S, C)  (glue reshapes stay in plain JAX)
    # TODO(synk): accept NHWC upstream to avoid this extra HBM round-trip.
    x = jnp.transpose(x_nchw, (0, 2, 3, 1)).reshape(B, S, C).astype(jnp.float32)

    gamma = params["gamma"].reshape(1, C).astype(jnp.float32)
    beta = params["beta"].reshape(1, C).astype(jnp.float32)

    def wt(w):  # pre-transpose so y = x @ W + b; cast MXU operand to compute dtype
        return w.T.astype(compute_dtype)

    wq, wk, wv, wp = wt(params["wq"]), wt(params["wk"]), wt(params["wv"]), wt(params["wp"])
    bq = params["bq"].reshape(1, C).astype(jnp.float32)
    bk = params["bk"].reshape(1, C).astype(jnp.float32)
    bv = params["bv"].reshape(1, C).astype(jnp.float32)
    bp = params["bp"].reshape(1, C).astype(jnp.float32)

    approx_recip = jnp.dtype(compute_dtype) != jnp.dtype(jnp.float32)
    kernel = functools.partial(
        _attention_block_kernel,
        groups=groups, block_q=block_q, block_kv=block_kv,
        compute_dtype=compute_dtype, approx_recip=approx_recip)

    def inv_spec(shape):  # grid-invariant operand
        return pl.BlockSpec(shape, lambda b, qi: (0,) * len(shape))

    cbytes = jnp.dtype(compute_dtype).itemsize
    est_vmem = (
        2 * S * C * 4                        # x block (double-buffered)
        + 2 * block_q * C * 4                # out tile (double-buffered)
        + 2 * 4 * C * C * cbytes             # weights (double-buffered)
        + S * C * 4 + 2 * S * C * cbytes     # persistent scratch (xn, k, v)
        + 4 * S * C * 4                      # in-kernel temporaries at qi == 0
    )
    compiler_kwargs = {"dimension_semantics": ("parallel", "arbitrary")}
    if est_vmem > 16 * 1024 * 1024:          # smallest default scoped limit (v5e)
        # v7x has only 64 MiB physical VMEM per TC — clamp the request there.
        compiler_kwargs["vmem_limit_bytes"] = int(min(2 * est_vmem, 64 * 1024 * 1024))

    out = pl.pallas_call(
        kernel,
        out_shape=jax.ShapeDtypeStruct((B, S, C), jnp.float32),
        grid_spec=pltpu.PrefetchScalarGridSpec(
            num_scalar_prefetch=0,
            grid=(B, S // block_q),
            in_specs=[
                pl.BlockSpec((1, S, C), lambda b, qi: (b, 0, 0)),   # x (resident per b)
                inv_spec((1, C)),                                    # gamma
                inv_spec((1, C)),                                    # beta
                inv_spec((C, C)), inv_spec((1, C)),                  # wq, bq
                inv_spec((C, C)), inv_spec((1, C)),                  # wk, bk
                inv_spec((C, C)), inv_spec((1, C)),                  # wv, bv
                inv_spec((C, C)), inv_spec((1, C)),                  # wp, bp
            ],
            out_specs=pl.BlockSpec((1, block_q, C), lambda b, qi: (b, qi, 0)),
            scratch_shapes=[
                pltpu.VMEM((S, C), jnp.float32),     # xn (GroupNorm output)
                pltpu.VMEM((S, C), compute_dtype),   # k
                pltpu.VMEM((S, C), compute_dtype),   # v
            ],
        ),
        compiler_params=pltpu.CompilerParams(**compiler_kwargs),
    )(x, gamma, beta, wq, bq, wk, bk, wv, bv, wp, bp)

    # (B, S, C) -> NCHW
    return jnp.transpose(out.reshape(B, H, W, C), (0, 3, 1, 2))


def attention_block_reference(x_nchw, params, groups):
    """Pure-JAX reference mirroring the PyTorch forward, for correctness check."""
    B, C, H, W = x_nchw.shape
    S = H * W
    eps = 1e-5
    xg = x_nchw.reshape(B, groups, C // groups, H, W)
    mean = xg.mean(axis=(2, 3, 4), keepdims=True)
    var = xg.var(axis=(2, 3, 4), keepdims=True)
    xn = (xg - mean) / jnp.sqrt(var + eps)
    xn = xn.reshape(B, C, H, W) * params["gamma"].reshape(1, C, 1, 1) \
         + params["beta"].reshape(1, C, 1, 1)
    x = jnp.transpose(xn, (0, 2, 3, 1)).reshape(B, S, C)
    q = x @ params["wq"].T + params["bq"]
    k = x @ params["wk"].T + params["bk"]
    v = x @ params["wv"].T + params["bv"]
    scale = C ** (-0.5)
    attn = jax.nn.softmax(jnp.einsum("bsc,btc->bst", q, k) * scale, axis=-1)
    o = jnp.einsum("bst,btc->bsc", attn, v)
    proj = o @ params["wp"].T + params["bp"]
    out = x + proj
    return jnp.transpose(out.reshape(B, H, W, C), (0, 3, 1, 2))


def init_params(key, units):
    """Deterministic synthetic parameter init (shapes match nn.Linear / nn.GroupNorm)."""
    keys = jax.random.split(key, 10)
    s = 1.0 / math.sqrt(units)
    return {
        "gamma": 1.0 + 0.1 * jax.random.normal(keys[0], (units,), jnp.float32),
        "beta": 0.1 * jax.random.normal(keys[1], (units,), jnp.float32),
        "wq": jax.random.uniform(keys[2], (units, units), jnp.float32, -s, s),
        "bq": jax.random.uniform(keys[3], (units,), jnp.float32, -s, s),
        "wk": jax.random.uniform(keys[4], (units, units), jnp.float32, -s, s),
        "bk": jax.random.uniform(keys[5], (units,), jnp.float32, -s, s),
        "wv": jax.random.uniform(keys[6], (units, units), jnp.float32, -s, s),
        "bv": jax.random.uniform(keys[7], (units,), jnp.float32, -s, s),
        "wp": jax.random.uniform(keys[8], (units, units), jnp.float32, -s, s),
        "bp": jax.random.uniform(keys[9], (units,), jnp.float32, -s, s),
    }


if __name__ == "__main__":
    # Small but multi-tile: S = 16*16 = 256 -> 2 q-tiles x 2 kv-tiles of 128.
    B, units, groups, H, W = 2, 32, 4, 16, 16

    key = jax.random.PRNGKey(0)
    k_x, k_p = jax.random.split(key)
    x = jax.random.normal(k_x, (B, units, H, W), jnp.float32)
    params = init_params(k_p, units)

    ref = attention_block_reference(x, params, groups)

    # f32 validation path (exact reciprocal, f32 MXU operands) — tight tolerance.
    fwd_f32 = jax.jit(functools.partial(attention_block, groups=groups,
                                        compute_dtype=jnp.float32))
    out_f32 = jax.block_until_ready(fwd_f32(x, params))
    assert out_f32.shape == (B, units, H, W)
    err_f32 = float(jnp.max(jnp.abs(out_f32 - ref)))
    assert jnp.allclose(out_f32, ref, atol=2e-4, rtol=2e-4), f"f32 max abs err {err_f32}"

    # bf16 performance path (bf16 MXU operands, approx reciprocal) — loose tolerance.
    fwd_bf16 = jax.jit(functools.partial(attention_block, groups=groups,
                                         compute_dtype=jnp.bfloat16))
    out_bf16 = jax.block_until_ready(fwd_bf16(x, params))
    assert out_bf16.shape == (B, units, H, W)
    err_bf16 = float(jnp.max(jnp.abs(out_bf16 - ref)))
    assert err_bf16 < 0.1, f"bf16 max abs err {err_bf16}"

    print("KERNEL_OK")
</pallas_src>

<mosaic_0001>
module attributes {stable_mosaic.version = 11 : i64} {
  func.func @_attention_block_kernel(%arg0: i32, %arg1: i32, %arg2: memref<1x256x32xf32, #tpu.memory_space<vmem>>, %arg3: memref<1x32xf32, #tpu.memory_space<vmem>>, %arg4: memref<1x32xf32, #tpu.memory_space<vmem>>, %arg5: memref<32x32xf32, #tpu.memory_space<vmem>>, %arg6: memref<1x32xf32, #tpu.memory_space<vmem>>, %arg7: memref<32x32xf32, #tpu.memory_space<vmem>>, %arg8: memref<1x32xf32, #tpu.memory_space<vmem>>, %arg9: memref<32x32xf32, #tpu.memory_space<vmem>>, %arg10: memref<1x32xf32, #tpu.memory_space<vmem>>, %arg11: memref<32x32xf32, #tpu.memory_space<vmem>>, %arg12: memref<1x32xf32, #tpu.memory_space<vmem>>, %arg13: memref<1x128x32xf32, #tpu.memory_space<vmem>>, %arg14: memref<256x32xf32, #tpu.memory_space<vmem>>, %arg15: memref<256x32xf32, #tpu.memory_space<vmem>>, %arg16: memref<256x32xf32, #tpu.memory_space<vmem>>) attributes {dimension_semantics = [#tpu.dimension_semantics<parallel>, #tpu.dimension_semantics<arbitrary>], iteration_bounds = array<i64: 2, 2>, scalar_prefetch = 0 : i64, scratch_operands = 3 : i64, tpu.core_type = #tpu.core_type<tc>, window_params = [{transform_indices = @transform_0, window_bounds = array<i64: 1, 256, 32>}, {pipeline_mode = #tpu.pipeline_mode<synchronous>, transform_indices = @transform_1, window_bounds = array<i64: 1, 32>}, {pipeline_mode = #tpu.pipeline_mode<synchronous>, transform_indices = @transform_2, window_bounds = array<i64: 1, 32>}, {pipeline_mode = #tpu.pipeline_mode<synchronous>, transform_indices = @transform_3, window_bounds = array<i64: 32, 32>}, {pipeline_mode = #tpu.pipeline_mode<synchronous>, transform_indices = @transform_4, window_bounds = array<i64: 1, 32>}, {pipeline_mode = #tpu.pipeline_mode<synchronous>, transform_indices = @transform_5, window_bounds = array<i64: 32, 32>}, {pipeline_mode = #tpu.pipeline_mode<synchronous>, transform_indices = @transform_6, window_bounds = array<i64: 1, 32>}, {pipeline_mode = #tpu.pipeline_mode<synchronous>, transform_indices = @transform_7, window_bounds = array<i64: 32, 32>}, {pipeline_mode = #tpu.pipeline_mode<synchronous>, transform_indices = @transform_8, window_bounds = array<i64: 1, 32>}, {pipeline_mode = #tpu.pipeline_mode<synchronous>, transform_indices = @transform_9, window_bounds = array<i64: 32, 32>}, {pipeline_mode = #tpu.pipeline_mode<synchronous>, transform_indices = @transform_10, window_bounds = array<i64: 1, 32>}, {transform_indices = @transform_11, window_bounds = array<i64: 1, 128, 32>}]} {
    %c0_i32 = arith.constant 0 : i32
    %0 = arith.cmpi eq, %arg1, %c0_i32 : i32
    %1 = arith.extui %0 : i1 to i32
    %c0_i32_0 = arith.constant 0 : i32
    %2 = arith.cmpi ne, %1, %c0_i32_0 : i32
    scf.if %2 {
      %c0_20 = arith.constant 0 : index
      %c0_21 = arith.constant 0 : index
      %c0_22 = arith.constant 0 : index
      %32 = vector.load %arg2[%c0_20, %c0_21, %c0_22] : memref<1x256x32xf32, #tpu.memory_space<vmem>>, vector<1x256x32xf32>
      %33 = vector.shape_cast %32 : vector<1x256x32xf32> to vector<256x32xf32>
      %34 = tpu.iota {dimensions = array<i32: 1>} : vector<1x32xi32>
      %c0_i32_23 = arith.constant 0 : i32
      %35 = vector.broadcast %c0_i32_23 : i32 to vector<1x32xi32>
      %36 = arith.cmpi sge, %34, %35 : vector<1x32xi32>
      %c8_i32 = arith.constant 8 : i32
      %37 = vector.broadcast %c8_i32 : i32 to vector<1x32xi32>
      %38 = arith.cmpi slt, %34, %37 : vector<1x32xi32>
      %39 = arith.andi %36, %38 : vector<1x32xi1>
      %40 = arith.extui %39 : vector<1x32xi1> to vector<1x32xi32>
      %41 = arith.sitofp %40 : vector<1x32xi32> to vector<1x32xf32>
      %c8_i32_24 = arith.constant 8 : i32
      %42 = vector.broadcast %c8_i32_24 : i32 to vector<1x32xi32>
      %43 = arith.cmpi sge, %34, %42 : vector<1x32xi32>
      %c16_i32 = arith.constant 16 : i32
      %44 = vector.broadcast %c16_i32 : i32 to vector<1x32xi32>
      %45 = arith.cmpi slt, %34, %44 : vector<1x32xi32>
      %46 = arith.andi %43, %45 : vector<1x32xi1>
      %47 = arith.extui %46 : vector<1x32xi1> to vector<1x32xi32>
      %48 = arith.sitofp %47 : vector<1x32xi32> to vector<1x32xf32>
      %c16_i32_25 = arith.constant 16 : i32
      %49 = vector.broadcast %c16_i32_25 : i32 to vector<1x32xi32>
      %50 = arith.cmpi sge, %34, %49 : vector<1x32xi32>
      %c24_i32 = arith.constant 24 : i32
      %51 = vector.broadcast %c24_i32 : i32 to vector<1x32xi32>
      %52 = arith.cmpi slt, %34, %51 : vector<1x32xi32>
      %53 = arith.andi %50, %52 : vector<1x32xi1>
      %54 = arith.extui %53 : vector<1x32xi1> to vector<1x32xi32>
      %55 = arith.sitofp %54 : vector<1x32xi32> to vector<1x32xf32>
      %c24_i32_26 = arith.constant 24 : i32
      %56 = vector.broadcast %c24_i32_26 : i32 to vector<1x32xi32>
      %57 = arith.cmpi sge, %34, %56 : vector<1x32xi32>
      %c32_i32 = arith.constant 32 : i32
      %58 = vector.broadcast %c32_i32 : i32 to vector<1x32xi32>
      %59 = arith.cmpi slt, %34, %58 : vector<1x32xi32>
      %60 = arith.andi %57, %59 : vector<1x32xi1>
      %61 = arith.extui %60 : vector<1x32xi1> to vector<1x32xi32>
      %62 = arith.sitofp %61 : vector<1x32xi32> to vector<1x32xf32>
      %cst_27 = arith.constant dense<0.000000e+00> : vector<32xf32>
      %63 = vector.multi_reduction <add>, %33, %cst_27 [0] : vector<256x32xf32> to vector<32xf32>
      %64 = vector.shape_cast %63 : vector<32xf32> to vector<1x32xf32>
      %cst_28 = arith.constant 0.000000e+00 : f32
      %65 = vector.broadcast %cst_28 : f32 to vector<1x32xf32>
      %66 = arith.mulf %64, %41 : vector<1x32xf32>
      %67 = vector.shape_cast %66 : vector<1x32xf32> to vector<1x1x32xf32>
      %cst_29 = arith.constant dense<0.000000e+00> : vector<1xf32>
      %68 = vector.multi_reduction <add>, %67, %cst_29 [1, 2] : vector<1x1x32xf32> to vector<1xf32>
      %69 = vector.shape_cast %68 : vector<1xf32> to vector<1x1x1xf32>
      %70 = vector.extract %69[0, 0, 0] : f32 from vector<1x1x1xf32>
      %71 = vector.broadcast %70 : f32 to vector<1x1xf32>
      %cst_30 = arith.constant 2.048000e+03 : f32
      %72 = vector.broadcast %cst_30 : f32 to vector<1x1xf32>
      %73 = arith.divf %71, %72 : vector<1x1xf32>
      %74 = vector.broadcast %73 : vector<1x1xf32> to vector<1x32xf32>
      %75 = arith.mulf %41, %74 : vector<1x32xf32>
      %76 = arith.addf %65, %75 : vector<1x32xf32>
      %77 = arith.mulf %64, %48 : vector<1x32xf32>
      %78 = vector.shape_cast %77 : vector<1x32xf32> to vector<1x1x32xf32>
      %cst_31 = arith.constant dense<0.000000e+00> : vector<1xf32>
      %79 = vector.multi_reduction <add>, %78, %cst_31 [1, 2] : vector<1x1x32xf32> to vector<1xf32>
      %80 = vector.shape_cast %79 : vector<1xf32> to vector<1x1x1xf32>
      %81 = vector.extract %80[0, 0, 0] : f32 from vector<1x1x1xf32>
      %82 = vector.broadcast %81 : f32 to vector<1x1xf32>
      %cst_32 = arith.constant 2.048000e+03 : f32
      %83 = vector.broadcast %cst_32 : f32 to vector<1x1xf32>
      %84 = arith.divf %82, %83 : vector<1x1xf32>
      %85 = vector.broadcast %84 : vector<1x1xf32> to vector<1x32xf32>
      %86 = arith.mulf %48, %85 : vector<1x32xf32>
      %87 = arith.addf %76, %86 : vector<1x32xf32>
      %88 = arith.mulf %64, %55 : vector<1x32xf32>
      %89 = vector.shape_cast %88 : vector<1x32xf32> to vector<1x1x32xf32>
      %cst_33 = arith.constant dense<0.000000e+00> : vector<1xf32>
      %90 = vector.multi_reduction <add>, %89, %cst_33 [1, 2] : vector<1x1x32xf32> to vector<1xf32>
      %91 = vector.shape_cast %90 : vector<1xf32> to vector<1x1x1xf32>
      %92 = vector.extract %91[0, 0, 0] : f32 from vector<1x1x1xf32>
      %93 = vector.broadcast %92 : f32 to vector<1x1xf32>
      %cst_34 = arith.constant 2.048000e+03 : f32
      %94 = vector.broadcast %cst_34 : f32 to vector<1x1xf32>
      %95 = arith.divf %93, %94 : vector<1x1xf32>
      %96 = vector.broadcast %95 : vector<1x1xf32> to vector<1x32xf32>
      %97 = arith.mulf %55, %96 : vector<1x32xf32>
      %98 = arith.addf %87, %97 : vector<1x32xf32>
      %99 = arith.mulf %64, %62 : vector<1x32xf32>
      %100 = vector.shape_cast %99 : vector<1x32xf32> to vector<1x1x32xf32>
      %cst_35 = arith.constant dense<0.000000e+00> : vector<1xf32>
      %101 = vector.multi_reduction <add>, %100, %cst_35 [1, 2] : vector<1x1x32xf32> to vector<1xf32>
      %102 = vector.shape_cast %101 : vector<1xf32> to vector<1x1x1xf32>
      %103 = vector.extract %102[0, 0, 0] : f32 from vector<1x1x1xf32>
      %104 = vector.broadcast %103 : f32 to vector<1x1xf32>
      %cst_36 = arith.constant 2.048000e+03 : f32
      %105 = vector.broadcast %cst_36 : f32 to vector<1x1xf32>
      %106 = arith.divf %104, %105 : vector<1x1xf32>
      %107 = vector.broadcast %106 : vector<1x1xf32> to vector<1x32xf32>
      %108 = arith.mulf %62, %107 : vector<1x32xf32>
      %109 = arith.addf %98, %108 : vector<1x32xf32>
      %110 = vector.broadcast %109 : vector<1x32xf32> to vector<256x32xf32>
      %111 = arith.subf %33, %110 : vector<256x32xf32>
      %112 = arith.mulf %111, %111 : vector<256x32xf32>
      %cst_37 = arith.constant dense<0.000000e+00> : vector<32xf32>
      %113 = vector.multi_reduction <add>, %112, %cst_37 [0] : vector<256x32xf32> to vector<32xf32>
      %114 = vector.shape_cast %113 : vector<32xf32> to vector<1x32xf32>
      %cst_38 = arith.constant 0.000000e+00 : f32
      %115 = vector.broadcast %cst_38 : f32 to vector<1x32xf32>
      %116 = arith.mulf %114, %41 : vector<1x32xf32>
      %117 = vector.shape_cast %116 : vector<1x32xf32> to vector<1x1x32xf32>
      %cst_39 = arith.constant dense<0.000000e+00> : vector<1xf32>
      %118 = vector.multi_reduction <add>, %117, %cst_39 [1, 2] : vector<1x1x32xf32> to vector<1xf32>
      %119 = vector.shape_cast %118 : vector<1xf32> to vector<1x1x1xf32>
      %120 = vector.extract %119[0, 0, 0] : f32 from vector<1x1x1xf32>
      %121 = vector.broadcast %120 : f32 to vector<1x1xf32>
      %cst_40 = arith.constant 2.048000e+03 : f32
      %122 = vector.broadcast %cst_40 : f32 to vector<1x1xf32>
      %123 = arith.divf %121, %122 : vector<1x1xf32>
      %124 = vector.broadcast %123 : vector<1x1xf32> to vector<1x32xf32>
      %125 = arith.mulf %41, %124 : vector<1x32xf32>
      %126 = arith.addf %115, %125 : vector<1x32xf32>
      %127 = arith.mulf %114, %48 : vector<1x32xf32>
      %128 = vector.shape_cast %127 : vector<1x32xf32> to vector<1x1x32xf32>
      %cst_41 = arith.constant dense<0.000000e+00> : vector<1xf32>
      %129 = vector.multi_reduction <add>, %128, %cst_41 [1, 2] : vector<1x1x32xf32> to vector<1xf32>
      %130 = vector.shape_cast %129 : vector<1xf32> to vector<1x1x1xf32>
      %131 = vector.extract %130[0, 0, 0] : f32 from vector<1x1x1xf32>
      %132 = vector.broadcast %131 : f32 to vector<1x1xf32>
      %cst_42 = arith.constant 2.048000e+03 : f32
      %133 = vector.broadcast %cst_42 : f32 to vector<1x1xf32>
      %134 = arith.divf %132, %133 : vector<1x1xf32>
      %135 = vector.broadcast %134 : vector<1x1xf32> to vector<1x32xf32>
      %136 = arith.mulf %48, %135 : vector<1x32xf32>
      %137 = arith.addf %126, %136 : vector<1x32xf32>
      %138 = arith.mulf %114, %55 : vector<1x32xf32>
      %139 = vector.shape_cast %138 : vector<1x32xf32> to vector<1x1x32xf32>
      %cst_43 = arith.constant dense<0.000000e+00> : vector<1xf32>
      %140 = vector.multi_reduction <add>, %139, %cst_43 [1, 2] : vector<1x1x32xf32> to vector<1xf32>
      %141 = vector.shape_cast %140 : vector<1xf32> to vector<1x1x1xf32>
      %142 = vector.extract %141[0, 0, 0] : f32 from vector<1x1x1xf32>
      %143 = vector.broadcast %142 : f32 to vector<1x1xf32>
      %cst_44 = arith.constant 2.048000e+03 : f32
      %144 = vector.broadcast %cst_44 : f32 to vector<1x1xf32>
      %145 = arith.divf %143, %144 : vector<1x1xf32>
      %146 = vector.broadcast %145 : vector<1x1xf32> to vector<1x32xf32>
      %147 = arith.mulf %55, %146 : vector<1x32xf32>
      %148 = arith.addf %137, %147 : vector<1x32xf32>
      %149 = arith.mulf %114, %62 : vector<1x32xf32>
      %150 = vector.shape_cast %149 : vector<1x32xf32> to vector<1x1x32xf32>
      %cst_45 = arith.constant dense<0.000000e+00> : vector<1xf32>
      %151 = vector.multi_reduction <add>, %150, %cst_45 [1, 2] : vector<1x1x32xf32> to vector<1xf32>
      %152 = vector.shape_cast %151 : vector<1xf32> to vector<1x1x1xf32>
      %153 = vector.extract %152[0, 0, 0] : f32 from vector<1x1x1xf32>
      %154 = vector.broadcast %153 : f32 to vector<1x1xf32>
      %cst_46 = arith.constant 2.048000e+03 : f32
      %155 = vector.broadcast %cst_46 : f32 to vector<1x1xf32>
      %156 = arith.divf %154, %155 : vector<1x1xf32>
      %157 = vector.broadcast %156 : vector<1x1xf32> to vector<1x32xf32>
      %158 = arith.mulf %62, %157 : vector<1x32xf32>
      %159 = arith.addf %148, %158 : vector<1x32xf32>
      %cst_47 = arith.constant 9.99999974E-6 : f32
      %160 = vector.broadcast %cst_47 : f32 to vector<1x32xf32>
      %161 = arith.addf %159, %160 : vector<1x32xf32>
      %162 = math.rsqrt %161 : vector<1x32xf32>
      %163 = vector.broadcast %162 : vector<1x32xf32> to vector<256x32xf32>
      %164 = arith.mulf %111, %163 : vector<256x32xf32>
      %c0_48 = arith.constant 0 : index
      %c0_49 = arith.constant 0 : index
      %165 = vector.load %arg3[%c0_48, %c0_49] : memref<1x32xf32, #tpu.memory_space<vmem>>, vector<1x32xf32>
      %166 = vector.broadcast %165 : vector<1x32xf32> to vector<256x32xf32>
      %167 = arith.mulf %164, %166 : vector<256x32xf32>
      %c0_50 = arith.constant 0 : index
      %c0_51 = arith.constant 0 : index
      %168 = vector.load %arg4[%c0_50, %c0_51] : memref<1x32xf32, #tpu.memory_space<vmem>>, vector<1x32xf32>
      %169 = vector.broadcast %168 : vector<1x32xf32> to vector<256x32xf32>
      %170 = arith.addf %167, %169 : vector<256x32xf32>
      %c0_52 = arith.constant 0 : index
      %c0_53 = arith.constant 0 : index
      %171 = vector.load %arg14[%c0_52, %c0_53] : memref<256x32xf32, #tpu.memory_space<vmem>>, vector<256x32xf32>
      tpu.vector_store %arg14[%c0_52, %c0_53], %170 {strides = array<i32>} : memref<256x32xf32, #tpu.memory_space<vmem>>, vector<256x32xf32>,
      %c0_54 = arith.constant 0 : index
      %c0_55 = arith.constant 0 : index
      %172 = vector.load %arg7[%c0_54, %c0_55] : memref<32x32xf32, #tpu.memory_space<vmem>>, vector<32x32xf32>
      %cst_56 = arith.constant dense<0.000000e+00> : vector<256x32xf32>
      %173 = tpu.matmul %170, %172, %cst_56 {dimension_numbers = #tpu.dot_dimension_numbers<[1], [0], [0], [1], [0, 0, 1, 1], [], []>} : vector<256x32xf32>, vector<32x32xf32>, vector<256x32xf32> -> vector<256x32xf32>
      %c0_57 = arith.constant 0 : index
      %c0_58 = arith.constant 0 : index
      %174 = vector.load %arg8[%c0_57, %c0_58] : memref<1x32xf32, #tpu.memory_space<vmem>>, vector<1x32xf32>
      %175 = vector.broadcast %174 : vector<1x32xf32> to vector<256x32xf32>
      %176 = arith.addf %173, %175 : vector<256x32xf32>
      %c0_59 = arith.constant 0 : index
      %c0_60 = arith.constant 0 : index
      %177 = vector.load %arg15[%c0_59, %c0_60] : memref<256x32xf32, #tpu.memory_space<vmem>>, vector<256x32xf32>
      tpu.vector_store %arg15[%c0_59, %c0_60], %176 {strides = array<i32>} : memref<256x32xf32, #tpu.memory_space<vmem>>, vector<256x32xf32>,
      %c0_61 = arith.constant 0 : index
      %c0_62 = arith.constant 0 : index
      %178 = vector.load %arg9[%c0_61, %c0_62] : memref<32x32xf32, #tpu.memory_space<vmem>>, vector<32x32xf32>
      %cst_63 = arith.constant dense<0.000000e+00> : vector<256x32xf32>
      %179 = tpu.matmul %170, %178, %cst_63 {dimension_numbers = #tpu.dot_dimension_numbers<[1], [0], [0], [1], [0, 0, 1, 1], [], []>} : vector<256x32xf32>, vector<32x32xf32>, vector<256x32xf32> -> vector<256x32xf32>
      %c0_64 = arith.constant 0 : index
      %c0_65 = arith.constant 0 : index
      %180 = vector.load %arg10[%c0_64, %c0_65] : memref<1x32xf32, #tpu.memory_space<vmem>>, vector<1x32xf32>
      %181 = vector.broadcast %180 : vector<1x32xf32> to vector<256x32xf32>
      %182 = arith.addf %179, %181 : vector<256x32xf32>
      %c0_66 = arith.constant 0 : index
      %c0_67 = arith.constant 0 : index
      %183 = vector.load %arg16[%c0_66, %c0_67] : memref<256x32xf32, #tpu.memory_space<vmem>>, vector<256x32xf32>
      tpu.vector_store %arg16[%c0_66, %c0_67], %182 {strides = array<i32>} : memref<256x32xf32, #tpu.memory_space<vmem>>, vector<256x32xf32>,
    } else {
    }
    %c128_i32 = arith.constant 128 : i32
    %3 = arith.muli %arg1, %c128_i32 : i32
    %4 = tpu.assume_multiple %3, 128 : i32
    %5 = arith.index_cast %4 : i32 to index
    %c0 = arith.constant 0 : index
    %6 = vector.load %arg14[%5, %c0] : memref<256x32xf32, #tpu.memory_space<vmem>>, vector<128x32xf32>
    %c0_1 = arith.constant 0 : index
    %c0_2 = arith.constant 0 : index
    %7 = vector.load %arg5[%c0_1, %c0_2] : memref<32x32xf32, #tpu.memory_space<vmem>>, vector<32x32xf32>
    %cst = arith.constant dense<0.000000e+00> : vector<128x32xf32>
    %8 = tpu.matmul %6, %7, %cst {dimension_numbers = #tpu.dot_dimension_numbers<[1], [0], [0], [1], [0, 0, 1, 1], [], []>} : vector<128x32xf32>, vector<32x32xf32>, vector<128x32xf32> -> vector<128x32xf32>
    %c0_3 = arith.constant 0 : index
    %c0_4 = arith.constant 0 : index
    %9 = vector.load %arg6[%c0_3, %c0_4] : memref<1x32xf32, #tpu.memory_space<vmem>>, vector<1x32xf32>
    %10 = vector.broadcast %9 : vector<1x32xf32> to vector<128x32xf32>
    %11 = arith.addf %8, %10 : vector<128x32xf32>
    %cst_5 = arith.constant 0.176776692 : f32
    %12 = vector.broadcast %cst_5 : f32 to vector<128x32xf32>
    %13 = arith.mulf %11, %12 : vector<128x32xf32>
    %cst_6 = arith.constant 0xFF800000 : f32
    %14 = vector.broadcast %cst_6 : f32 to vector<128x1xf32>
    %cst_7 = arith.constant 0.000000e+00 : f32
    %15 = vector.broadcast %cst_7 : f32 to vector<128x1xf32>
    %cst_8 = arith.constant 0.000000e+00 : f32
    %16 = vector.broadcast %cst_8 : f32 to vector<128x32xf32>
    %c0_i32_9 = arith.constant 0 : i32
    %c2_i32 = arith.constant 2 : i32
    %17 = arith.addi %c0_i32_9, %c2_i32 : i32
    %c1_i32 = arith.constant 1 : i32
    %18:3 = scf.for %arg17 = %c0_i32_9 to %17 step %c1_i32 iter_args(%arg18 = %14, %arg19 = %15, %arg20 = %16) -> (vector<128x1xf32>, vector<128x1xf32>, vector<128x32xf32>)  : i32 {
      %c128_i32_20 = arith.constant 128 : i32
      %32 = arith.muli %arg17, %c128_i32_20 : i32
      %33 = tpu.assume_multiple %32, 128 : i32
      %34 = arith.index_cast %33 : i32 to index
      %c0_21 = arith.constant 0 : index
      %35 = vector.load %arg15[%34, %c0_21] : memref<256x32xf32, #tpu.memory_space<vmem>>, vector<128x32xf32>
      %36 = arith.index_cast %33 : i32 to index
      %c0_22 = arith.constant 0 : index
      %37 = vector.load %arg16[%36, %c0_22] : memref<256x32xf32, #tpu.memory_space<vmem>>, vector<128x32xf32>
      %cst_23 = arith.constant dense<0.000000e+00> : vector<128x128xf32>
      %38 = tpu.matmul %13, %35, %cst_23 {dimension_numbers = #tpu.dot_dimension_numbers<[1], [1], [0], [0], [0, 0, 1, 0], [], []>} : vector<128x32xf32>, vector<128x32xf32>, vector<128x128xf32> -> vector<128x128xf32>
      %cst_24 = arith.constant dense<0xFF800000> : vector<128xf32>
      %39 = vector.multi_reduction <maximumf>, %38, %cst_24 [1] : vector<128x128xf32> to vector<128xf32>
      %40 = vector.shape_cast %39 : vector<128xf32> to vector<128x1xf32>
      %41 = arith.maximumf %arg18, %40 : vector<128x1xf32>
      %42 = arith.subf %arg18, %41 : vector<128x1xf32>
      %43 = math.exp %42 : vector<128x1xf32>
      %44 = vector.broadcast %41 : vector<128x1xf32> to vector<128x128xf32>
      %45 = arith.subf %38, %44 : vector<128x128xf32>
      %46 = math.exp %45 : vector<128x128xf32>
      %47 = arith.mulf %43, %arg19 : vector<128x1xf32>
      %cst_25 = arith.constant dense<0.000000e+00> : vector<128xf32>
      %48 = vector.multi_reduction <add>, %46, %cst_25 [1] : vector<128x128xf32> to vector<128xf32>
      %49 = vector.shape_cast %48 : vector<128xf32> to vector<128x1xf32>
      %50 = arith.addf %47, %49 : vector<128x1xf32>
      %51 = vector.broadcast %43 : vector<128x1xf32> to vector<128x32xf32>
      %52 = arith.mulf %51, %arg20 : vector<128x32xf32>
      %cst_26 = arith.constant dense<0.000000e+00> : vector<128x32xf32>
      %53 = tpu.matmul %46, %37, %cst_26 {dimension_numbers = #tpu.dot_dimension_numbers<[1], [0], [0], [1], [0, 0, 1, 1], [], []>} : vector<128x128xf32>, vector<128x32xf32>, vector<128x32xf32> -> vector<128x32xf32>
      %54 = arith.addf %52, %53 : vector<128x32xf32>
      scf.yield %41, %50, %54 : vector<128x1xf32>, vector<128x1xf32>, vector<128x32xf32>
    }
    %c2_i32_10 = arith.constant 2 : i32
    %cst_11 = arith.constant 1.000000e+00 : f32
    %19 = vector.broadcast %cst_11 : f32 to vector<128x1xf32>
    %20 = arith.divf %19, %18#1 : vector<128x1xf32>
    %21 = vector.broadcast %20 : vector<128x1xf32> to vector<128x32xf32>
    %22 = arith.mulf %18#2, %21 : vector<128x32xf32>
    %c0_12 = arith.constant 0 : index
    %c0_13 = arith.constant 0 : index
    %23 = vector.load %arg11[%c0_12, %c0_13] : memref<32x32xf32, #tpu.memory_space<vmem>>, vector<32x32xf32>
    %cst_14 = arith.constant dense<0.000000e+00> : vector<128x32xf32>
    %24 = tpu.matmul %22, %23, %cst_14 {dimension_numbers = #tpu.dot_dimension_numbers<[1], [0], [0], [1], [0, 0, 1, 1], [], []>} : vector<128x32xf32>, vector<32x32xf32>, vector<128x32xf32> -> vector<128x32xf32>
    %c0_15 = arith.constant 0 : index
    %c0_16 = arith.constant 0 : index
    %25 = vector.load %arg12[%c0_15, %c0_16] : memref<1x32xf32, #tpu.memory_space<vmem>>, vector<1x32xf32>
    %26 = vector.broadcast %25 : vector<1x32xf32> to vector<128x32xf32>
    %27 = arith.addf %24, %26 : vector<128x32xf32>
    %28 = arith.addf %6, %27 : vector<128x32xf32>
    %c0_17 = arith.constant 0 : index
    %c0_18 = arith.constant 0 : index
    %c0_19 = arith.constant 0 : index
    %29 = vector.load %arg13[%c0_17, %c0_18, %c0_19] : memref<1x128x32xf32, #tpu.memory_space<vmem>>, vector<1x128x32xf32>
    %30 = vector.shape_cast %29 : vector<1x128x32xf32> to vector<128x32xf32>
    %31 = vector.shape_cast %28 : vector<128x32xf32> to vector<1x128x32xf32>
    tpu.vector_store %arg13[%c0_17, %c0_18, %c0_19], %31 {strides = array<i32>} : memref<1x128x32xf32, #tpu.memory_space<vmem>>, vector<1x128x32xf32>,
    return
  }
  func.func @transform_0(%arg0: i32, %arg1: i32) -> (i32, i32, i32) {
    %c0_i32 = arith.constant 0 : i32
    %c0_i32_0 = arith.constant 0 : i32
    %c0_i32_1 = arith.constant 0 : i32
    return %arg0, %c0_i32, %c0_i32_0 : i32, i32, i32
  }
  func.func @transform_1(%arg0: i32, %arg1: i32) -> (i32, i32) {
    %c0_i32 = arith.constant 0 : i32
    %c0_i32_0 = arith.constant 0 : i32
    %c0_i32_1 = arith.constant 0 : i32
    return %c0_i32, %c0_i32_0 : i32, i32
  }
  func.func @transform_2(%arg0: i32, %arg1: i32) -> (i32, i32) {
    %c0_i32 = arith.constant 0 : i32
    %c0_i32_0 = arith.constant 0 : i32
    %c0_i32_1 = arith.constant 0 : i32
    return %c0_i32, %c0_i32_0 : i32, i32
  }
  func.func @transform_3(%arg0: i32, %arg1: i32) -> (i32, i32) {
    %c0_i32 = arith.constant 0 : i32
    %c0_i32_0 = arith.constant 0 : i32
    %c0_i32_1 = arith.constant 0 : i32
    return %c0_i32, %c0_i32_0 : i32, i32
  }
  func.func @transform_4(%arg0: i32, %arg1: i32) -> (i32, i32) {
    %c0_i32 = arith.constant 0 : i32
    %c0_i32_0 = arith.constant 0 : i32
    %c0_i32_1 = arith.constant 0 : i32
    return %c0_i32, %c0_i32_0 : i32, i32
  }
  func.func @transform_5(%arg0: i32, %arg1: i32) -> (i32, i32) {
    %c0_i32 = arith.constant 0 : i32
    %c0_i32_0 = arith.constant 0 : i32
    %c0_i32_1 = arith.constant 0 : i32
    return %c0_i32, %c0_i32_0 : i32, i32
  }
  func.func @transform_6(%arg0: i32, %arg1: i32) -> (i32, i32) {
    %c0_i32 = arith.constant 0 : i32
    %c0_i32_0 = arith.constant 0 : i32
    %c0_i32_1 = arith.constant 0 : i32
    return %c0_i32, %c0_i32_0 : i32, i32
  }
  func.func @transform_7(%arg0: i32, %arg1: i32) -> (i32, i32) {
    %c0_i32 = arith.constant 0 : i32
    %c0_i32_0 = arith.constant 0 : i32
    %c0_i32_1 = arith.constant 0 : i32
    return %c0_i32, %c0_i32_0 : i32, i32
  }
  func.func @transform_8(%arg0: i32, %arg1: i32) -> (i32, i32) {
    %c0_i32 = arith.constant 0 : i32
    %c0_i32_0 = arith.constant 0 : i32
    %c0_i32_1 = arith.constant 0 : i32
    return %c0_i32, %c0_i32_0 : i32, i32
  }
  func.func @transform_9(%arg0: i32, %arg1: i32) -> (i32, i32) {
    %c0_i32 = arith.constant 0 : i32
    %c0_i32_0 = arith.constant 0 : i32
    %c0_i32_1 = arith.constant 0 : i32
    return %c0_i32, %c0_i32_0 : i32, i32
  }
  func.func @transform_10(%arg0: i32, %arg1: i32) -> (i32, i32) {
    %c0_i32 = arith.constant 0 : i32
    %c0_i32_0 = arith.constant 0 : i32
    %c0_i32_1 = arith.constant 0 : i32
    return %c0_i32, %c0_i32_0 : i32, i32
  }
  func.func @transform_11(%arg0: i32, %arg1: i32) -> (i32, i32, i32) {
    %c0_i32 = arith.constant 0 : i32
    %c0_i32_0 = arith.constant 0 : i32
    return %arg0, %arg1, %c0_i32 : i32, i32, i32
  }
}

</mosaic_0001>

<bundles_post_ra>
// kernel: attention_block.1
= control target key start
LH: loop header
LB: loop body
LE: loop exit
PB: predicated region body
PF: predicated region fallthrough
CT: control target
= control target key end

     0   :  { %s7256_s0 = inlined_call_operand.hbm [shape: f32[2,256,32], index: 0, kind: input, shape index: {}]   ;;  %s7257_s1 = inlined_call_operand.vmem [shape: f32[1,32], index: 1, kind: input, shape index: {}]   ;;  %s7258_s2 = inlined_call_operand.vmem [shape: f32[1,32], index: 2, kind: input, shape index: {}]   ;;  %s7259_s3 = inlined_call_operand.vmem [shape: f32[32,32], index: 3, kind: input, shape index: {}]   ;;  %s7260_s4 = inlined_call_operand.vmem [shape: f32[1,32], index: 4, kind: input, shape index: {}]   ;;  %s7261_s5 = inlined_call_operand.vmem [shape: f32[32,32], index: 5, kind: input, shape index: {}]   ;;  %s7262_s6 = inlined_call_operand.vmem [shape: f32[1,32], index: 6, kind: input, shape index: {}]   ;;  %s7263_s7 = inlined_call_operand.vmem [shape: f32[32,32], index: 7, kind: input, shape index: {}]   ;;  %s7264_s8 = inlined_call_operand.vmem [shape: f32[1,32], index: 8, kind: input, shape index: {}]   ;;  %s7265_s9 = inlined_call_operand.vmem [shape: f32[32,32], index: 9, kind: input, shape index: {}]   ;;  %s7266_s10 = inlined_call_operand.vmem [shape: f32[1,32], index: 10, kind: input, shape index: {}]   ;;  %s7267_s11 = inlined_call_operand.hbm [shape: f32[2,256,32], index: 11, kind: output, shape index: {}]  }
   0x1   :  { %7315 = sst [smem:[#allocation95_spill]] %s7260_s4 }
   0x2   :  { %7316 = sst [smem:[#allocation96_spill]] %s7265_s9 }
   0x3   :  { %7317 = sst [smem:[#allocation97_spill]] %s7266_s10 }
   0x4   :  { %7318 = sst [smem:[#allocation98_spill]] %s7267_s11 }
   0x5   :  { %16 = vsyncpa [#allocation6], 0 }
   0x6   :  { %18 = vsyncpa [#allocation6 + $0x1], 0 }
   0x7   :  { %19 = vsyncpa [#allocation7], 0 }
   0x8   :  { %21 = vsyncpa [#allocation7 + $0x1], 0  ;;  %s5043_s17 = smov 0   ;;  %s5045_s18 = smov 0  }
   0x9   :  { %s5047_s19 = smov 0   ;;  %s5049_s20 = smov 0  }
   0xa   :  { %s5051_s21 = smov 0   ;;  %s5053_s22 = smov 0  }
   0xb   :  { %s5055_s23 = smov 0   ;;  %s5057_s24 = smov 0  }
   0xc   :  { %s5059_s25 = smov 0   ;;  %s5061_s26 = smov 0  }
   0xd   :  { %s5063_s27 = smov 0  }
   0xe LB: > { %7319 = sst [smem:[#allocation11_spill]] %s4766_s24  ;;  %s3075_s28 = sadd.s32 4294967295, %s4778_s27   ;;  %s4778_s27 = sphi %s5063_s27, %s27_s27   ;;  %s4774_s26 = sphi %s5061_s26, %s7601_s26   ;;  %s4770_s25 = sphi %s5059_s25, %s7608_s25   ;;  %s4766_s24 = sphi %s5057_s24, %s7599_s24   ;;  %s4762_s23 = sphi %s5055_s23, %s7598_s23   ;;  %s4758_s22 = sphi %s5053_s22, %s7607_s22   ;;  %s4754_s21 = sphi %s5051_s21, %s7606_s21   ;;  %s4750_s20 = sphi %s5049_s20, %s7605_s20   ;;  %s4746_s19 = sphi %s5047_s19, %s7604_s19   ;;  %s4742_s18 = sphi %s5045_s18, %s7603_s18   ;;  %s4738_s17 = sphi %s5043_s17, %s7602_s17  }
   0xf   : > { %7320 = sst [smem:[#allocation12_spill]] %s4770_s25  ;;  %s3076_s29 = sadd.s32 4294967294, %s4778_s27  }
  0x10   : > { %7321 = sst [smem:[#allocation13_spill]] %s4774_s26  ;;  %s36_s30 = sadd.s32 1, %s4770_s25 }
  0x11   : > { %s39_s12 = sadd.s32 1, %s4774_s26  ;;  %p37_p0 = scmp.ge.s32.totalorder %s36_s30, 2 }
  0x12   : > { %s46_s13 = sadd.s32 1, %s4758_s22  ;;  %p53_p1 = scmp.ne.s32.totalorder %s4758_s22, %s4754_s21 }
  0x13   : > { %p54_p2 = scmp.eq.s32.totalorder %s4778_s27, 0  ;;  %s7610_s30 = smov (%p37_p0, %s36_s30), 0 }
  0x14   : > { %7322 = sst [smem:[#allocation14_spill]] %s7610_s30  ;;  %s7612_s12 = smov (!%p37_p0, %s39_s12), %s4774_s26 }
  0x15   : > { %p5107_p3 = por %p54_p2, %p53_p1  ;;  %p59_p4 = scmp.ne.s32.totalorder %s4754_s21, %s4750_s20 }
  0x16   : > { %p41_p5 = scmp.ge.s32.totalorder %s7612_s12, 2  ;;  %p60_p6 = scmp.eq.s32.totalorder %s3075_s28, 0 }
  0x17   : > { %s280_s15 = ssub.s32 %s4770_s25, %s7610_s30  ;;  %s284_s16 = sadd.s32 1, %s4746_s19 }
  0x18   : > { %s7614_s12 = smov (%p41_p5, %s7612_s12), 0  ;;  %p5117_p7 = por %p60_p6, %p59_p4 }
  0x19   : > { %7324 = sst [smem:[#allocation15_spill]] %s7614_s12  ;;  %p294_p8 = scmp.ne.s32.totalorder %s4746_s19, %s4742_s18 }
  0x1a   : > { %s43_s24 = ssub.s32 %s4774_s26, %s7614_s12  ;;  %p295_p9 = scmp.eq.s32.totalorder %s3075_s28, 3 }
  0x1b   : > { %p44_p10 = scmp.eq.s32.totalorder %s43_s24, 0  ;;  %s281_s20 = sor.u32 %s280_s15, %s43_s24 }
  0x1c   : > { %p282_p11 = scmp.eq.s32.totalorder %s281_s20, 0  ;;  %p5125_p12 = por %p295_p9, %p294_p8 }
  0x1d   : > { %s5130_s25 = scalar_select %p44_p10, %s4758_s22, %s46_s13  }
  0x1e   : > { %s7326_s30 = scalar_select %p5125_p12, 1, 0 }
  0x1f   : > { %s5133_s10 = scalar_select %p282_p11, %s4746_s19, %s284_s16  }
  0x20   : > { %p300_p13 = scmp.ne.s32.totalorder %s4742_s18, %s4738_s17  ;;  %p301_p0 = scmp.eq.s32.totalorder %s3076_s29, 3 }
  0x21   : > { %p3845_p1 = scmp.lt.s32.totalorder %s4778_s27, 4  ;;  %s351_s28 = sand.u32 1, %s4758_s22  }
  0x22   : > { %p5138_p2 = por %p301_p0, %p300_p13  ;;  %s3079_s24 = sshll.u32 %s351_s28, 8 }
  0x23   : > { %s3232_s15 = sshll.u32 %s4774_s26, 12  ;;  %s355_s13 = scalar_lea.vmem [#allocation5], %s3079_s24 }
  0x24   : > { %s7327_s9 = scalar_select %p5138_p2, 1, 0 }
  0x25   : > { %s5147_s4 = scalar_lea.hbm %s7256_s0, %s3232_s15  ;;  %s362_s16 = sshll.u32 %s355_s13, 4  ;;  %s5149_s16 = int_to_ptr.vmem [resolvable:$true] %s362_s16 }
  0x26   : > { %p5153_p4 = pnand %p3845_p1, %p5107_p3  ;;  %s5158_s26 = scalar_lea.sflag [#allocation6], %s351_s28 }
  0x27   : > { %s4430_s12 = scalar_lea.hbm %s5147_s4, 4096  ;;  %s4435_s14 = scalar_lea.hbm %s7256_s0, 8192 }
  0x28   : > { %p4431_p6 = scmp.ne.s32.totalorder %s5147_s4, %s4430_s12  ;;  %p4432_p8 = pneg %p5153_p4 }
  0x29   : > { %p4436_p3 = scmp.lt.u32.totalorder %s5147_s4, %s7256_s0  ;;  %p4437_p11 = scmp.lt.u32.totalorder %s4435_s14, %s4430_s12 }
  0x2a   : > { %p4433_p9 = pnand %p4432_p8, %p4431_p6  ;;  %p4439_p0 = scmp.lt.u32.totalorder %s4430_s12, %s5147_s4 }
  0x2b   : > { %p4438_p13 = por %p4437_p11, %p4436_p3 }
  0x2c   : > { %p4434_p10 = pneg %p4433_p9 }
  0x2d   : > { %p4440_p1 = por %p4439_p0, %p4438_p13 }
  0x2f   : > { %p4441_p5 = pnand %p4440_p1, %p4434_p10 }
  0x31   : > { %4444 = shalt.err (!%p4441_p5)
}
  0x32   : > { %s4445_s28 = scalar_lea.vmem %s5149_s16, 4096  ;;  %s4976_s24 = smov [#allocation5]  }
  0x33   : > { %p4446_p6 = scmp.ne.s32.totalorder %s5149_s16, %s4445_s28  ;;  %s4450_s15 = sshll.u32 %s4976_s24, 4  ;;  %s4451_s15 = int_to_ptr.vmem [resolvable:$false] %s4450_s15 }
  0x34   : > { %s4452_s20 = scalar_lea.vmem %s4451_s15, 8192  ;;  %p4453_p12 = scmp.lt.s32.totalorder %s5149_s16, %s4451_s15 }
  0x35   : > { %p4448_p9 = pnand %p4446_p6, %p4432_p8  ;;  %p4454_p3 = scmp.lt.s32.totalorder %s4452_s20, %s4445_s28 }
  0x37   : > { %p4449_p2 = pneg %p4448_p9  ;;  %p4455_p11 = por %p4454_p3, %p4453_p12 }
  0x39   : > { %p4456_p13 = pnand %p4455_p11, %p4449_p2 }
  0x3b   : > { %4459 = shalt.err (!%p4456_p13)
}
  0x3c   : > { %s4977_s12 = smov 128   ;;  %s4978_s14 = smov 8  }
  0x3d   : > { %3840 = dma.hbm_to_vmem [thread:$0]  (!%p5153_p4), %s5147_s4, 4096, %s5149_s16, %s5158_s26, %s4977_s12, %s4977_s12, %s4978_s14  }
  0x3e   : > { %p370_p5 = scmp.lt.s32.totalorder %s4778_s27, 5  ;;  %p7329_p8 = scmp.ge.s32.totalorder %s4778_s27, 1 }
  0x40   : > { %p371_p10 = pnand %p7329_p8, %p370_p5 }
  0x42   : > { %374 = sbr.rel (%p371_p10) target bundleno = 2164 (0x874), region = 64 }
  0x49   : > { %s376_s13 = sand.u32 1, %s4754_s21  }
  0x4a   : > { %s3083_s28 = sshll.u32 %s376_s13, 8  ;;  %s377_s24 = scalar_lea.sflag [#allocation6], %s376_s13 }
  0x4b   : > { %s5190_s15 = scalar_lea.vmem [#allocation5], %s3083_s28 }
  0x4c   : > { %4729 = dma.done.wait (%p5117_p7), %s377_s24, 4096  }
  0x4d   : > { %4731 = vsyncadd (%p5117_p7), %s377_s24, 4294963200  ;;  %s7275_s29 = sand.u32 1, %s4742_s18   ;;  %p3085_p12 = scmp.ne.s32.totalorder %s4762_s23, 0 }
  0x4e   : > { %s3084_s4 = sshll.u32 %s7275_s29, 7  ;;  %v5203_v0 = vld [vmem:[%s5190_s15] sm:$0xff] (!%p3085_p12)  ;;  %v5206_v1 = vld [vmem:[%s5190_s15 + $0x8] sm:$0xff] (!%p3085_p12)  ;;  %v5209_v2 = vld [vmem:[%s5190_s15 + $0x10] sm:$0xff] (!%p3085_p12)  ;;  %vm478_vm0 = vcmask (!%p3085_p12), 261120   ;;  %vm549_vm11 = vcmask (!%p3085_p12), 253952  }
  0x4f   : > { %s5199_s26 = scalar_lea.vmem [#allocation8], %s3084_s4  ;;  %423 = sbr.rel (%p3085_p12) target bundleno = 972 (0x3cc), region = 72  ;;  %v5212_v3 = vld [vmem:[%s5190_s15 + $0x18] sm:$0xff] (!%p3085_p12)  ;;  %v479_v4 = vsel (!%p3085_p12), %vm478_vm0, %v5203_v0, 0.0  ;;  %v480_v5 = vsel (!%p3085_p12), %vm478_vm0, %v5206_v1, 0.0  ;;  %v482_v6 = vsel (!%p3085_p12), %vm478_vm0, %v5209_v2, 0.0 }
  0x50   : > { %v5221_v7 = vld [vmem:[%s5190_s15 + $0x20] sm:$0xff] (!%p3085_p12)  ;;  %v481_v8 = vadd.f32 (!%p3085_p12), %v480_v5, %v479_v4  ;;  %v484_v9 = vsel (!%p3085_p12), %vm478_vm0, %v5212_v3, 0.0  ;;  %v5226_v10 = vld [vmem:[%s5190_s15 + $0x28] sm:$0xff] (!%p3085_p12)  ;;  %v5231_v13 = vld [vmem:[%s5190_s15 + $0x30] sm:$0xff] (!%p3085_p12) }
  0x51   : > { %v486_v12 = vsel (!%p3085_p12), %vm478_vm0, %v5221_v7, 0.0  ;;  %v488_v15 = vsel (!%p3085_p12), %vm478_vm0, %v5226_v10, 0.0  ;;  %v5236_v16 = vld [vmem:[%s5190_s15 + $0x38] sm:$0xff] (!%p3085_p12)  ;;  %v490_v18 = vsel (!%p3085_p12), %vm478_vm0, %v5231_v13, 0.0  ;;  %v5241_v19 = vld [vmem:[%s5190_s15 + $0x40] sm:$0xff] (!%p3085_p12)  ;;  %v5246_v22 = vld [vmem:[%s5190_s15 + $0x48] sm:$0xff] (!%p3085_p12) }
  0x52   : > { %v483_v11 = vadd.f32 (!%p3085_p12), %v482_v6, %v481_v8  ;;  %v492_v21 = vsel (!%p3085_p12), %vm478_vm0, %v5236_v16, 0.0  ;;  %v494_v24 = vsel (!%p3085_p12), %vm478_vm0, %v5241_v19, 0.0  ;;  %v5251_v25 = vld [vmem:[%s5190_s15 + $0x50] sm:$0xff] (!%p3085_p12)  ;;  %v496_v27 = vsel (!%p3085_p12), %vm478_vm0, %v5246_v22, 0.0  ;;  %v5256_v28 = vld [vmem:[%s5190_s15 + $0x58] sm:$0xff] (!%p3085_p12)  ;;  %v5261_v31 = vld [vmem:[%s5190_s15 + $0x60] sm:$0xff] (!%p3085_p12) }
  0x53   : > { %v498_v30 = vsel (!%p3085_p12), %vm478_vm0, %v5251_v25, 0.0  ;;  %v500_v33 = vsel (!%p3085_p12), %vm478_vm0, %v5256_v28, 0.0  ;;  %v5266_v34 = vld [vmem:[%s5190_s15 + $0x68] sm:$0xff] (!%p3085_p12)  ;;  %v502_v36 = vsel (!%p3085_p12), %vm478_vm0, %v5261_v31, 0.0  ;;  %v5271_v37 = vld [vmem:[%s5190_s15 + $0x70] sm:$0xff] (!%p3085_p12)  ;;  %v5276_v40 = vld [vmem:[%s5190_s15 + $0x78] sm:$0xff] (!%p3085_p12) }
  0x54   : > { %v485_v14 = vadd.f32 (!%p3085_p12), %v484_v9, %v483_v11  ;;  %v504_v39 = vsel (!%p3085_p12), %vm478_vm0, %v5266_v34, 0.0  ;;  %v506_v42 = vsel (!%p3085_p12), %vm478_vm0, %v5271_v37, 0.0  ;;  %v5281_v43 = vld [vmem:[%s5190_s15 + $0x80] sm:$0xff] (!%p3085_p12)  ;;  %v508_v45 = vsel (!%p3085_p12), %vm478_vm0, %v5276_v40, 0.0  ;;  %v5286_v46 = vld [vmem:[%s5190_s15 + $0x88] sm:$0xff] (!%p3085_p12)  ;;  %v5291_v49 = vld [vmem:[%s5190_s15 + $0x90] sm:$0xff] (!%p3085_p12) }
  0x55   : > { %v510_v48 = vsel (!%p3085_p12), %vm478_vm0, %v5281_v43, 0.0  ;;  %v512_v51 = vsel (!%p3085_p12), %vm478_vm0, %v5286_v46, 0.0  ;;  %v5296_v52 = vld [vmem:[%s5190_s15 + $0x98] sm:$0xff] (!%p3085_p12)  ;;  %v514_v54 = vsel (!%p3085_p12), %vm478_vm0, %v5291_v49, 0.0  ;;  %v5301_v55 = vld [vmem:[%s5190_s15 + $0xa0] sm:$0xff] (!%p3085_p12)  ;;  %v5306_v58 = vld [vmem:[%s5190_s15 + $0xa8] sm:$0xff] (!%p3085_p12) }
  0x56   : > { %v487_v17 = vadd.f32 %v486_v12, %v485_v14  ;;  %v516_v57 = vsel %vm478_vm0, %v5296_v52, 0.0  ;;  %v518_v60 = vsel %vm478_vm0, %v5301_v55, 0.0  ;;  %v5311_v61 = vld [vmem:[%s5190_s15 + $0xb0] sm:$0xff]  ;;  %v520_v63 = vsel %vm478_vm0, %v5306_v58, 0.0  ;;  %v5316_v4 = vld [vmem:[%s5190_s15 + $0xb8] sm:$0xff]  ;;  %v5321_v8 = vld [vmem:[%s5190_s15 + $0xc0] sm:$0xff] }
  0x57   : > { %v522_v6 = vsel %vm478_vm0, %v5311_v61, 0.0  ;;  %v524_v11 = vsel %vm478_vm0, %v5316_v4, 0.0  ;;  %v5326_v12 = vld [vmem:[%s5190_s15 + $0xc8] sm:$0xff] }
  0x58   : > { %v489_v20 = vadd.f32 %v488_v15, %v487_v17  ;;  %v526_v15 = vsel %vm478_vm0, %v5321_v8, 0.0  ;;  %v5331_v17 = vld [vmem:[%s5190_s15 + $0xd0] sm:$0xff] }
  0x5a   : > { %v491_v23 = vadd.f32 %v490_v18, %v489_v20  ;;  %v528_v20 = vsel %vm478_vm0, %v5326_v12, 0.0 }
  0x5c   : > { %v493_v26 = vadd.f32 %v492_v21, %v491_v23  ;;  %v5336_v21 = vld [vmem:[%s5190_s15 + $0xd8] sm:$0xff] }
  0x5e   : > { %v495_v29 = vadd.f32 %v494_v24, %v493_v26  ;;  %v530_v24 = vsel %vm478_vm0, %v5331_v17, 0.0  ;;  %v5341_v26 = vld [vmem:[%s5190_s15 + $0xe0] sm:$0xff] }
  0x60   : > { %v497_v32 = vadd.f32 %v496_v27, %v495_v29  ;;  %v532_v29 = vsel %vm478_vm0, %v5336_v21, 0.0 }
  0x62   : > { %v499_v35 = vadd.f32 %v498_v30, %v497_v32  ;;  %v5346_v30 = vld [vmem:[%s5190_s15 + $0xe8] sm:$0xff] }
  0x64   : > { %v501_v38 = vadd.f32 %v500_v33, %v499_v35  ;;  %v534_v33 = vsel %vm478_vm0, %v5341_v26, 0.0  ;;  %v5351_v35 = vld [vmem:[%s5190_s15 + $0xf0] sm:$0xff] }
  0x66   : > { %v503_v41 = vadd.f32 %v502_v36, %v501_v38  ;;  %v536_v38 = vsel %vm478_vm0, %v5346_v30, 0.0 }
  0x68   : > { %v505_v44 = vadd.f32 %v504_v39, %v503_v41  ;;  %v5356_v39 = vld [vmem:[%s5190_s15 + $0xf8] sm:$0xff] }
  0x6a   : > { %v507_v47 = vadd.f32 %v506_v42, %v505_v44  ;;  %v456_v42 = vlaneseq  ;;  %v538_v44 = vsel %vm478_vm0, %v5351_v35, 0.0 }
  0x6c   : > { %v509_v50 = vadd.f32 %v508_v45, %v507_v47  ;;  %v540_v47 = vsel %vm478_vm0, %v5356_v39, 0.0 }
  0x6e   : > { %v511_v53 = vadd.f32 %v510_v48, %v509_v50  ;;  %v457_v50 = vand.u32 127, %v456_v42 }
  0x70   : > { %v513_v56 = vadd.f32 %v512_v51, %v511_v53  ;;  %vm468_vm1 = vcmp.ge.s32.totalorder %v457_v50, 16  ;;  %vm469_vm2 = vcmp.lt.s32.totalorder %v457_v50, 24  ;;  %vm473_vm3 = vcmp.ge.s32.totalorder %v457_v50, 24 }
  0x71   : > { %vm474_vm4 = vcmp.lt.s32.totalorder %v457_v50, 32  ;;  %vm463_vm5 = vcmp.ge.s32.totalorder %v457_v50, 8  ;;  %vm464_vm6 = vcmp.lt.s32.totalorder %v457_v50, 16  ;;  %vm470_vm7 = vmand %vm468_vm1, %vm469_vm2  ;;  %vm459_vm9 = vcmp.lt.s32.totalorder %v457_v50, 8 }
  0x72   : > { %v515_v59 = vadd.f32 %v514_v54, %v513_v56  ;;  %vm475_vm8 = vmand %vm473_vm3, %vm474_vm4 }
  0x73   : > { %vm465_vm10 = vmand %vm463_vm5, %vm464_vm6 }
  0x74   : > { %v517_v62 = vadd.f32 %v516_v57, %v515_v59 }
  0x76   : > { %v519_v5 = vadd.f32 %v518_v60, %v517_v62  ;;  %v4979_v60 = vmov 0.0  }
  0x77   : > { %v5362_v62 = vsel %vm470_vm7, 1.0, %v4979_v60 }
  0x78   : > { %v521_v9 = vadd.f32 %v520_v63, %v519_v5  ;;  %v5364_v63 = vsel %vm459_vm9, 1.0, %v4979_v60  ;;  %v5366_v5 = vsel %vm475_vm8, 1.0, %v4979_v60 }
  0x7a   : > { %v523_v14 = vadd.f32 %v522_v6, %v521_v9  ;;  %v5368_v6 = vsel %vm465_vm10, 1.0, %v4979_v60 }
  0x7c   : > { %v525_v18 = vadd.f32 %v524_v11, %v523_v14 }
  0x7e   : > { %v527_v23 = vadd.f32 %v526_v15, %v525_v18 }
  0x80   : > { %v529_v27 = vadd.f32 %v528_v20, %v527_v23 }
  0x82   : > { %v531_v32 = vadd.f32 %v530_v24, %v529_v27 }
  0x84   : > { %v533_v36 = vadd.f32 %v532_v29, %v531_v32 }
  0x86   : > { %v535_v41 = vadd.f32 %v534_v33, %v533_v36 }
  0x88   : > { %v537_v45 = vadd.f32 %v536_v38, %v535_v41 }
  0x8a   : > { %v539_v48 = vadd.f32 %v538_v44, %v537_v45 }
  0x8c   : > { %v541_v51 = vadd.f32 %v540_v47, %v539_v48 }
  0x8e   : > { %v542_v53 = vrot.slane %v541_v51, 4 }
  0x90   : > { %v543_v54 = vadd.f32 %v542_v53, %v541_v51 }
  0x92   : > { %v544_v56 = vrot.slane %v543_v54, 2 }
  0x94   : > { %v545_v57 = vadd.f32 %v544_v56, %v543_v54 }
  0x96   : > { %v546_v59 = vrot.slane %v545_v57, 1 }
  0x98   : > { %v547_v9 = vadd.f32 %v546_v59, %v545_v57 }
  0x9a   : > { %v580_v11 = vmul.f32 %v5362_v62, %v547_v9  ;;  %v548_v14 = vmul.f32 %v5364_v63, %v547_v9  ;;  %v595_v15 = vmul.f32 %v5366_v5, %v547_v9  ;;  %v565_v18 = vmul.f32 %v5368_v6, %v547_v9 }
  0x9c   : > { %v581_v20 = vsel %vm549_vm11, %v580_v11, 0.0  ;;  %v550_v23 = vsel %vm549_vm11, %v548_v14, 0.0  ;;  %v596_v24 = vsel %vm549_vm11, %v595_v15, 0.0  ;;  %v566_v27 = vsel %vm549_vm11, %v565_v18, 0.0 }
  0x9d   : > { %582 = vadd.xlane.f32.xlu1 %v581_v20  ;;  %551 = vadd.xlane.f32.xlu0 %v550_v23 }
  0xa1   : > { %597 = vadd.xlane.f32.xlu1 %v596_v24  ;;  %567 = vadd.xlane.f32.xlu0 %v566_v27 }
 0x12a   : > { %v583_v29 = vpop.xlane.xlu1 %582  ;;  %v552_v32 = vpop.xlane.xlu0 %551 }
 0x12b   : > { %v584_v33 = vrot.slane %v583_v29, 4  ;;  %v553_v36 = vrot.slane %v552_v32, 4 }
 0x12d   : > { %v585_v38 = vadd.f32 %v584_v33, %v583_v29  ;;  %v554_v41 = vadd.f32 %v553_v36, %v552_v32 }
 0x12e   : > { %v598_v42 = vpop.xlane.xlu1 %597  ;;  %v568_v44 = vpop.xlane.xlu0 %567 }
 0x12f   : > { %v586_v45 = vrot.slane %v585_v38, 2  ;;  %v555_v47 = vrot.slane %v554_v41, 2  ;;  %v599_v48 = vrot.slane %v598_v42, 4  ;;  %v569_v50 = vrot.slane %v568_v44, 4 }
 0x131   : > { %v600_v51 = vadd.f32 %v599_v48, %v598_v42  ;;  %v570_v53 = vadd.f32 %v569_v50, %v568_v44  ;;  %v556_v54 = vadd.f32 %v555_v47, %v554_v41  ;;  %v587_v56 = vadd.f32 %v586_v45, %v585_v38 }
 0x133   : > { %v601_v57 = vrot.slane %v600_v51, 2  ;;  %v571_v59 = vrot.slane %v570_v53, 2  ;;  %v557_v60 = vrot.slane %v556_v54, 1  ;;  %v588_v15 = vrot.slane %v587_v56, 1 }
 0x135   : > { %v558_v9 = vadd.f32 %v557_v60, %v556_v54  ;;  %v572_v11 = vadd.f32 %v571_v59, %v570_v53  ;;  %v602_v14 = vadd.f32 %v601_v57, %v600_v51  ;;  %v589_v27 = vadd.f32 %v588_v15, %v587_v56 }
 0x137   : > { %3817 = vpush %v558_v9  ;;  %v573_v18 = vrot.slane %v572_v11, 1  ;;  %v603_v20 = vrot.slane %v602_v14, 1 }
 0x139   : > { %v574_v23 = vadd.f32 %v573_v18, %v572_v11  ;;  %v604_v24 = vadd.f32 %v603_v20, %v602_v14 }
 0x13b   : > { %3819 = vpush %v574_v23 }
 0x13c   : > { %3821 = vpush %v589_v27 }
 0x13d   : > { %3823 = vpush %v604_v24 }
 0x168   : > { %s3818_s11 = spop %3817 }
 0x169   : > { %v560_v29 = vstv %s3818_s11 }
 0x16a   : > { %v562_v33 = vmul.f32 0.00048828125, %v560_v29 }
 0x16c   : > { %s3820_s16 = spop %3819  ;;  %v563_v42 = vmul.f32 %v5364_v63, %v562_v33 }
 0x16d   : > { %v576_v32 = vstv %s3820_s16  ;;  %s3822_s20 = spop %3821 }
 0x16e   : > { %v577_v36 = vmul.f32 0.00048828125, %v576_v32  ;;  %v591_v38 = vstv %s3822_s20  ;;  %s3824_s12 = spop %3823 }
 0x16f   : > { %v592_v44 = vmul.f32 0.00048828125, %v591_v38  ;;  %v606_v45 = vstv %s3824_s12 }
 0x170   : > { %v578_v41 = vmul.f32 %v5368_v6, %v577_v36  ;;  %v607_v50 = vmul.f32 0.00048828125, %v606_v45 }
 0x171   : > { %v593_v48 = vmul.f32 %v5362_v62, %v592_v44 }
 0x172   : > { %v579_v47 = vadd.f32 %v578_v41, %v563_v42  ;;  %v608_v53 = vmul.f32 %v5366_v5, %v607_v50 }
 0x174   : > { %v594_v51 = vadd.f32 %v593_v48, %v579_v47 }
 0x176   : > { %v5382_v54 = vadd.f32 %v608_v53, %v594_v51 }
 0x178   : > { %v5386_v56 = vsub.f32 %v5203_v0, %v5382_v54  ;;  %v5390_v57 = vsub.f32 %v5206_v1, %v5382_v54  ;;  %v5394_v59 = vsub.f32 %v5209_v2, %v5382_v54  ;;  %v5398_v60 = vsub.f32 %v5212_v3, %v5382_v54 }
 0x179   : > { %v5406_v0 = vsub.f32 %v5221_v7, %v5382_v54  ;;  %v5412_v2 = vsub.f32 %v5226_v10, %v5382_v54  ;;  %v5420_v20 = vsub.f32 %v5231_v13, %v5382_v54  ;;  %v5427_v10 = vsub.f32 %v5236_v16, %v5382_v54 }
 0x17a   : > { %v642_v9 = vmul.f32 %v5386_v56, %v5386_v56  ;;  %v643_v11 = vmul.f32 %v5390_v57, %v5390_v57  ;;  %v644_v1 = vmul.f32 %v5394_v59, %v5394_v59  ;;  %v645_v3 = vmul.f32 %v5398_v60, %v5398_v60 }
 0x17b   : > { %v646_v7 = vmul.f32 %v5406_v0, %v5406_v0  ;;  %v647_v27 = vmul.f32 %v5412_v2, %v5412_v2  ;;  %v5434_v13 = vsub.f32 %v5241_v19, %v5382_v54  ;;  %v648_v33 = vmul.f32 %v5420_v20, %v5420_v20 }
 0x17c   : > { %v674_v14 = vsel %vm478_vm0, %v642_v9, 0.0  ;;  %v675_v15 = vsel %vm478_vm0, %v643_v11, 0.0  ;;  %v677_v23 = vsel %vm478_vm0, %v644_v1, 0.0  ;;  %v679_v29 = vsel %vm478_vm0, %v645_v3, 0.0 }
 0x17d   : > { %v676_v18 = vadd.f32 %v675_v15, %v674_v14  ;;  %v681_v36 = vsel %vm478_vm0, %v646_v7, 0.0  ;;  %v5441_v16 = vsub.f32 %v5246_v22, %v5382_v54  ;;  %v649_v41 = vmul.f32 %v5427_v10, %v5427_v10 }
 0x17e   : > { %v683_v42 = vsel %vm478_vm0, %v647_v27, 0.0  ;;  %v5448_v19 = vsub.f32 %v5251_v25, %v5382_v54  ;;  %v650_v45 = vmul.f32 %v5434_v13, %v5434_v13  ;;  %v685_v47 = vsel %vm478_vm0, %v648_v33, 0.0 }
 0x17f   : > { %v678_v24 = vadd.f32 %v677_v23, %v676_v18  ;;  %v5455_v22 = vsub.f32 %v5256_v28, %v5382_v54  ;;  %v651_v50 = vmul.f32 %v5441_v16, %v5441_v16  ;;  %v687_v51 = vsel %vm478_vm0, %v649_v41, 0.0 }
 0x180   : > { %v5462_v25 = vsub.f32 %v5261_v31, %v5382_v54  ;;  %v652_v9 = vmul.f32 %v5448_v19, %v5448_v19  ;;  %v689_v11 = vsel %vm478_vm0, %v650_v45, 0.0  ;;  %v5469_v28 = vsub.f32 %v5266_v34, %v5382_v54 }
 0x181   : > { %v680_v32 = vadd.f32 %v679_v29, %v678_v24  ;;  %v653_v3 = vmul.f32 %v5455_v22, %v5455_v22  ;;  %v691_v14 = vsel %vm478_vm0, %v651_v50, 0.0  ;;  %v5476_v31 = vsub.f32 %v5271_v37, %v5382_v54 }
 0x182   : > { %v654_v18 = vmul.f32 %v5462_v25, %v5462_v25  ;;  %v693_v7 = vsel %vm478_vm0, %v652_v9, 0.0  ;;  %v5483_v34 = vsub.f32 %v5276_v40, %v5382_v54  ;;  %v655_v24 = vmul.f32 %v5469_v28, %v5469_v28 }
 0x183   : > { %v682_v38 = vadd.f32 %v681_v36, %v680_v32  ;;  %v695_v27 = vsel %vm478_vm0, %v653_v3, 0.0  ;;  %v5490_v37 = vsub.f32 %v5281_v43, %v5382_v54  ;;  %v656_v32 = vmul.f32 %v5476_v31, %v5476_v31 }
 0x184   : > { %v697_v33 = vsel %vm478_vm0, %v654_v18, 0.0  ;;  %v5497_v40 = vsub.f32 %v5286_v46, %v5382_v54  ;;  %v699_v41 = vsel %vm478_vm0, %v655_v24, 0.0  ;;  %v5504_v43 = vsub.f32 %v5291_v49, %v5382_v54 }
 0x185   : > { %v684_v44 = vadd.f32 %v683_v42, %v682_v38  ;;  %v657_v38 = vmul.f32 %v5483_v34, %v5483_v34  ;;  %v701_v45 = vsel %vm478_vm0, %v656_v32, 0.0  ;;  %v5511_v46 = vsub.f32 %v5296_v52, %v5382_v54 }
 0x186   : > { %v5518_v49 = vsub.f32 %v5301_v55, %v5382_v54  ;;  %v5525_v52 = vsub.f32 %v5306_v58, %v5382_v54  ;;  %v5532_v55 = vsub.f32 %v5311_v61, %v5382_v54  ;;  %v5539_v58 = vsub.f32 %v5316_v4, %v5382_v54 }
 0x187   : > { %v686_v48 = vadd.f32 %v685_v47, %v684_v44  ;;  %v658_v44 = vmul.f32 %v5490_v37, %v5490_v37  ;;  %v703_v50 = vsel %vm478_vm0, %v657_v38, 0.0  ;;  %v5546_v61 = vsub.f32 %v5321_v8, %v5382_v54 }
 0x188   : > { %v5553_v4 = vsub.f32 %v5326_v12, %v5382_v54  ;;  %v5560_v8 = vsub.f32 %v5331_v17, %v5382_v54  ;;  %v5567_v12 = vsub.f32 %v5336_v21, %v5382_v54  ;;  %v5574_v17 = vsub.f32 %v5341_v26, %v5382_v54 }
 0x189   : > { %v688_v53 = vadd.f32 %v687_v51, %v686_v48  ;;  %v659_v48 = vmul.f32 %v5497_v40, %v5497_v40  ;;  %v705_v9 = vsel %vm478_vm0, %v658_v44, 0.0  ;;  %v5581_v21 = vsub.f32 %v5346_v30, %v5382_v54 }
 0x18a   : > { %v5588_v26 = vsub.f32 %v5351_v35, %v5382_v54  ;;  %v5595_v30 = vsub.f32 %v5356_v39, %v5382_v54 }
 0x18b   : > { %v690_v1 = vadd.f32 %v689_v11, %v688_v53  ;;  %v660_v53 = vmul.f32 %v5504_v43, %v5504_v43  ;;  %v707_v3 = vsel %vm478_vm0, %v659_v48, 0.0 }
 0x18c   : > { %v672_v35 = vmul.f32 %v5588_v26, %v5588_v26 }
 0x18d   : > { %v692_v15 = vadd.f32 %v691_v14, %v690_v1  ;;  %v661_v1 = vmul.f32 %v5511_v46, %v5511_v46  ;;  %v709_v18 = vsel %vm478_vm0, %v660_v53, 0.0 }
 0x18e   : > { %v733_v39 = vsel %vm478_vm0, %v672_v35, 0.0  ;;  %v1312_v35 = vld [vmem:[%s7263_s7 + $0x8] sm:$0xff] }
 0x18f   : > { %v694_v23 = vadd.f32 %v693_v7, %v692_v15  ;;  %v662_v15 = vmul.f32 %v5518_v49, %v5518_v49  ;;  %v711_v24 = vsel %vm478_vm0, %v661_v1, 0.0 }
 0x191   : > { %v696_v29 = vadd.f32 %v695_v27, %v694_v23  ;;  %v663_v23 = vmul.f32 %v5525_v52, %v5525_v52  ;;  %v713_v32 = vsel %vm478_vm0, %v662_v15, 0.0 }
 0x193   : > { %v698_v36 = vadd.f32 %v697_v33, %v696_v29  ;;  %v664_v29 = vmul.f32 %v5532_v55, %v5532_v55  ;;  %v715_v38 = vsel %vm478_vm0, %v663_v23, 0.0 }
 0x195   : > { %v700_v42 = vadd.f32 %v699_v41, %v698_v36  ;;  %v665_v36 = vmul.f32 %v5539_v58, %v5539_v58  ;;  %v717_v44 = vsel %vm478_vm0, %v664_v29, 0.0 }
 0x197   : > { %v702_v47 = vadd.f32 %v701_v45, %v700_v42  ;;  %v666_v42 = vmul.f32 %v5546_v61, %v5546_v61  ;;  %v719_v48 = vsel %vm478_vm0, %v665_v36, 0.0 }
 0x199   : > { %v704_v51 = vadd.f32 %v703_v50, %v702_v47  ;;  %v667_v47 = vmul.f32 %v5553_v4, %v5553_v4  ;;  %v721_v53 = vsel %vm478_vm0, %v666_v42, 0.0 }
 0x19b   : > { %v706_v11 = vadd.f32 %v705_v9, %v704_v51  ;;  %v668_v51 = vmul.f32 %v5560_v8, %v5560_v8  ;;  %v723_v1 = vsel %vm478_vm0, %v667_v47, 0.0 }
 0x19d   : > { %v708_v14 = vadd.f32 %v707_v3, %v706_v11  ;;  %v669_v11 = vmul.f32 %v5567_v12, %v5567_v12  ;;  %v725_v15 = vsel %vm478_vm0, %v668_v51, 0.0 }
 0x19f   : > { %v710_v7 = vadd.f32 %v709_v18, %v708_v14  ;;  %v670_v14 = vmul.f32 %v5574_v17, %v5574_v17  ;;  %v727_v23 = vsel %vm478_vm0, %v669_v11, 0.0 }
 0x1a1   : > { %v712_v27 = vadd.f32 %v711_v24, %v710_v7  ;;  %v671_v7 = vmul.f32 %v5581_v21, %v5581_v21 }
 0x1a3   : > { %v714_v33 = vadd.f32 %v713_v32, %v712_v27  ;;  %v729_v27 = vsel %vm478_vm0, %v670_v14, 0.0  ;;  %v673_v32 = vmul.f32 %v5595_v30, %v5595_v30 }
 0x1a5   : > { %v716_v41 = vadd.f32 %v715_v38, %v714_v33  ;;  %v731_v33 = vsel %vm478_vm0, %v671_v7, 0.0  ;;  %v735_v38 = vsel %vm478_vm0, %v673_v32, 0.0  ;;  %v948_v7 = vld [vmem:[%s7261_s5 + $0x8] sm:$0xff] }
 0x1a7   : > { %v718_v45 = vadd.f32 %v717_v44, %v716_v41 }
 0x1a9   : > { %v720_v50 = vadd.f32 %v719_v48, %v718_v45 }
 0x1ab   : > { %v722_v9 = vadd.f32 %v721_v53, %v720_v50 }
 0x1ad   : > { %v724_v3 = vadd.f32 %v723_v1, %v722_v9 }
 0x1af   : > { %v726_v18 = vadd.f32 %v725_v15, %v724_v3 }
 0x1b1   : > { %v728_v24 = vadd.f32 %v727_v23, %v726_v18  ;;  %v947_v18 = vld [vmem:[%s7261_s5] sm:$0xff] }
 0x1b2   : > { %v1311_v23 = vld [vmem:[%s7263_s7] sm:$0xff] }
 0x1b3   : > { %v730_v29 = vadd.f32 %v729_v27, %v728_v24  ;;  %v3697_v24 = vpack.c.bf16 %v948_v7, %v947_v18  ;;  %v949_v27 = vld [vmem:[%s7261_s5 + $0x10] sm:$0xff]  ;;  %v3705_v32 = vpack.c.bf16 %v1312_v35, %v1311_v23 }
 0x1b5   : > { %v732_v36 = vadd.f32 %v731_v33, %v730_v29  ;;  %v950_v29 = vld [vmem:[%s7261_s5 + $0x18] sm:$0xff]  ;;  %3698 = vmatprep.subr.bf16.mxu0 %v3697_v24  ;;  %3706 = vmatprep.subr.bf16.mxu1 %v3705_v32 }
 0x1b6   : > { %v3701_v33 = vpack.c.bf16 %v950_v29, %v949_v27  ;;  %3700 = vmatpush3.bf16.msra.mxu0 %v3697_v24  ;;  %3708 = vmatpush3.bf16.msra.mxu1 %v3705_v32 }
 0x1b7   : > { %v734_v54 = vadd.f32 %v733_v39, %v732_v36  ;;  %v1313_v36 = vld [vmem:[%s7263_s7 + $0x10] sm:$0xff]  ;;  %v1314_v39 = vld [vmem:[%s7263_s7 + $0x18] sm:$0xff] }
 0x1b8   : > { %3702 = vmatprep.subr.bf16.mxu0 %v3701_v33 }
 0x1b9   : > { %v736_v41 = vadd.f32 %v735_v38, %v734_v54  ;;  %v3709_v54 = vpack.c.bf16 %v1314_v39, %v1313_v36 }
 0x1ba   : > { %3704 = vmatpush3.bf16.msra.mxu0 %v3701_v33 }
 0x1bb   : > { %v737_v42 = vrot.slane %v736_v41, 4  ;;  %3710 = vmatprep.subr.bf16.mxu1 %v3709_v54 }
 0x1bc   : > { %3712 = vmatpush3.bf16.msra.mxu1 %v3709_v54 }
 0x1bd   : > { %v738_v44 = vadd.f32 %v737_v42, %v736_v41 }
 0x1bf   : > { %v739_v45 = vrot.slane %v738_v44, 2 }
 0x1c1   : > { %v740_v47 = vadd.f32 %v739_v45, %v738_v44 }
 0x1c3   : > { %v741_v48 = vrot.slane %v740_v47, 1 }
 0x1c5   : > { %v742_v50 = vadd.f32 %v741_v48, %v740_v47 }
 0x1c7   : > { %v758_v51 = vmul.f32 %v5368_v6, %v742_v50  ;;  %v743_v53 = vmul.f32 %v5364_v63, %v742_v50  ;;  %v788_v1 = vmul.f32 %v5366_v5, %v742_v50  ;;  %v773_v3 = vmul.f32 %v5362_v62, %v742_v50 }
 0x1c9   : > { %v759_v9 = vsel %vm549_vm11, %v758_v51, 0.0  ;;  %v744_v11 = vsel %vm549_vm11, %v743_v53, 0.0  ;;  %v789_v14 = vsel %vm549_vm11, %v788_v1, 0.0  ;;  %v774_v15 = vsel %vm549_vm11, %v773_v3, 0.0 }
 0x1ca   : > { %760 = vadd.xlane.f32.xlu1 %v759_v9  ;;  %745 = vadd.xlane.f32.xlu0 %v744_v11 }
 0x1ce   : > { %790 = vadd.xlane.f32.xlu1 %v789_v14  ;;  %775 = vadd.xlane.f32.xlu0 %v774_v15 }
 0x257   : > { %v761_v38 = vpop.xlane.xlu1 %760  ;;  %v746_v41 = vpop.xlane.xlu0 %745 }
 0x258   : > { %v762_v42 = vrot.slane %v761_v38, 4  ;;  %v747_v44 = vrot.slane %v746_v41, 4 }
 0x25a   : > { %v763_v45 = vadd.f32 %v762_v42, %v761_v38  ;;  %v748_v47 = vadd.f32 %v747_v44, %v746_v41 }
 0x25b   : > { %v791_v48 = vpop.xlane.xlu1 %790  ;;  %v776_v50 = vpop.xlane.xlu0 %775 }
 0x25c   : > { %v764_v51 = vrot.slane %v763_v45, 2  ;;  %v749_v53 = vrot.slane %v748_v47, 2  ;;  %v792_v9 = vrot.slane %v791_v48, 4  ;;  %v777_v11 = vrot.slane %v776_v50, 4 }
 0x25e   : > { %v793_v1 = vadd.f32 %v792_v9, %v791_v48  ;;  %v778_v3 = vadd.f32 %v777_v11, %v776_v50  ;;  %v750_v14 = vadd.f32 %v749_v53, %v748_v47  ;;  %v765_v15 = vadd.f32 %v764_v51, %v763_v45 }
 0x260   : > { %v794_v18 = vrot.slane %v793_v1, 2  ;;  %v779_v7 = vrot.slane %v778_v3, 2  ;;  %v751_v23 = vrot.slane %v750_v14, 1  ;;  %v766_v24 = vrot.slane %v765_v15, 1 }
 0x262   : > { %v795_v35 = vadd.f32 %v794_v18, %v793_v1  ;;  %v780_v27 = vadd.f32 %v779_v7, %v778_v3  ;;  %v752_v29 = vadd.f32 %v751_v23, %v750_v14  ;;  %v767_v32 = vadd.f32 %v766_v24, %v765_v15  ;;  %v5662_v23 = vld [vmem:[%s7258_s2] ss:$0 sm:$0xff] }
 0x264   : > { %3825 = vpush %v752_v29  ;;  %v781_v33 = vrot.slane %v780_v27, 1  ;;  %v796_v36 = vrot.slane %v795_v35, 1 }
 0x265   : > { %3827 = vpush %v767_v32 }
 0x266   : > { %v782_v39 = vadd.f32 %v781_v33, %v780_v27  ;;  %v797_v54 = vadd.f32 %v796_v36, %v795_v35 }
 0x268   : > { %3829 = vpush %v782_v39 }
 0x269   : > { %3831 = vpush %v797_v54 }
 0x295   : > { %s3826_s29 = spop %3825 }
 0x296   : > { %v754_v38 = vstv %s3826_s29  ;;  %s3828_s4 = spop %3827 }
 0x297   : > { %v755_v41 = vmul.f32 0.00048828125, %v754_v38  ;;  %v769_v42 = vstv %s3828_s4 }
 0x298   : > { %v770_v44 = vmul.f32 0.00048828125, %v769_v42 }
 0x299   : > { %v756_v45 = vmul.f32 %v5364_v63, %v755_v41  ;;  %s3830_s11 = spop %3829  ;;  %v5649_v63 = vld [vmem:[%s7257_s1] ss:$0 sm:$0xff] }
 0x29a   : > { %v771_v47 = vmul.f32 %v5368_v6, %v770_v44  ;;  %v784_v48 = vstv %s3830_s11  ;;  %s3832_s16 = spop %3831 }
 0x29b   : > { %v785_v50 = vmul.f32 0.00048828125, %v784_v48  ;;  %v799_v51 = vstv %s3832_s16 }
 0x29c   : > { %v800_v53 = vmul.f32 0.00048828125, %v799_v51  ;;  %v772_v9 = vadd.f32 %v771_v47, %v756_v45 }
 0x29d   : > { %v786_v11 = vmul.f32 %v5362_v62, %v785_v50 }
 0x29e   : > { %v801_v3 = vmul.f32 %v5366_v5, %v800_v53 }
 0x29f   : > { %v787_v1 = vadd.f32 %v786_v11, %v772_v9 }
 0x2a1   : > { %v802_v14 = vadd.f32 %v801_v3, %v787_v1 }
 0x2a3   : > { %v803_v15 = vadd.f32 1e-05, %v802_v14 }
 0x2a5   : > { %4332 = vrsqrt.f32 %v803_v15 }
 0x2af   : > { %v5644_v18 = vpop.eup %4332 }
 0x2b0   : > { %v805_v6 = vmul.f32 %v5644_v18, %v5386_v56  ;;  %v806_v7 = vmul.f32 %v5644_v18, %v5390_v57  ;;  %v807_v62 = vmul.f32 %v5644_v18, %v5394_v59  ;;  %v808_v5 = vmul.f32 %v5644_v18, %v5398_v60 }
 0x2b1   : > { %v809_v24 = vmul.f32 %v5644_v18, %v5406_v0  ;;  %v810_v56 = vmul.f32 %v5644_v18, %v5412_v2  ;;  %v811_v57 = vmul.f32 %v5644_v18, %v5420_v20  ;;  %v812_v59 = vmul.f32 %v5644_v18, %v5427_v10 }
 0x2b2   : > { %v844_v35 = vmul.f32 %v5649_v63, %v805_v6  ;;  %v845_v60 = vmul.f32 %v5649_v63, %v806_v7  ;;  %v846_v27 = vmul.f32 %v5649_v63, %v807_v62  ;;  %v847_v29 = vmul.f32 %v5649_v63, %v808_v5 }
 0x2b3   : > { %v848_v32 = vmul.f32 %v5649_v63, %v809_v24  ;;  %v849_v0 = vmul.f32 %v5649_v63, %v810_v56  ;;  %v850_v2 = vmul.f32 %v5649_v63, %v811_v57  ;;  %v851_v33 = vmul.f32 %v5649_v63, %v812_v59 }
 0x2b4   : > { %v883_v20 = vadd.f32 %v5662_v23, %v844_v35  ;;  %v884_v10 = vadd.f32 %v5662_v23, %v845_v60  ;;  %v885_v36 = vadd.f32 %v5662_v23, %v846_v27  ;;  %v886_v39 = vadd.f32 %v5662_v23, %v847_v29 }
 0x2b5   : > { %v887_v54 = vadd.f32 %v5662_v23, %v848_v32  ;;  %v888_v38 = vadd.f32 %v5662_v23, %v849_v0  ;;  %v5687_v41 = vadd.f32 %v5662_v23, %v850_v2  ;;  %v5690_v42 = vadd.f32 %v5662_v23, %v851_v33 }
 0x2b6   : > { %915 = vst.msk [vmem:[#allocation2] sm:$0xff] %vm478_vm0, %v883_v20  ;;  %3417 = vmatprep.mubr.msk.f32.mxu0 %vm478_vm0, %v883_v20  ;;  %3473 = vmatprep.mubr.msk.f32.mxu1 %vm478_vm0, %v883_v20  ;;  %916 = vst.msk [vmem:[#allocation2 + $0x8] sm:$0xff] %vm478_vm0, %v884_v10  ;;  %v813_v44 = vmul.f32 %v5644_v18, %v5434_v13  ;;  %v814_v45 = vmul.f32 %v5644_v18, %v5441_v16 }
 0x2b7   : > { %917 = vst.msk [vmem:[#allocation2 + $0x10] sm:$0xff] %vm478_vm0, %v885_v36  ;;  %918 = vst.msk [vmem:[#allocation2 + $0x18] sm:$0xff] %vm478_vm0, %v886_v39  ;;  %v815_v47 = vmul.f32 %v5644_v18, %v5448_v19  ;;  %3418 = vmatmul.mubr.msk.f32.vlgmr.msra.gmra.mrb[0].mxu0 %vm478_vm0, %v884_v10  ;;  %3474 = vmatmul.mubr.msk.f32.vlgmr.msra.gmra.mrb[0].mxu1 %vm478_vm0, %v884_v10  ;;  %v816_v13 = vmul.f32 %v5644_v18, %v5455_v22 }
 0x2b8   : > { %919 = vst.msk [vmem:[#allocation2 + $0x20] sm:$0xff] %vm478_vm0, %v887_v54  ;;  %920 = vst.msk [vmem:[#allocation2 + $0x28] sm:$0xff] %vm478_vm0, %v888_v38  ;;  %v817_v16 = vmul.f32 %v5644_v18, %v5462_v25  ;;  %v818_v19 = vmul.f32 %v5644_v18, %v5469_v28  ;;  %3420 = vmatprep.mubr.msk.f32.mxu0 %vm478_vm0, %v885_v36  ;;  %3476 = vmatprep.mubr.msk.f32.mxu1 %vm478_vm0, %v885_v36 }
 0x2b9   : > { %921 = vst.msk [vmem:[#allocation2 + $0x30] sm:$0xff] %vm478_vm0, %v5687_v41  ;;  %922 = vst.msk [vmem:[#allocation2 + $0x38] sm:$0xff] %vm478_vm0, %v5690_v42  ;;  %v852_v48 = vmul.f32 %v5649_v63, %v813_v44  ;;  %v853_v50 = vmul.f32 %v5649_v63, %v814_v45  ;;  %v854_v51 = vmul.f32 %v5649_v63, %v815_v47 }
 0x2ba   : > { %v855_v53 = vmul.f32 %v5649_v63, %v816_v13  ;;  %v856_v22 = vmul.f32 %v5649_v63, %v817_v16  ;;  %v857_v9 = vmul.f32 %v5649_v63, %v818_v19  ;;  %v819_v25 = vmul.f32 %v5644_v18, %v5476_v31 }
 0x2bb   : > { %v891_v28 = vadd.f32 %v5662_v23, %v852_v48  ;;  %v5730_v11 = vadd.f32 %v5662_v23, %v853_v50  ;;  %v5733_v1 = vadd.f32 %v5662_v23, %v854_v51  ;;  %v820_v3 = vmul.f32 %v5644_v18, %v5483_v34  ;;  %3421 = vmatmul.mubr.msk.f32.gmra.mrb[2].mxu0 %vm478_vm0, %v886_v39 }
 0x2bc   : > { %3477 = vmatmul.mubr.msk.f32.gmra.mrb[2].mxu1 %vm478_vm0, %v886_v39  ;;  %v5740_v14 = vadd.f32 %v5662_v23, %v855_v53  ;;  %v5743_v31 = vadd.f32 %v5662_v23, %v856_v22  ;;  %v5746_v15 = vadd.f32 %v5662_v23, %v857_v9  ;;  %3423 = vmatprep.mubr.msk.f32.mxu0 %vm478_vm0, %v887_v54 }
 0x2bd   : > { %3479 = vmatprep.mubr.msk.f32.mxu1 %vm478_vm0, %v887_v54  ;;  %923 = vst.msk [vmem:[#allocation2 + $0x40] sm:$0xff] %vm478_vm0, %v891_v28  ;;  %924 = vst.msk [vmem:[#allocation2 + $0x48] sm:$0xff] %vm478_vm0, %v5730_v11  ;;  %v858_v34 = vmul.f32 %v5649_v63, %v819_v25  ;;  %v859_v6 = vmul.f32 %v5649_v63, %v820_v3  ;;  %v821_v7 = vmul.f32 %v5644_v18, %v5490_v37 }
 0x2be   : > { %925 = vst.msk [vmem:[#allocation2 + $0x50] sm:$0xff] %vm478_vm0, %v5733_v1  ;;  %926 = vst.msk [vmem:[#allocation2 + $0x58] sm:$0xff] %vm478_vm0, %v5740_v14  ;;  %v822_v62 = vmul.f32 %v5644_v18, %v5497_v40  ;;  %v823_v5 = vmul.f32 %v5644_v18, %v5504_v43  ;;  %v824_v24 = vmul.f32 %v5644_v18, %v5511_v46 }
 0x2bf   : > { %927 = vst.msk [vmem:[#allocation2 + $0x60] sm:$0xff] %vm478_vm0, %v5743_v31  ;;  %928 = vst.msk [vmem:[#allocation2 + $0x68] sm:$0xff] %vm478_vm0, %v5746_v15  ;;  %v825_v37 = vmul.f32 %v5644_v18, %v5518_v49  ;;  %v5774_v56 = vadd.f32 %v5662_v23, %v858_v34  ;;  %v5777_v57 = vadd.f32 %v5662_v23, %v859_v6  ;;  %3424 = vmatmul.mubr.msk.f32.gmra.mrb[4].mxu0 %vm478_vm0, %v888_v38 }
 0x2c0   : > { %v860_v59 = vmul.f32 %v5649_v63, %v821_v7  ;;  %v826_v40 = vmul.f32 %v5644_v18, %v5525_v52  ;;  %3480 = vmatmul.mubr.msk.f32.gmra.mrb[4].mxu1 %vm478_vm0, %v888_v38  ;;  %v861_v43 = vmul.f32 %v5649_v63, %v822_v62  ;;  %v862_v46 = vmul.f32 %v5649_v63, %v823_v5 }
 0x2c1   : > { %v863_v49 = vmul.f32 %v5649_v63, %v824_v24  ;;  %3426 = vmatprep.mubr.msk.f32.mxu0 %vm478_vm0, %v5687_v41  ;;  %3482 = vmatprep.mubr.msk.f32.mxu1 %vm478_vm0, %v5687_v41  ;;  %929 = vst.msk [vmem:[#allocation2 + $0x70] sm:$0xff] %vm478_vm0, %v5774_v56  ;;  %930 = vst.msk [vmem:[#allocation2 + $0x78] sm:$0xff] %vm478_vm0, %v5777_v57  ;;  %v864_v35 = vmul.f32 %v5649_v63, %v825_v37 }
 0x2c2   : > { %v5796_v52 = vadd.f32 %v5662_v23, %v860_v59  ;;  %v865_v60 = vmul.f32 %v5649_v63, %v826_v40  ;;  %v5801_v27 = vadd.f32 %v5662_v23, %v861_v43  ;;  %v5804_v29 = vadd.f32 %v5662_v23, %v862_v46 }
 0x2c3   : > { %v5807_v32 = vadd.f32 %v5662_v23, %v863_v49  ;;  %v827_v0 = vmul.f32 %v5644_v18, %v5532_v55  ;;  %v5814_v2 = vadd.f32 %v5662_v23, %v864_v35  ;;  %v828_v20 = vmul.f32 %v5644_v18, %v5539_v58  ;;  %3427 = vmatmul.mubr.msk.f32.gmra.mrb[6].mxu0 %vm478_vm0, %v5690_v42 }
 0x2c4   : > { %931 = vst.msk [vmem:[#allocation2 + $0x80] sm:$0xff] %vm478_vm0, %v5796_v52  ;;  %v5817_v33 = vadd.f32 %v5662_v23, %v865_v60  ;;  %v829_v10 = vmul.f32 %v5644_v18, %v5546_v61  ;;  %3483 = vmatmul.mubr.msk.f32.gmra.mrb[6].mxu1 %vm478_vm0, %v5690_v42  ;;  %932 = vst.msk [vmem:[#allocation2 + $0x88] sm:$0xff] %vm478_vm0, %v5801_v27  ;;  %v830_v58 = vmul.f32 %v5644_v18, %v5553_v4 }
 0x2c5   : > { %933 = vst.msk [vmem:[#allocation2 + $0x90] sm:$0xff] %vm478_vm0, %v5804_v29  ;;  %934 = vst.msk [vmem:[#allocation2 + $0x98] sm:$0xff] %vm478_vm0, %v5807_v32  ;;  %v866_v55 = vmul.f32 %v5649_v63, %v827_v0  ;;  %v831_v61 = vmul.f32 %v5644_v18, %v5560_v8  ;;  %3429 = vmatprep.mubr.msk.f32.mxu0 %vm478_vm0, %v891_v28  ;;  %3485 = vmatprep.mubr.msk.f32.mxu1 %vm478_vm0, %v891_v28 }
 0x2c6   : > { %935 = vst.msk [vmem:[#allocation2 + $0xa0] sm:$0xff] %vm478_vm0, %v5814_v2  ;;  %936 = vst.msk [vmem:[#allocation2 + $0xa8] sm:$0xff] %vm478_vm0, %v5817_v33  ;;  %v867_v36 = vmul.f32 %v5649_v63, %v828_v20  ;;  %v868_v39 = vmul.f32 %v5649_v63, %v829_v10  ;;  %v832_v4 = vmul.f32 %v5644_v18, %v5567_v12 }
 0x2c7   : > { %v905_v54 = vadd.f32 %v5662_v23, %v866_v55  ;;  %v869_v8 = vmul.f32 %v5649_v63, %v830_v58  ;;  %v870_v38 = vmul.f32 %v5649_v63, %v831_v61  ;;  %v833_v41 = vmul.f32 %v5644_v18, %v5574_v17  ;;  %3430 = vmatmul.mubr.msk.f32.gmra.mrb[8].mxu0 %vm478_vm0, %v5730_v11 }
 0x2c8   : > { %v906_v42 = vadd.f32 %v5662_v23, %v867_v36  ;;  %v907_v44 = vadd.f32 %v5662_v23, %v868_v39  ;;  %v871_v45 = vmul.f32 %v5649_v63, %v832_v4  ;;  %v834_v47 = vmul.f32 %v5644_v18, %v5581_v21  ;;  %3486 = vmatmul.mubr.msk.f32.gmra.mrb[8].mxu1 %vm478_vm0, %v5730_v11 }
 0x2c9   : > { %937 = vst.msk [vmem:[#allocation2 + $0xb0] sm:$0xff] %vm478_vm0, %v905_v54  ;;  %v908_v12 = vadd.f32 %v5662_v23, %v869_v8  ;;  %v909_v17 = vadd.f32 %v5662_v23, %v870_v38  ;;  %v872_v13 = vmul.f32 %v5649_v63, %v833_v41  ;;  %3432 = vmatprep.mubr.msk.f32.mxu0 %vm478_vm0, %v5733_v1 }
 0x2ca   : > { %3488 = vmatprep.mubr.msk.f32.mxu1 %vm478_vm0, %v5733_v1  ;;  %938 = vst.msk [vmem:[#allocation2 + $0xb8] sm:$0xff] %vm478_vm0, %v906_v42  ;;  %939 = vst.msk [vmem:[#allocation2 + $0xc0] sm:$0xff] %vm478_vm0, %v907_v44  ;;  %v910_v21 = vadd.f32 %v5662_v23, %v871_v45  ;;  %v873_v16 = vmul.f32 %v5649_v63, %v834_v47  ;;  %v835_v19 = vmul.f32 %v5644_v18, %v5588_v26 }
 0x2cb   : > { %940 = vst.msk [vmem:[#allocation2 + $0xc8] sm:$0xff] %vm478_vm0, %v908_v12  ;;  %941 = vst.msk [vmem:[#allocation2 + $0xd0] sm:$0xff] %vm478_vm0, %v909_v17  ;;  %v911_v48 = vadd.f32 %v5662_v23, %v872_v13  ;;  %v836_v50 = vmul.f32 %v5644_v18, %v5595_v30  ;;  %3433 = vmatmul.mubr.msk.f32.gmra.mrb[10].mxu0 %vm478_vm0, %v5740_v14 }
 0x2cc   : > { %942 = vst.msk [vmem:[#allocation2 + $0xd8] sm:$0xff] %vm478_vm0, %v910_v21  ;;  %v912_v51 = vadd.f32 %v5662_v23, %v873_v16  ;;  %v874_v53 = vmul.f32 %v5649_v63, %v835_v19  ;;  %3489 = vmatmul.mubr.msk.f32.gmra.mrb[10].mxu1 %vm478_vm0, %v5740_v14  ;;  %3435 = vmatprep.mubr.msk.f32.mxu0 %vm478_vm0, %v5743_v31 }
 0x2cd   : > { %943 = vst.msk [vmem:[#allocation2 + $0xe0] sm:$0xff] %vm478_vm0, %v911_v48  ;;  %v875_v26 = vmul.f32 %v5649_v63, %v836_v50  ;;  %3491 = vmatprep.mubr.msk.f32.mxu1 %vm478_vm0, %v5743_v31  ;;  %v5958_v63 = vld [vmem:[%s7262_s6] ss:$0 sm:$0xff] }
 0x2ce   : > { %944 = vst.msk [vmem:[#allocation2 + $0xe8] sm:$0xff] %vm478_vm0, %v912_v51  ;;  %v913_v30 = vadd.f32 %v5662_v23, %v874_v53 }
 0x2cf   : > { %v914_v18 = vadd.f32 %v5662_v23, %v875_v26  ;;  %3436 = vmatmul.mubr.msk.f32.gmra.mrb[12].mxu0 %vm478_vm0, %v5746_v15  ;;  %v5963_v23 = vld [vmem:[%s7264_s8] ss:$0 sm:$0xff] }
 0x2d0   : > { %945 = vst.msk [vmem:[#allocation2 + $0xf0] sm:$0xff] %vm478_vm0, %v913_v30  ;;  %3492 = vmatmul.mubr.msk.f32.gmra.mrb[12].mxu1 %vm478_vm0, %v5746_v15  ;;  %3438 = vmatprep.mubr.msk.f32.mxu0 %vm478_vm0, %v5774_v56 }
 0x2d1   : > { %946 = vst.msk [vmem:[#allocation2 + $0xf8] sm:$0xff] %vm478_vm0, %v914_v18  ;;  %3494 = vmatprep.mubr.msk.f32.mxu1 %vm478_vm0, %v5774_v56 }
 0x2d3   : > { %3439 = vmatmul.mubr.msk.f32.gmra.mrb[14].mxu0 %vm478_vm0, %v5777_v57 }
 0x2d4   : > { %3495 = vmatmul.mubr.msk.f32.gmra.mrb[14].mxu1 %vm478_vm0, %v5777_v57  ;;  %3441 = vmatprep.mubr.msk.f32.mxu0 %vm478_vm0, %v5796_v52 }
 0x2d5   : > { %3497 = vmatprep.mubr.msk.f32.mxu1 %vm478_vm0, %v5796_v52 }
 0x2d7   : > { %3442 = vmatmul.mubr.msk.f32.gmra.mrb[16].mxu0 %vm478_vm0, %v5801_v27 }
 0x2d8   : > { %3498 = vmatmul.mubr.msk.f32.gmra.mrb[16].mxu1 %vm478_vm0, %v5801_v27  ;;  %3444 = vmatprep.mubr.msk.f32.mxu0 %vm478_vm0, %v5804_v29 }
 0x2d9   : > { %3500 = vmatprep.mubr.msk.f32.mxu1 %vm478_vm0, %v5804_v29 }
 0x2db   : > { %3445 = vmatmul.mubr.msk.f32.gmra.mrb[18].mxu0 %vm478_vm0, %v5807_v32 }
 0x2dc   : > { %3501 = vmatmul.mubr.msk.f32.gmra.mrb[18].mxu1 %vm478_vm0, %v5807_v32  ;;  %3447 = vmatprep.mubr.msk.f32.mxu0 %vm478_vm0, %v5814_v2 }
 0x2dd   : > { %3503 = vmatprep.mubr.msk.f32.mxu1 %vm478_vm0, %v5814_v2 }
 0x2df   : > { %3448 = vmatmul.mubr.msk.f32.gmra.mrb[20].mxu0 %vm478_vm0, %v5817_v33 }
 0x2e0   : > { %3504 = vmatmul.mubr.msk.f32.gmra.mrb[20].mxu1 %vm478_vm0, %v5817_v33  ;;  %3450 = vmatprep.mubr.msk.f32.mxu0 %vm478_vm0, %v905_v54 }
 0x2e1   : > { %3506 = vmatprep.mubr.msk.f32.mxu1 %vm478_vm0, %v905_v54 }
 0x2e3   : > { %3451 = vmatmul.mubr.msk.f32.gmra.mrb[22].mxu0 %vm478_vm0, %v906_v42 }
 0x2e4   : > { %3507 = vmatmul.mubr.msk.f32.gmra.mrb[22].mxu1 %vm478_vm0, %v906_v42  ;;  %3453 = vmatprep.mubr.msk.f32.mxu0 %vm478_vm0, %v907_v44 }
 0x2e5   : > { %3509 = vmatprep.mubr.msk.f32.mxu1 %vm478_vm0, %v907_v44 }
 0x2e7   : > { %3454 = vmatmul.mubr.msk.f32.gmra.mrb[24].mxu0 %vm478_vm0, %v908_v12 }
 0x2e8   : > { %3510 = vmatmul.mubr.msk.f32.gmra.mrb[24].mxu1 %vm478_vm0, %v908_v12  ;;  %3456 = vmatprep.mubr.msk.f32.mxu0 %vm478_vm0, %v909_v17 }
 0x2e9   : > { %3512 = vmatprep.mubr.msk.f32.mxu1 %vm478_vm0, %v909_v17 }
 0x2eb   : > { %3457 = vmatmul.mubr.msk.f32.gmra.mrb[26].mxu0 %vm478_vm0, %v910_v21 }
 0x2ec   : > { %3513 = vmatmul.mubr.msk.f32.gmra.mrb[26].mxu1 %vm478_vm0, %v910_v21  ;;  %3459 = vmatprep.mubr.msk.f32.mxu0 %vm478_vm0, %v911_v48 }
 0x2ed   : > { %3515 = vmatprep.mubr.msk.f32.mxu1 %vm478_vm0, %v911_v48 }
 0x2ef   : > { %3460 = vmatmul.mubr.msk.f32.gmra.mrb[28].mxu0 %vm478_vm0, %v912_v51 }
 0x2f0   : > { %3516 = vmatmul.mubr.msk.f32.gmra.mrb[28].mxu1 %vm478_vm0, %v912_v51  ;;  %3462 = vmatprep.mubr.msk.f32.mxu0 %vm478_vm0, %v913_v30 }
 0x2f1   : > { %3518 = vmatprep.mubr.msk.f32.mxu1 %vm478_vm0, %v913_v30 }
 0x2f3   : > { %3463 = vmatmul.mubr.msk.f32.gmra.mrb[30].mxu0 %vm478_vm0, %v914_v18 }
 0x2f4   : > { %3519 = vmatmul.mubr.msk.f32.gmra.mrb[30].mxu1 %vm478_vm0, %v914_v18 }
 0x38a   : > { %v3419_v22 = vpop.f32.mrb[0].mxu0  ;;  %v3475_v9 = vpop.f32.mrb[0].mxu1 }
 0x38b   : > { %v1126_v25 = vadd.f32 %v3419_v22, %v5958_v63  ;;  %v1394_v28 = vadd.f32 %v3475_v9, %v5963_v23  ;;  %v1120_v11 = vpop.f32.mrb[1].mxu0  ;;  %v1388_v1 = vpop.f32.mrb[1].mxu1 }
 0x38c   : > { %v1121_v3 = vadd.f32 %v5958_v63, %v1120_v11  ;;  %v1389_v14 = vadd.f32 %v5963_v23, %v1388_v1 }
 0x38d   : > { %1280 = vst.msk [vmem:[#allocation3 + $0x8] sm:$0xff] %vm478_vm0, %v1126_v25  ;;  %1548 = vst.msk [vmem:[#allocation4 + $0x8] sm:$0xff] %vm478_vm0, %v1394_v28 }
 0x38e   : > { %1279 = vst.msk [vmem:[#allocation3] sm:$0xff] %vm478_vm0, %v1121_v3  ;;  %1547 = vst.msk [vmem:[#allocation4] sm:$0xff] %vm478_vm0, %v1389_v14  ;;  %v3422_v31 = vpop.f32.mrb[2].mxu0 }
 0x38f   : > { %v3478_v15 = vpop.f32.mrb[2].mxu1  ;;  %v1136_v34 = vadd.f32 %v3422_v31, %v5958_v63  ;;  %v1130_v7 = vpop.f32.mrb[3].mxu0 }
 0x390   : > { %v1404_v6 = vadd.f32 %v3478_v15, %v5963_v23  ;;  %v1398_v62 = vpop.f32.mrb[3].mxu1  ;;  %v1131_v5 = vadd.f32 %v5958_v63, %v1130_v7 }
 0x391   : > { %v1399_v24 = vadd.f32 %v5963_v23, %v1398_v62  ;;  %1282 = vst.msk [vmem:[#allocation3 + $0x18] sm:$0xff] %vm478_vm0, %v1136_v34 }
 0x392   : > { %1550 = vst.msk [vmem:[#allocation4 + $0x18] sm:$0xff] %vm478_vm0, %v1404_v6  ;;  %1281 = vst.msk [vmem:[#allocation3 + $0x10] sm:$0xff] %vm478_vm0, %v1131_v5  ;;  %v3425_v37 = vpop.f32.mrb[4].mxu0 }
 0x393   : > { %1549 = vst.msk [vmem:[#allocation4 + $0x10] sm:$0xff] %vm478_vm0, %v1399_v24  ;;  %v3481_v56 = vpop.f32.mrb[4].mxu1  ;;  %v1146_v57 = vadd.f32 %v3425_v37, %v5958_v63  ;;  %v1140_v40 = vpop.f32.mrb[5].mxu0 }
 0x394   : > { %v1414_v59 = vadd.f32 %v3481_v56, %v5963_v23  ;;  %v1408_v43 = vpop.f32.mrb[5].mxu1  ;;  %v1141_v46 = vadd.f32 %v5958_v63, %v1140_v40 }
 0x395   : > { %v1409_v49 = vadd.f32 %v5963_v23, %v1408_v43  ;;  %1284 = vst.msk [vmem:[#allocation3 + $0x28] sm:$0xff] %vm478_vm0, %v1146_v57 }
 0x396   : > { %1552 = vst.msk [vmem:[#allocation4 + $0x28] sm:$0xff] %vm478_vm0, %v1414_v59  ;;  %1283 = vst.msk [vmem:[#allocation3 + $0x20] sm:$0xff] %vm478_vm0, %v1141_v46  ;;  %v3428_v52 = vpop.f32.mrb[6].mxu0 }
 0x397   : > { %1551 = vst.msk [vmem:[#allocation4 + $0x20] sm:$0xff] %vm478_vm0, %v1409_v49  ;;  %v3484_v35 = vpop.f32.mrb[6].mxu1  ;;  %v1156_v60 = vadd.f32 %v3428_v52, %v5958_v63  ;;  %v1150_v29 = vpop.f32.mrb[7].mxu0 }
 0x398   : > { %v1424_v27 = vadd.f32 %v3484_v35, %v5963_v23  ;;  %v1418_v32 = vpop.f32.mrb[7].mxu1  ;;  %v1151_v0 = vadd.f32 %v5958_v63, %v1150_v29 }
 0x399   : > { %v1419_v2 = vadd.f32 %v5963_v23, %v1418_v32  ;;  %1286 = vst.msk [vmem:[#allocation3 + $0x38] sm:$0xff] %vm478_vm0, %v1156_v60 }
 0x39a   : > { %1554 = vst.msk [vmem:[#allocation4 + $0x38] sm:$0xff] %vm478_vm0, %v1424_v27  ;;  %1285 = vst.msk [vmem:[#allocation3 + $0x30] sm:$0xff] %vm478_vm0, %v1151_v0  ;;  %v3431_v33 = vpop.f32.mrb[8].mxu0 }
 0x39b   : > { %1553 = vst.msk [vmem:[#allocation4 + $0x30] sm:$0xff] %vm478_vm0, %v1419_v2  ;;  %v3487_v20 = vpop.f32.mrb[8].mxu1  ;;  %v1166_v10 = vadd.f32 %v3431_v33, %v5958_v63  ;;  %v1160_v58 = vpop.f32.mrb[9].mxu0 }
 0x39c   : > { %v1434_v55 = vadd.f32 %v3487_v20, %v5963_v23  ;;  %v1428_v61 = vpop.f32.mrb[9].mxu1  ;;  %v1161_v36 = vadd.f32 %v5958_v63, %v1160_v58 }
 0x39d   : > { %v1429_v39 = vadd.f32 %v5963_v23, %v1428_v61  ;;  %1288 = vst.msk [vmem:[#allocation3 + $0x48] sm:$0xff] %vm478_vm0, %v1166_v10 }
 0x39e   : > { %1556 = vst.msk [vmem:[#allocation4 + $0x48] sm:$0xff] %vm478_vm0, %v1434_v55  ;;  %1287 = vst.msk [vmem:[#allocation3 + $0x40] sm:$0xff] %vm478_vm0, %v1161_v36  ;;  %v3434_v4 = vpop.f32.mrb[10].mxu0 }
 0x39f   : > { %1555 = vst.msk [vmem:[#allocation4 + $0x40] sm:$0xff] %vm478_vm0, %v1429_v39  ;;  %v3490_v54 = vpop.f32.mrb[10].mxu1  ;;  %v1176_v8 = vadd.f32 %v3434_v4, %v5958_v63  ;;  %v1170_v41 = vpop.f32.mrb[11].mxu0 }
 0x3a0   : > { %v1444_v38 = vadd.f32 %v3490_v54, %v5963_v23  ;;  %v1438_v42 = vpop.f32.mrb[11].mxu1  ;;  %v1171_v44 = vadd.f32 %v5958_v63, %v1170_v41 }
 0x3a1   : > { %v1439_v45 = vadd.f32 %v5963_v23, %v1438_v42  ;;  %1290 = vst.msk [vmem:[#allocation3 + $0x58] sm:$0xff] %vm478_vm0, %v1176_v8 }
 0x3a2   : > { %1558 = vst.msk [vmem:[#allocation4 + $0x58] sm:$0xff] %vm478_vm0, %v1444_v38  ;;  %1289 = vst.msk [vmem:[#allocation3 + $0x50] sm:$0xff] %vm478_vm0, %v1171_v44  ;;  %v3437_v47 = vpop.f32.mrb[12].mxu0 }
 0x3a3   : > { %1557 = vst.msk [vmem:[#allocation4 + $0x50] sm:$0xff] %vm478_vm0, %v1439_v45  ;;  %v3493_v12 = vpop.f32.mrb[12].mxu1  ;;  %v1186_v17 = vadd.f32 %v3437_v47, %v5958_v63  ;;  %v1180_v21 = vpop.f32.mrb[13].mxu0 }
 0x3a4   : > { %v1454_v13 = vadd.f32 %v3493_v12, %v5963_v23  ;;  %v1448_v16 = vpop.f32.mrb[13].mxu1  ;;  %v1181_v19 = vadd.f32 %v5958_v63, %v1180_v21 }
 0x3a5   : > { %v1449_v48 = vadd.f32 %v5963_v23, %v1448_v16  ;;  %1292 = vst.msk [vmem:[#allocation3 + $0x68] sm:$0xff] %vm478_vm0, %v1186_v17 }
 0x3a6   : > { %1560 = vst.msk [vmem:[#allocation4 + $0x68] sm:$0xff] %vm478_vm0, %v1454_v13  ;;  %1291 = vst.msk [vmem:[#allocation3 + $0x60] sm:$0xff] %vm478_vm0, %v1181_v19  ;;  %v3440_v50 = vpop.f32.mrb[14].mxu0 }
 0x3a7   : > { %1559 = vst.msk [vmem:[#allocation4 + $0x60] sm:$0xff] %vm478_vm0, %v1449_v48  ;;  %v3496_v51 = vpop.f32.mrb[14].mxu1  ;;  %v1196_v53 = vadd.f32 %v3440_v50, %v5958_v63  ;;  %v1190_v30 = vpop.f32.mrb[15].mxu0 }
 0x3a8   : > { %v1464_v26 = vadd.f32 %v3496_v51, %v5963_v23  ;;  %v1458_v18 = vpop.f32.mrb[15].mxu1  ;;  %v1191_v22 = vadd.f32 %v5958_v63, %v1190_v30 }
 0x3a9   : > { %v1459_v9 = vadd.f32 %v5963_v23, %v1458_v18  ;;  %1294 = vst.msk [vmem:[#allocation3 + $0x78] sm:$0xff] %vm478_vm0, %v1196_v53 }
 0x3aa   : > { %1562 = vst.msk [vmem:[#allocation4 + $0x78] sm:$0xff] %vm478_vm0, %v1464_v26  ;;  %1293 = vst.msk [vmem:[#allocation3 + $0x70] sm:$0xff] %vm478_vm0, %v1191_v22  ;;  %v3443_v25 = vpop.f32.mrb[16].mxu0 }
 0x3ab   : > { %1561 = vst.msk [vmem:[#allocation4 + $0x70] sm:$0xff] %vm478_vm0, %v1459_v9  ;;  %v3499_v28 = vpop.f32.mrb[16].mxu1  ;;  %v1206_v11 = vadd.f32 %v3443_v25, %v5958_v63  ;;  %v1200_v3 = vpop.f32.mrb[17].mxu0 }
 0x3ac   : > { %v1474_v1 = vadd.f32 %v3499_v28, %v5963_v23  ;;  %v1468_v14 = vpop.f32.mrb[17].mxu1  ;;  %v1201_v31 = vadd.f32 %v5958_v63, %v1200_v3 }
 0x3ad   : > { %v1469_v15 = vadd.f32 %v5963_v23, %v1468_v14  ;;  %1296 = vst.msk [vmem:[#allocation3 + $0x88] sm:$0xff] %vm478_vm0, %v1206_v11 }
 0x3ae   : > { %1564 = vst.msk [vmem:[#allocation4 + $0x88] sm:$0xff] %vm478_vm0, %v1474_v1  ;;  %1295 = vst.msk [vmem:[#allocation3 + $0x80] sm:$0xff] %vm478_vm0, %v1201_v31  ;;  %v3446_v34 = vpop.f32.mrb[18].mxu0 }
 0x3af   : > { %1563 = vst.msk [vmem:[#allocation4 + $0x80] sm:$0xff] %vm478_vm0, %v1469_v15  ;;  %v3502_v6 = vpop.f32.mrb[18].mxu1  ;;  %v1216_v7 = vadd.f32 %v3446_v34, %v5958_v63  ;;  %v1210_v5 = vpop.f32.mrb[19].mxu0 }
 0x3b0   : > { %v1484_v62 = vadd.f32 %v3502_v6, %v5963_v23  ;;  %v1478_v24 = vpop.f32.mrb[19].mxu1  ;;  %v1211_v37 = vadd.f32 %v5958_v63, %v1210_v5 }
 0x3b1   : > { %v1479_v56 = vadd.f32 %v5963_v23, %v1478_v24  ;;  %1298 = vst.msk [vmem:[#allocation3 + $0x98] sm:$0xff] %vm478_vm0, %v1216_v7 }
 0x3b2   : > { %1566 = vst.msk [vmem:[#allocation4 + $0x98] sm:$0xff] %vm478_vm0, %v1484_v62  ;;  %1297 = vst.msk [vmem:[#allocation3 + $0x90] sm:$0xff] %vm478_vm0, %v1211_v37  ;;  %v3449_v57 = vpop.f32.mrb[20].mxu0 }
 0x3b3   : > { %1565 = vst.msk [vmem:[#allocation4 + $0x90] sm:$0xff] %vm478_vm0, %v1479_v56  ;;  %v3505_v59 = vpop.f32.mrb[20].mxu1  ;;  %v1226_v40 = vadd.f32 %v3449_v57, %v5958_v63  ;;  %v1220_v46 = vpop.f32.mrb[21].mxu0 }
 0x3b4   : > { %v1494_v43 = vadd.f32 %v3505_v59, %v5963_v23  ;;  %v1488_v49 = vpop.f32.mrb[21].mxu1  ;;  %v1221_v52 = vadd.f32 %v5958_v63, %v1220_v46 }
 0x3b5   : > { %v1489_v35 = vadd.f32 %v5963_v23, %v1488_v49  ;;  %1300 = vst.msk [vmem:[#allocation3 + $0xa8] sm:$0xff] %vm478_vm0, %v1226_v40 }
 0x3b6   : > { %1568 = vst.msk [vmem:[#allocation4 + $0xa8] sm:$0xff] %vm478_vm0, %v1494_v43  ;;  %1299 = vst.msk [vmem:[#allocation3 + $0xa0] sm:$0xff] %vm478_vm0, %v1221_v52  ;;  %v3452_v60 = vpop.f32.mrb[22].mxu0 }
 0x3b7   : > { %1567 = vst.msk [vmem:[#allocation4 + $0xa0] sm:$0xff] %vm478_vm0, %v1489_v35  ;;  %v3508_v27 = vpop.f32.mrb[22].mxu1  ;;  %v1236_v29 = vadd.f32 %v3452_v60, %v5958_v63  ;;  %v1230_v0 = vpop.f32.mrb[23].mxu0 }
 0x3b8   : > { %v1504_v32 = vadd.f32 %v3508_v27, %v5963_v23  ;;  %v1498_v2 = vpop.f32.mrb[23].mxu1  ;;  %v1231_v33 = vadd.f32 %v5958_v63, %v1230_v0 }
 0x3b9   : > { %v1499_v20 = vadd.f32 %v5963_v23, %v1498_v2  ;;  %1302 = vst.msk [vmem:[#allocation3 + $0xb8] sm:$0xff] %vm478_vm0, %v1236_v29 }
 0x3ba   : > { %1570 = vst.msk [vmem:[#allocation4 + $0xb8] sm:$0xff] %vm478_vm0, %v1504_v32  ;;  %1301 = vst.msk [vmem:[#allocation3 + $0xb0] sm:$0xff] %vm478_vm0, %v1231_v33  ;;  %v3455_v10 = vpop.f32.mrb[24].mxu0 }
 0x3bb   : > { %1569 = vst.msk [vmem:[#allocation4 + $0xb0] sm:$0xff] %vm478_vm0, %v1499_v20  ;;  %v3511_v55 = vpop.f32.mrb[24].mxu1  ;;  %v1246_v58 = vadd.f32 %v3455_v10, %v5958_v63  ;;  %v1240_v36 = vpop.f32.mrb[25].mxu0 }
 0x3bc   : > { %v1514_v61 = vadd.f32 %v3511_v55, %v5963_v23  ;;  %v1508_v39 = vpop.f32.mrb[25].mxu1  ;;  %v1241_v4 = vadd.f32 %v5958_v63, %v1240_v36 }
 0x3bd   : > { %v1509_v54 = vadd.f32 %v5963_v23, %v1508_v39  ;;  %1304 = vst.msk [vmem:[#allocation3 + $0xc8] sm:$0xff] %vm478_vm0, %v1246_v58 }
 0x3be   : > { %1572 = vst.msk [vmem:[#allocation4 + $0xc8] sm:$0xff] %vm478_vm0, %v1514_v61  ;;  %1303 = vst.msk [vmem:[#allocation3 + $0xc0] sm:$0xff] %vm478_vm0, %v1241_v4  ;;  %v3458_v8 = vpop.f32.mrb[26].mxu0 }
 0x3bf   : > { %1571 = vst.msk [vmem:[#allocation4 + $0xc0] sm:$0xff] %vm478_vm0, %v1509_v54  ;;  %v3514_v38 = vpop.f32.mrb[26].mxu1  ;;  %v1256_v41 = vadd.f32 %v3458_v8, %v5958_v63  ;;  %v1250_v44 = vpop.f32.mrb[27].mxu0 }
 0x3c0   : > { %v1524_v42 = vadd.f32 %v3514_v38, %v5963_v23  ;;  %v1518_v45 = vpop.f32.mrb[27].mxu1  ;;  %v1251_v47 = vadd.f32 %v5958_v63, %v1250_v44 }
 0x3c1   : > { %v1519_v12 = vadd.f32 %v5963_v23, %v1518_v45  ;;  %1306 = vst.msk [vmem:[#allocation3 + $0xd8] sm:$0xff] %vm478_vm0, %v1256_v41 }
 0x3c2   : > { %1574 = vst.msk [vmem:[#allocation4 + $0xd8] sm:$0xff] %vm478_vm0, %v1524_v42  ;;  %1305 = vst.msk [vmem:[#allocation3 + $0xd0] sm:$0xff] %vm478_vm0, %v1251_v47  ;;  %v3461_v17 = vpop.f32.mrb[28].mxu0 }
 0x3c3   : > { %1573 = vst.msk [vmem:[#allocation4 + $0xd0] sm:$0xff] %vm478_vm0, %v1519_v12  ;;  %v3517_v13 = vpop.f32.mrb[28].mxu1  ;;  %v1266_v21 = vadd.f32 %v3461_v17, %v5958_v63  ;;  %v1260_v19 = vpop.f32.mrb[29].mxu0 }
 0x3c4   : > { %v1534_v16 = vadd.f32 %v3517_v13, %v5963_v23  ;;  %v1528_v48 = vpop.f32.mrb[29].mxu1  ;;  %v1261_v50 = vadd.f32 %v5958_v63, %v1260_v19 }
 0x3c5   : > { %v1529_v51 = vadd.f32 %v5963_v23, %v1528_v48  ;;  %1308 = vst.msk [vmem:[#allocation3 + $0xe8] sm:$0xff] %vm478_vm0, %v1266_v21 }
 0x3c6   : > { %1576 = vst.msk [vmem:[#allocation4 + $0xe8] sm:$0xff] %vm478_vm0, %v1534_v16  ;;  %1307 = vst.msk [vmem:[#allocation3 + $0xe0] sm:$0xff] %vm478_vm0, %v1261_v50  ;;  %v3464_v53 = vpop.f32.mrb[30].mxu0 }
 0x3c7   : > { %1575 = vst.msk [vmem:[#allocation4 + $0xe0] sm:$0xff] %vm478_vm0, %v1529_v51  ;;  %v3520_v26 = vpop.f32.mrb[30].mxu1  ;;  %v1276_v30 = vadd.f32 %v3464_v53, %v5958_v63  ;;  %v1270_v22 = vpop.f32.mrb[31].mxu0 }
 0x3c8   : > { %v1544_v18 = vadd.f32 %v3520_v26, %v5963_v23  ;;  %v1538_v9 = vpop.f32.mrb[31].mxu1  ;;  %v1271_v25 = vadd.f32 %v5958_v63, %v1270_v22 }
 0x3c9   : > { %v1539_v28 = vadd.f32 %v5963_v23, %v1538_v9  ;;  %1310 = vst.msk [vmem:[#allocation3 + $0xf8] sm:$0xff] %vm478_vm0, %v1276_v30 }
 0x3ca   : > { %1578 = vst.msk [vmem:[#allocation4 + $0xf8] sm:$0xff] %vm478_vm0, %v1544_v18  ;;  %1309 = vst.msk [vmem:[#allocation3 + $0xf0] sm:$0xff] %vm478_vm0, %v1271_v25 }
 0x3cb   : > { %1577 = vst.msk [vmem:[#allocation4 + $0xf0] sm:$0xff] %vm478_vm0, %v1539_v28 }
 0x3cc PF: > { %v1597_v11 = vld [vmem:[%s7259_s3] sm:$0xff]  ;;  %v1598_v63 = vld [vmem:[%s7259_s3 + $0x8] sm:$0xff]  ;;  %v1599_v23 = vld [vmem:[%s7259_s3 + $0x10] sm:$0xff]  ;;  %s3158_s13 = sshll.u32 %s4762_s23, 7  ;;  %vm1608_vm12 = vcmask 261120   ;;  %s7346_s11 = sld [smem:[#allocation95_spill]] }
 0x3cd   : > { %v3713_v1 = vpack.c.bf16 %v1598_v63, %v1597_v11  ;;  %v1600_v3 = vld [vmem:[%s7259_s3 + $0x18] sm:$0xff]  ;;  %s6106_s15 = scalar_lea.vmem [#allocation2], %s3158_s13  ;;  %s6319_s16 = smov 0  }
 0x3ce   : > { %v3717_v14 = vpack.c.bf16 %v1600_v3, %v1599_v23  ;;  %v6109_v31 = vld [vmem:[%s6106_s15] sm:$0xff]  ;;  %v6119_v34 = vld [vmem:[%s6106_s15 + $0x8] sm:$0xff]  ;;  %v6125_v7 = vld [vmem:[%s6106_s15 + $0x10] sm:$0xff] }
 0x3cf   : > { %3714 = vmatprep.subr.bf16.mxu0 %v3713_v1  ;;  %3809 = vmatprep.subr.bf16.mxu1 %v3713_v1  ;;  %7330 = vst [vmem:[#allocation16_spill] sm:$0xff] %v6109_v31  ;;  %v6112_v15 = vld [vmem:[%s6106_s15 + $0x40] sm:$0xff]  ;;  %7332 = vst [vmem:[#allocation18_spill] sm:$0xff] %v6119_v34  ;;  %v6122_v6 = vld [vmem:[%s6106_s15 + $0x48] sm:$0xff] }
 0x3d0   : > { %7331 = vst [vmem:[#allocation17_spill] sm:$0xff] %v6112_v15  ;;  %3716 = vmatpush3.bf16.msra.mxu0 %v3713_v1  ;;  %3811 = vmatpush3.bf16.msra.mxu1 %v3713_v1  ;;  %7333 = vst [vmem:[#allocation19_spill] sm:$0xff] %v6122_v6  ;;  %v6128_v62 = vld [vmem:[%s6106_s15 + $0x50] sm:$0xff]  ;;  %v6139_v5 = vld [vmem:[%s6106_s15 + $0x18] sm:$0xff] }
 0x3d1   : > { %3718 = vmatprep.subr.bf16.mxu0 %v3717_v14  ;;  %3810 = vmatprep.subr.bf16.mxu1 %v3717_v14  ;;  %7334 = vst [vmem:[#allocation20_spill] sm:$0xff] %v6125_v7  ;;  %7335 = vst [vmem:[#allocation21_spill] sm:$0xff] %v6128_v62  ;;  %v6142_v24 = vld [vmem:[%s6106_s15 + $0x58] sm:$0xff]  ;;  %v6145_v37 = vld [vmem:[%s6106_s15 + $0x20] sm:$0xff] }
 0x3d2   : > { %3529 = vmatprep.mubr.msk.f32.mxu0 %vm1608_vm12, %v6109_v31  ;;  %3541 = vmatprep.mubr.msk.f32.mxu1 %vm1608_vm12, %v6112_v15  ;;  %7336 = vst [vmem:[#allocation22_spill] sm:$0xff] %v6139_v5  ;;  %7337 = vst [vmem:[#allocation23_spill] sm:$0xff] %v6142_v24  ;;  %v6148_v56 = vld [vmem:[%s6106_s15 + $0x60] sm:$0xff]  ;;  %v6159_v57 = vld [vmem:[%s6106_s15 + $0x28] sm:$0xff]  ;;  %v6311_v15 = vmov -inf   ;;  %v6313_v31 = vmov -inf  }
 0x3d3   : > { %7338 = vst [vmem:[#allocation24_spill] sm:$0xff] %v6145_v37  ;;  %7339 = vst [vmem:[#allocation25_spill] sm:$0xff] %v6148_v56  ;;  %v6162_v59 = vld [vmem:[%s6106_s15 + $0x68] sm:$0xff]  ;;  %v6165_v40 = vld [vmem:[%s6106_s15 + $0x30] sm:$0xff] }
 0x3d4   : > { %3720 = vmatpush3.bf16.msra.mxu0 %v3717_v14  ;;  %3812 = vmatpush3.bf16.msra.mxu1 %v3717_v14  ;;  %7340 = vst [vmem:[#allocation26_spill] sm:$0xff] %v6159_v57  ;;  %7341 = vst [vmem:[#allocation27_spill] sm:$0xff] %v6162_v59  ;;  %v6168_v43 = vld [vmem:[%s6106_s15 + $0x70] sm:$0xff]  ;;  %v6179_v46 = vld [vmem:[%s6106_s15 + $0x38] sm:$0xff] }
 0x3d5   : > { %7342 = vst [vmem:[#allocation28_spill] sm:$0xff] %v6165_v40  ;;  %7343 = vst [vmem:[#allocation29_spill] sm:$0xff] %v6168_v43  ;;  %v6182_v49 = vld [vmem:[%s6106_s15 + $0x78] sm:$0xff]  ;;  %v3159_v52 = vld [vmem:[%s7346_s11] ss:$0 sm:$0xff] }
 0x3d6   : > { %7344 = vst [vmem:[#allocation30_spill] sm:$0xff] %v6179_v46  ;;  %7345 = vst [vmem:[#allocation31_spill] sm:$0xff] %v6182_v49 }
 0x3d7   : > { %3530 = vmatmul.mubr.msk.f32.vlgmr.msra.gmra.mrb[0].mxu0 %vm1608_vm12, %v6119_v34  ;;  %3542 = vmatmul.mubr.msk.f32.vlgmr.msra.gmra.mrb[0].mxu1 %vm1608_vm12, %v6122_v6  ;;  %v6315_v6 = vmov -inf   ;;  %v6317_v34 = vmov -inf  }
 0x3d8   : > { %3532 = vmatprep.mubr.msk.f32.mxu0 %vm1608_vm12, %v6125_v7  ;;  %3544 = vmatprep.mubr.msk.f32.mxu1 %vm1608_vm12, %v6128_v62  ;;  %v6303_v62 = vmov -inf   ;;  %v6305_v7 = vmov -inf  }
 0x3db   : > { %3533 = vmatmul.mubr.msk.f32.gmra.mrb[2].mxu0 %vm1608_vm12, %v6139_v5  ;;  %3545 = vmatmul.mubr.msk.f32.gmra.mrb[2].mxu1 %vm1608_vm12, %v6142_v24  ;;  %v6307_v24 = vmov -inf   ;;  %v6309_v5 = vmov -inf  }
 0x3dc   : > { %3535 = vmatprep.mubr.msk.f32.mxu0 %vm1608_vm12, %v6145_v37  ;;  %3547 = vmatprep.mubr.msk.f32.mxu1 %vm1608_vm12, %v6148_v56  ;;  %v6295_v56 = vmov -inf   ;;  %v6297_v37 = vmov -inf  }
 0x3df   : > { %3536 = vmatmul.mubr.msk.f32.gmra.mrb[4].mxu0 %vm1608_vm12, %v6159_v57  ;;  %3548 = vmatmul.mubr.msk.f32.gmra.mrb[4].mxu1 %vm1608_vm12, %v6162_v59  ;;  %v6299_v59 = vmov -inf   ;;  %v6301_v57 = vmov -inf  }
 0x3e0   : > { %3538 = vmatprep.mubr.msk.f32.mxu0 %vm1608_vm12, %v6165_v40  ;;  %3550 = vmatprep.mubr.msk.f32.mxu1 %vm1608_vm12, %v6168_v43  ;;  %v6287_v43 = vmov -inf   ;;  %v6289_v40 = vmov -inf  }
 0x3e3   : > { %3539 = vmatmul.mubr.msk.f32.gmra.mrb[6].mxu0 %vm1608_vm12, %v6179_v46  ;;  %3551 = vmatmul.mubr.msk.f32.gmra.mrb[6].mxu1 %vm1608_vm12, %v6182_v49  ;;  %v6291_v49 = vmov -inf   ;;  %v6293_v46 = vmov -inf  }
 0x4aa   : > { %v3531_v35 = vpop.f32.mrb[0].mxu0  ;;  %v3543_v60 = vpop.f32.mrb[0].mxu1 }
 0x4ab   : > { %v1729_v27 = vadd.f32 %v3531_v35, %v3159_v52  ;;  %v1769_v29 = vadd.f32 %v3543_v60, %v3159_v52  ;;  %v1723_v32 = vpop.f32.mrb[1].mxu0  ;;  %v1763_v0 = vpop.f32.mrb[1].mxu1  ;;  %v6223_v60 = vmov 0.0  }
 0x4ac   : > { %v1724_v2 = vadd.f32 %v3159_v52, %v1723_v32  ;;  %v1764_v33 = vadd.f32 %v3159_v52, %v1763_v0  ;;  %v6229_v32 = vmov 0.0   ;;  %v6231_v0 = vmov 0.0  }
 0x4ad   : > { %v6191_v20 = vmul.f32 0.17677669, %v1729_v27  ;;  %v6193_v10 = vmul.f32 0.17677669, %v1769_v29  ;;  %v6225_v27 = vmov 0.0   ;;  %v6227_v29 = vmov 0.0  }
 0x4ae   : > { %v6195_v55 = vmul.f32 0.17677669, %v1724_v2  ;;  %v6197_v58 = vmul.f32 0.17677669, %v1764_v33  ;;  %v3534_v61 = vpop.f32.mrb[2].mxu0  ;;  %v3546_v36 = vpop.f32.mrb[2].mxu1 }
 0x4af   : > { %7347 = vst [vmem:[#allocation32_spill] sm:$0xff] %v6191_v20  ;;  %7348 = vst [vmem:[#allocation33_spill] sm:$0xff] %v6193_v10  ;;  %v1739_v39 = vadd.f32 %v3534_v61, %v3159_v52  ;;  %v1779_v4 = vadd.f32 %v3546_v36, %v3159_v52  ;;  %v1733_v54 = vpop.f32.mrb[3].mxu0  ;;  %v1773_v8 = vpop.f32.mrb[3].mxu1  ;;  %v6233_v2 = vmov 0.0   ;;  %v6237_v33 = vmov 0.0  }
 0x4b0   : > { %7349 = vst [vmem:[#allocation34_spill] sm:$0xff] %v6195_v55  ;;  %7350 = vst [vmem:[#allocation35_spill] sm:$0xff] %v6197_v58  ;;  %v1734_v38 = vadd.f32 %v3159_v52, %v1733_v54  ;;  %v1774_v41 = vadd.f32 %v3159_v52, %v1773_v8  ;;  %v6239_v61 = vmov 0.0   ;;  %v6241_v36 = vmov 0.0  }
 0x4b1   : > { %v6199_v42 = vmul.f32 0.17677669, %v1739_v39  ;;  %v6201_v44 = vmul.f32 0.17677669, %v1779_v4  ;;  %7363 = vst [vmem:[#allocation48_spill] sm:$0xff] %v6225_v27  ;;  %7365 = vst [vmem:[#allocation50_spill] sm:$0xff] %v6237_v33 }
 0x4b2   : > { %v6203_v45 = vmul.f32 0.17677669, %v1734_v38  ;;  %v6205_v47 = vmul.f32 0.17677669, %v1774_v41  ;;  %v3537_v12 = vpop.f32.mrb[4].mxu0  ;;  %v3549_v17 = vpop.f32.mrb[4].mxu1 }
 0x4b3   : > { %7351 = vst [vmem:[#allocation36_spill] sm:$0xff] %v6199_v42  ;;  %7352 = vst [vmem:[#allocation37_spill] sm:$0xff] %v6201_v44  ;;  %v1749_v13 = vadd.f32 %v3537_v12, %v3159_v52  ;;  %v1789_v21 = vadd.f32 %v3549_v17, %v3159_v52  ;;  %v1743_v16 = vpop.f32.mrb[5].mxu0  ;;  %v1783_v19 = vpop.f32.mrb[5].mxu1  ;;  %v6243_v39 = vmov 0.0   ;;  %v6245_v4 = vmov 0.0  }
 0x4b4   : > { %7353 = vst [vmem:[#allocation38_spill] sm:$0xff] %v6203_v45  ;;  %7354 = vst [vmem:[#allocation39_spill] sm:$0xff] %v6205_v47  ;;  %v1744_v48 = vadd.f32 %v3159_v52, %v1743_v16  ;;  %v1784_v50 = vadd.f32 %v3159_v52, %v1783_v19  ;;  %v6247_v54 = vmov 0.0   ;;  %v6249_v8 = vmov 0.0  }
 0x4b5   : > { %v6207_v51 = vmul.f32 0.17677669, %v1749_v13  ;;  %v6209_v53 = vmul.f32 0.17677669, %v1789_v21  ;;  %7366 = vst [vmem:[#allocation51_spill] sm:$0xff] %v6243_v39  ;;  %7367 = vst [vmem:[#allocation52_spill] sm:$0xff] %v6249_v8 }
 0x4b6   : > { %v6211_v26 = vmul.f32 0.17677669, %v1744_v48  ;;  %v6213_v30 = vmul.f32 0.17677669, %v1784_v50  ;;  %v3540_v18 = vpop.f32.mrb[6].mxu0  ;;  %v3552_v22 = vpop.f32.mrb[6].mxu1 }
 0x4b7   : > { %7355 = vst [vmem:[#allocation40_spill] sm:$0xff] %v6207_v51  ;;  %7356 = vst [vmem:[#allocation41_spill] sm:$0xff] %v6209_v53  ;;  %v1759_v9 = vadd.f32 %v3540_v18, %v3159_v52  ;;  %v1799_v25 = vadd.f32 %v3552_v22, %v3159_v52  ;;  %v1753_v28 = vpop.f32.mrb[7].mxu0  ;;  %v1793_v11 = vpop.f32.mrb[7].mxu1  ;;  %v6251_v38 = vmov 0.0   ;;  %v6253_v41 = vmov 0.0  }
 0x4b8   : > { %7357 = vst [vmem:[#allocation42_spill] sm:$0xff] %v6211_v26  ;;  %7358 = vst [vmem:[#allocation43_spill] sm:$0xff] %v6213_v30  ;;  %v1754_v63 = vadd.f32 %v3159_v52, %v1753_v28  ;;  %v1794_v23 = vadd.f32 %v3159_v52, %v1793_v11  ;;  %v6235_v52 = vmov 0.0   ;;  %v6255_v12 = vmov 0.0  }
 0x4b9   : > { %v6215_v1 = vmul.f32 0.17677669, %v1759_v9  ;;  %v6217_v3 = vmul.f32 0.17677669, %v1799_v25  ;;  %7364 = vst [vmem:[#allocation49_spill] sm:$0xff] %v6235_v52  ;;  %v6257_v17 = vmov 0.0  }
 0x4ba   : > { %v6219_v14 = vmul.f32 0.17677669, %v1754_v63  ;;  %v6221_v35 = vmul.f32 0.17677669, %v1794_v23  ;;  %v6259_v13 = vmov 0.0   ;;  %v6261_v21 = vmov 0.0  }
 0x4bb   : > { %7359 = vst [vmem:[#allocation44_spill] sm:$0xff] %v6215_v1  ;;  %7360 = vst [vmem:[#allocation45_spill] sm:$0xff] %v6217_v3  ;;  %v6263_v16 = vmov 0.0   ;;  %v6265_v19 = vmov 0.0   ;;  %v6267_v48 = vmov 0.0   ;;  %v6269_v50 = vmov 0.0  }
 0x4bc   : > { %7361 = vst [vmem:[#allocation46_spill] sm:$0xff] %v6219_v14  ;;  %7362 = vst [vmem:[#allocation47_spill] sm:$0xff] %v6221_v35  ;;  %v6271_v18 = vmov 0.0   ;;  %v6273_v22 = vmov 0.0   ;;  %v6275_v9 = vmov 0.0   ;;  %v6277_v25 = vmov 0.0  }
 0x4bd   : > { %v6279_v28 = vmov 0.0   ;;  %v6281_v11 = vmov 0.0   ;;  %v6283_v63 = vmov 0.0   ;;  %v6285_v23 = vmov 0.0  }
 0x4be LB: >> { %7373 = vst [vmem:[#allocation53_spill] sm:$0xff] %v4782_v60  ;;  %v7374_v27 = vld [vmem:[#allocation48_spill] sm:$0xff]  ;;  %7376 = vst [vmem:[#allocation54_spill] sm:$0xff] %v4790_v29  ;;  %v7382_v33 = vld [vmem:[#allocation50_spill] sm:$0xff]  ;;  %s3176_s20 = sshll.u32 %s4974_s16, 7  ;;  %s1823_s13 = sadd.s32 1, %s4974_s16   ;;  %s4974_s16 = sphi %s6319_s16, %s7557_s16   ;;  %v4970_v34 = vphi %v6317_v34, %v7556_v34   ;;  %v4966_v6 = vphi %v6315_v6, %v7555_v6   ;;  %v4962_v31 = vphi %v6313_v31, %v7554_v31   ;;  %v4958_v15 = vphi %v6311_v15, %v7553_v15   ;;  %v4954_v5 = vphi %v6309_v5, %v7552_v5   ;;  %v4950_v24 = vphi %v6307_v24, %v7551_v24   ;;  %v4946_v7 = vphi %v6305_v7, %v7550_v7   ;;  %v4942_v62 = vphi %v6303_v62, %v7549_v62   ;;  %v4938_v57 = vphi %v6301_v57, %v7548_v57   ;;  %v4934_v59 = vphi %v6299_v59, %v7547_v59   ;;  %v4930_v37 = vphi %v6297_v37, %v7546_v37   ;;  %v4926_v56 = vphi %v6295_v56, %v7545_v56   ;;  %v4922_v46 = vphi %v6293_v46, %v7544_v46   ;;  %v4918_v49 = vphi %v6291_v49, %v7543_v49   ;;  %v4914_v40 = vphi %v6289_v40, %v7542_v40   ;;  %v4910_v43 = vphi %v6287_v43, %v7541_v43   ;;  %v4906_v23 = vphi %v6285_v23, %v7540_v23   ;;  %v4902_v63 = vphi %v6283_v63, %v7539_v63   ;;  %v4898_v11 = vphi %v6281_v11, %v7538_v11   ;;  %v4894_v28 = vphi %v6279_v28, %v7537_v28   ;;  %v4890_v25 = vphi %v6277_v25, %v7536_v25   ;;  %v4886_v9 = vphi %v6275_v9, %v7535_v9   ;;  %v4882_v22 = vphi %v6273_v22, %v7534_v22   ;;  %v4878_v18 = vphi %v6271_v18, %v7533_v18   ;;  %v4874_v50 = vphi %v6269_v50, %v7532_v50   ;;  %v4870_v48 = vphi %v6267_v48, %v7531_v48   ;;  %v4866_v19 = vphi %v6265_v19, %v7530_v19   ;;  %v4862_v16 = vphi %v6263_v16, %v7529_v16   ;;  %v4858_v21 = vphi %v6261_v21, %v7528_v21   ;;  %v4854_v13 = vphi %v6259_v13, %v7527_v13   ;;  %v4850_v17 = vphi %v6257_v17, %v7526_v17   ;;  %v4846_v12 = vphi %v6255_v12, %v7525_v12   ;;  %v4842_v41 = vphi %v6253_v41, %v7524_v41   ;;  %v4838_v38 = vphi %v6251_v38, %v7523_v38   ;;  %v4830_v54 = vphi %v6247_v54, %v7521_v54   ;;  %v4826_v4 = vphi %v6245_v4, %v7520_v4   ;;  %v4818_v36 = vphi %v6241_v36, %v7518_v36   ;;  %v4814_v61 = vphi %v6239_v61, %v7517_v61   ;;  %v4802_v2 = vphi %v6233_v2, %v7514_v2   ;;  %v4798_v0 = vphi %v6231_v0, %v7513_v0   ;;  %v4794_v32 = vphi %v6229_v32, %v7512_v32   ;;  %v4790_v29 = vphi %v6227_v29, %v7511_v29   ;;  %v4782_v60 = vphi %v6223_v60, %v7507_v60  }
 0x4bf   : >> { %7375 = vst [vmem:[#allocation48_spill] sm:$0xff] %v7374_v27  ;;  %7377 = vst [vmem:[#allocation55_spill] sm:$0xff] %v4794_v32  ;;  %v7386_v39 = vld [vmem:[#allocation51_spill] sm:$0xff]  ;;  %v7390_v8 = vld [vmem:[#allocation52_spill] sm:$0xff]  ;;  %s6479_s12 = scalar_lea.vmem [#allocation3], %s3176_s20  ;;  %s6561_s14 = scalar_lea.vmem [#allocation4], %s3176_s20 }
 0x4c0   : >> { %7378 = vst [vmem:[#allocation56_spill] sm:$0xff] %v4798_v0  ;;  %7379 = vst [vmem:[#allocation57_spill] sm:$0xff] %v4802_v2  ;;  %v7380_v52 = vld [vmem:[#allocation49_spill] sm:$0xff]  ;;  %v7393_v55 = vld [vmem:[#allocation34_spill] sm:$0xff]  ;;  %p6918_p7 = scmp.ge.s32.totalorder %s1823_s13, 2   ;;  %s7557_s16 = smov %s1823_s13 }
 0x4c1   : >> { %7381 = vst [vmem:[#allocation49_spill] sm:$0xff] %v7380_v52  ;;  %7383 = vst [vmem:[#allocation50_spill] sm:$0xff] %v7382_v33  ;;  %3585 = vmatprep.mubr.msk.f32.mxu0 %vm1608_vm12, %v7393_v55  ;;  %v1874_v60 = vld [vmem:[%s6479_s12] sm:$0xff]  ;;  %v1875_v55 = vld [vmem:[%s6479_s12 + $0x8] sm:$0xff]  ;;  %s7558_s29 = sld [smem:[#allocation96_spill]] (%p6918_p7)  ;;  %s7576_s24 = sld [smem:[#allocation97_spill]] (%p6918_p7) }
 0x4c2   : >> { %7384 = vst [vmem:[#allocation58_spill] sm:$0xff] %v4814_v61  ;;  %7385 = vst [vmem:[#allocation59_spill] sm:$0xff] %v4818_v36  ;;  %v1876_v32 = vld [vmem:[%s6479_s12 + $0x10] sm:$0xff]  ;;  %v3721_v29 = vpack.c.bf16 %v1875_v55, %v1874_v60  ;;  %v1877_v2 = vld [vmem:[%s6479_s12 + $0x18] sm:$0xff]  ;;  %s7580_s15 = sld [smem:[#allocation11_spill]] (%p6918_p7)  ;;  %s3227_s4 = sshll.u32 (%p6918_p7), %s4762_s23, 4 }
 0x4c3   : >> { %7387 = vst [vmem:[#allocation51_spill] sm:$0xff] %v7386_v39  ;;  %7388 = vst [vmem:[#allocation60_spill] sm:$0xff] %v4826_v4  ;;  %v3727_v0 = vpack.c.bf16 %v1877_v2, %v1876_v32  ;;  %v1878_v33 = vld [vmem:[%s6479_s12 + $0x20] sm:$0xff]  ;;  %v1879_v52 = vld [vmem:[%s6479_s12 + $0x28] sm:$0xff]  ;;  %s7593_s13 = sld [smem:[#allocation98_spill]] (%p6918_p7)  ;;  %p7596_p4 = scmp.ne.s32.totalorder (%p6918_p7), %s7326_s30, 0 }
 0x4c4   : >> { %7389 = vst [vmem:[#allocation61_spill] sm:$0xff] %v4830_v54  ;;  %7391 = vst [vmem:[#allocation52_spill] sm:$0xff] %v7390_v8  ;;  %v3733_v36 = vpack.c.bf16 %v1879_v52, %v1878_v33  ;;  %v1880_v55 = vld [vmem:[%s6479_s12 + $0x30] sm:$0xff]  ;;  %v1881_v60 = vld [vmem:[%s6479_s12 + $0x38] sm:$0xff] }
 0x4c5   : >> { %7392 = vst [vmem:[#allocation62_spill] sm:$0xff] %v4958_v15  ;;  %vm6473_vm13 = vmpackc.low %vm1608_vm12, %vm1608_vm12  ;;  %v3739_v32 = vpack.c.bf16 %v1881_v60, %v1880_v55  ;;  %v1883_v2 = vld [vmem:[%s6479_s12 + $0x48] sm:$0xff]  ;;  %v1885_v33 = vld [vmem:[%s6479_s12 + $0x58] sm:$0xff] }
 0x4c6   : >> { %3723 = vmatprep.subr.msk.bf16.mxu0 %vm6473_vm13, %v3721_v29  ;;  %v1887_v60 = vld [vmem:[%s6479_s12 + $0x68] sm:$0xff]  ;;  %v7396_v20 = vld [vmem:[#allocation32_spill] sm:$0xff]  ;;  %v7397_v45 = vld [vmem:[#allocation38_spill] sm:$0xff] }
 0x4c7   : >> { %3726 = vmatpush3.bf16.xpose.msk.msra.mxu0 %vm6473_vm13, %v3721_v29  ;;  %v1882_v29 = vld [vmem:[%s6479_s12 + $0x40] sm:$0xff]  ;;  %v7399_v26 = vld [vmem:[#allocation42_spill] sm:$0xff]  ;;  %v7403_v58 = vld [vmem:[#allocation35_spill] sm:$0xff] }
 0x4c8   : >> { %3729 = vmatprep.subr.msk.bf16.mxu0 %vm6473_vm13, %v3727_v0  ;;  %v3745_v52 = vpack.c.bf16 %v1883_v2, %v1882_v29  ;;  %v1889_v29 = vld [vmem:[%s6479_s12 + $0x78] sm:$0xff]  ;;  %v7398_v42 = vld [vmem:[#allocation36_spill] sm:$0xff]  ;;  %v7401_v14 = vld [vmem:[#allocation46_spill] sm:$0xff]  ;;  %s3228_s11 = sshll.u32 (%p6918_p7), %s7580_s15, 5 }
 0x4c9   : >> { %v7400_v51 = vld [vmem:[#allocation40_spill] sm:$0xff]  ;;  %v7404_v10 = vld [vmem:[#allocation33_spill] sm:$0xff]  ;;  %v7405_v47 = vld [vmem:[#allocation39_spill] sm:$0xff]  ;;  %s2830_s23 = sadd.s32 (%p6918_p7), %s3228_s11, %s3227_s4  ;;  %s4980_s11 = smov (%p6918_p7), [#allocation8]  }
 0x4ca   : >> { %v7402_v1 = vld [vmem:[#allocation44_spill] sm:$0xff]  ;;  %v7406_v44 = vld [vmem:[#allocation37_spill] sm:$0xff]  ;;  %v7407_v30 = vld [vmem:[#allocation43_spill] sm:$0xff]  ;;  %s3229_s20 = sshll.u32 (%p6918_p7), %s2830_s23, 7  ;;  %s4464_s23 = sshll.u32 (%p6918_p7), %s4980_s11, 4  ;;  %s4465_s23 = int_to_ptr.vmem [resolvable:$false] %s4464_s23 }
 0x4cb   : >> { %v7408_v53 = vld [vmem:[#allocation41_spill] sm:$0xff]  ;;  %v7409_v35 = vld [vmem:[#allocation47_spill] sm:$0xff]  ;;  %v1891_v27 = vld [vmem:[%s6561_s14] sm:$0xff]  ;;  %s7180_s28 = scalar_lea.hbm (%p6918_p7), %s7593_s13, %s3229_s20  ;;  %s4466_s20 = scalar_lea.vmem (%p6918_p7), %s4465_s23, 4096 }
 0x4cc   : >> { %v7410_v3 = vld [vmem:[#allocation45_spill] sm:$0xff] }
 0x4cf   : >> { %3732 = vmatpush3.bf16.xpose.msk.msra.mxu0 %vm6473_vm13, %v3727_v0  ;;  %v1884_v0 = vld [vmem:[%s6479_s12 + $0x50] sm:$0xff] }
 0x4d0   : >> { %3735 = vmatprep.subr.msk.bf16.mxu0 %vm6473_vm13, %v3733_v36  ;;  %v3751_v55 = vpack.c.bf16 %v1885_v33, %v1884_v0  ;;  %v1894_v33 = vld [vmem:[%s6561_s14 + $0x18] sm:$0xff] }
 0x4d7   : >> { %3738 = vmatpush3.bf16.xpose.msk.msra.mxu0 %vm6473_vm13, %v3733_v36  ;;  %v1886_v36 = vld [vmem:[%s6479_s12 + $0x60] sm:$0xff] }
 0x4d8   : >> { %3741 = vmatprep.subr.msk.bf16.mxu0 %vm6473_vm13, %v3739_v32  ;;  %v3757_v61 = vpack.c.bf16 %v1887_v60, %v1886_v36  ;;  %v1895_v36 = vld [vmem:[%s6561_s14 + $0x20] sm:$0xff]  ;;  %v1896_v60 = vld [vmem:[%s6561_s14 + $0x28] sm:$0xff] }
 0x4df   : >> { %3744 = vmatpush3.bf16.xpose.msk.msra.mxu0 %vm6473_vm13, %v3739_v32  ;;  %v1888_v32 = vld [vmem:[%s6479_s12 + $0x70] sm:$0xff]  ;;  %s2833_s12 = sshll.u32 (%p6918_p7), %s5199_s26, 4  ;;  %s7182_s12 = int_to_ptr.vmem [resolvable:$true] %s2833_s12 }
 0x4e0   : >> { %3747 = vmatprep.subr.msk.bf16.mxu0 %vm6473_vm13, %v3745_v52  ;;  %v3763_v2 = vpack.c.bf16 %v1889_v29, %v1888_v32  ;;  %v3777_v32 = vpack.c.bf16 %v1896_v60, %v1895_v36  ;;  %v1898_v36 = vld [vmem:[%s6561_s14 + $0x38] sm:$0xff]  ;;  %s4460_s4 = scalar_lea.vmem (%p6918_p7), %s7182_s12, 2048  ;;  %p4467_p6 = scmp.lt.s32.totalorder (%p6918_p7), %s7182_s12, %s4465_s23 }
 0x4e1   : > { %p4461_p2 = scmp.ne.s32.totalorder (%p6918_p7), %s7182_s12, %s4460_s4  ;;  %p4468_p9 = scmp.lt.s32.totalorder (%p6918_p7), %s4466_s20, %s4460_s4 }
 0x4e3   : > { %p4462_p0 = pnand (%p6918_p7), %p4461_p2, %p7596_p4  ;;  %p4469_p3 = por (%p6918_p7), %p4468_p9, %p4467_p6 }
 0x4e5   : > { %p4463_p1 = pneg (%p6918_p7), %p4462_p0 }
 0x4e7   : >> { %3750 = vmatpush3.bf16.xpose.msk.msra.mxu0 %vm6473_vm13, %v3745_v52  ;;  %v1893_v52 = vld [vmem:[%s6561_s14 + $0x10] sm:$0xff]  ;;  %p4470_p11 = pnand (%p6918_p7), %p4469_p3, %p4463_p1 }
 0x4e8   : >> { %3753 = vmatprep.subr.msk.bf16.mxu0 %vm6473_vm13, %v3751_v55 }
 0x4ef   : >> { %3756 = vmatpush3.bf16.xpose.msk.msra.mxu0 %vm6473_vm13, %v3751_v55  ;;  %v3773_v55 = vpack.c.bf16 %v1894_v33, %v1893_v52 }
 0x4f0   : >> { %3759 = vmatprep.subr.msk.bf16.mxu0 %vm6473_vm13, %v3757_v61 }
 0x4f7   : >> { %3762 = vmatpush3.bf16.xpose.msk.msra.mxu0 %vm6473_vm13, %v3757_v61  ;;  %v1892_v61 = vld [vmem:[%s6561_s14 + $0x8] sm:$0xff] }
 0x4f8   : >> { %3765 = vmatprep.subr.msk.bf16.mxu0 %vm6473_vm13, %v3763_v2  ;;  %v3769_v0 = vpack.c.bf16 %v1892_v61, %v1891_v27 }
 0x4fa   : >> { %3770 = vmatprep.subr.bf16.mxu1 %v3769_v0 }
 0x4fb   : >> { %3772 = vmatpush3.bf16.msra.mxu1 %v3769_v0 }
 0x4fc   : >> { %3774 = vmatprep.subr.bf16.mxu1 %v3773_v55 }
 0x4ff   : >> { %3768 = vmatpush3.bf16.xpose.msk.msra.mxu0 %vm6473_vm13, %v3763_v2  ;;  %3776 = vmatpush3.bf16.msra.mxu1 %v3773_v55  ;;  %v1897_v55 = vld [vmem:[%s6561_s14 + $0x30] sm:$0xff] }
 0x500   : >> { %3778 = vmatprep.subr.bf16.mxu1 %v3777_v32 }
 0x503   : >> { %3780 = vmatpush3.bf16.msra.mxu1 %v3777_v32  ;;  %v3781_v32 = vpack.c.bf16 %v1898_v36, %v1897_v55 }
 0x505   : >> { %3782 = vmatprep.subr.bf16.mxu1 %v3781_v32 }
 0x506   : >> { %3586 = vmatmul.mubr.msk.f32.vlgmr.msra.gmra.mrb[0].mxu0 %vm1608_vm12, %v7396_v20  ;;  %v1899_v20 = vld [vmem:[%s6561_s14 + $0x40] sm:$0xff] }
 0x507   : >> { %3588 = vmatprep.mubr.msk.f32.mxu0 %vm1608_vm12, %v7397_v45  ;;  %3784 = vmatpush3.bf16.msra.mxu1 %v3781_v32  ;;  %v1902_v32 = vld [vmem:[%s6561_s14 + $0x58] sm:$0xff] }
 0x50a   : >> { %3589 = vmatmul.mubr.msk.f32.gmra.mrb[2].mxu0 %vm1608_vm12, %v7398_v42 }
 0x50b   : >> { %3591 = vmatprep.mubr.msk.f32.mxu0 %vm1608_vm12, %v7399_v26  ;;  %v1900_v26 = vld [vmem:[%s6561_s14 + $0x48] sm:$0xff] }
 0x50c   : >> { %v3785_v55 = vpack.c.bf16 %v1900_v26, %v1899_v20  ;;  %v1903_v20 = vld [vmem:[%s6561_s14 + $0x60] sm:$0xff]  ;;  %v1904_v26 = vld [vmem:[%s6561_s14 + $0x68] sm:$0xff] }
 0x50e   : >> { %3592 = vmatmul.mubr.msk.f32.gmra.mrb[4].mxu0 %vm1608_vm12, %v7400_v51  ;;  %3786 = vmatprep.subr.bf16.mxu1 %v3785_v55  ;;  %v1906_v51 = vld [vmem:[%s6561_s14 + $0x78] sm:$0xff] }
 0x50f   : >> { %3594 = vmatprep.mubr.msk.f32.mxu0 %vm1608_vm12, %v7401_v14  ;;  %3788 = vmatpush3.bf16.msra.mxu1 %v3785_v55  ;;  %v3793_v55 = vpack.c.bf16 %v1904_v26, %v1903_v20 }
 0x512   : >> { %3595 = vmatmul.mubr.msk.f32.gmra.mrb[6].mxu0 %vm1608_vm12, %v7402_v1 }
 0x513   : >> { %3597 = vmatprep.mubr.msk.f32.mxu0 %vm1608_vm12, %v7403_v58 }
 0x516   : >> { %3598 = vmatmul.mubr.msk.f32.gmra.mrb[8].mxu0 %vm1608_vm12, %v7404_v10 }
 0x517   : >> { %3600 = vmatprep.mubr.msk.f32.mxu0 %vm1608_vm12, %v7405_v47  ;;  %v1905_v47 = vld [vmem:[%s6561_s14 + $0x70] sm:$0xff] }
 0x51a   : >> { %3601 = vmatmul.mubr.msk.f32.gmra.mrb[10].mxu0 %vm1608_vm12, %v7406_v44 }
 0x51b   : >> { %3603 = vmatprep.mubr.msk.f32.mxu0 %vm1608_vm12, %v7407_v30 }
 0x51e   : >> { %3604 = vmatmul.mubr.msk.f32.gmra.mrb[12].mxu0 %vm1608_vm12, %v7408_v53 }
 0x51f   : >> { %3606 = vmatprep.mubr.msk.f32.mxu0 %vm1608_vm12, %v7409_v35  ;;  %v1901_v35 = vld [vmem:[%s6561_s14 + $0x50] sm:$0xff] }
 0x520   : >> { %v3789_v42 = vpack.c.bf16 %v1902_v32, %v1901_v35  ;;  %v3797_v35 = vpack.c.bf16 %v1906_v51, %v1905_v47 }
 0x522   : >> { %3607 = vmatmul.mubr.msk.f32.gmra.mrb[14].mxu0 %vm1608_vm12, %v7410_v3  ;;  %3790 = vmatprep.subr.bf16.mxu1 %v3789_v42 }
 0x523   : >> { %3792 = vmatpush3.bf16.msra.mxu1 %v3789_v42 }
 0x524   : >> { %3794 = vmatprep.subr.bf16.mxu1 %v3793_v55 }
 0x527   : >> { %3796 = vmatpush3.bf16.msra.mxu1 %v3793_v55 }
 0x528   : >> { %3798 = vmatprep.subr.bf16.mxu1 %v3797_v35 }
 0x52b   : >> { %3800 = vmatpush3.bf16.msra.mxu1 %v3797_v35 }
 0x5d9   : >> { %v6569_v29 = vpop.f32.mrb[0].mxu0 }
 0x5da   : >> { %v2069_v2 = vpop.f32.mrb[1].mxu0 }
 0x5db   : >> { %2148 = vmax.xlane.f32.xlu0 %v2069_v2 }
 0x5dd   : >> { %v6571_v1 = vpop.f32.mrb[2].mxu0 }
 0x5de   : >> { %v6573_v27 = vpop.f32.mrb[3].mxu0 }
 0x5df   : >> { %2150 = vmax.xlane.f32.xlu0 %v6569_v29  ;;  %2152 = vmax.xlane.f32.xlu1 %v6573_v27 }
 0x5e1   : >> { %v6577_v61 = vpop.f32.mrb[4].mxu0 }
 0x5e2   : >> { %v6579_v52 = vpop.f32.mrb[5].mxu0 }
 0x5e3   : >> { %2154 = vmax.xlane.f32.xlu1 %v6571_v1  ;;  %2156 = vmax.xlane.f32.xlu0 %v6579_v52 }
 0x5e5   : >> { %v6583_v0 = vpop.f32.mrb[6].mxu0 }
 0x5e6   : >> { %v6585_v33 = vpop.f32.mrb[7].mxu0 }
 0x5e7   : >> { %2158 = vmax.xlane.f32.xlu1 %v6577_v61  ;;  %2160 = vmax.xlane.f32.xlu0 %v6585_v33 }
 0x5e9   : >> { %v6591_v60 = vpop.f32.mrb[8].mxu0 }
 0x5ea   : >> { %v6593_v3 = vpop.f32.mrb[9].mxu0 }
 0x5eb   : >> { %2162 = vmax.xlane.f32.xlu1 %v6583_v0  ;;  %2164 = vmax.xlane.f32.xlu0 %v6593_v3 }
 0x5ed   : >> { %v6597_v10 = vpop.f32.mrb[10].mxu0 }
 0x5ee   : >> { %v6599_v14 = vpop.f32.mrb[11].mxu0 }
 0x5ef   : >> { %2166 = vmax.xlane.f32.xlu1 %v6591_v60  ;;  %2168 = vmax.xlane.f32.xlu0 %v6599_v14 }
 0x5f1   : >> { %v6605_v36 = vpop.f32.mrb[12].mxu0 }
 0x5f2   : >> { %v6607_v30 = vpop.f32.mrb[13].mxu0 }
 0x5f3   : >> { %2170 = vmax.xlane.f32.xlu1 %v6597_v10  ;;  %2172 = vmax.xlane.f32.xlu0 %v6607_v30 }
 0x5f5   : >> { %v6613_v44 = vpop.f32.mrb[14].mxu0 }
 0x5f6   : >> { %v6615_v45 = vpop.f32.mrb[15].mxu0 }
 0x5f7   : >> { %2174 = vmax.xlane.f32.xlu1 %v6605_v36  ;;  %2176 = vmax.xlane.f32.xlu0 %v6615_v45 }
 0x5fb   : >> { %2178 = vmax.xlane.f32.xlu1 %v6613_v44 }
 0x668   : >> { %v2149_v32 = vpop.xlane.xlu0 %2148 }
 0x669   : >> { %v6625_v53 = vmax.f32 %v4970_v34, %v2149_v32  }
 0x66b   : >> { %7411 = vst [vmem:[#allocation63_spill] sm:$0xff] %v6625_v53  ;;  %v2244_v58 = vsub.f32 %v2069_v2, %v6625_v53 }
 0x66c   : >> { %v2151_v4 = vpop.xlane.xlu0 %2150  ;;  %v2153_v20 = vpop.xlane.xlu1 %2152 }
 0x66d   : >> { %v2260_v26 = vmul.f32 1.442695, %v2244_v58  ;;  %v6631_v55 = vmax.f32 %v4966_v6, %v2151_v4   ;;  %v6634_v39 = vmax.f32 %v4962_v31, %v2153_v20  }
 0x66f   : >> { %7412 = vst [vmem:[#allocation64_spill] sm:$0xff] %v6631_v55  ;;  %7413 = vst [vmem:[#allocation65_spill] sm:$0xff] %v6634_v39  ;;  %v7414_v47 = vmov %v6634_v39  ;;  %v2245_v35 = vsub.f32 %v6569_v29, %v6631_v55  ;;  %4334 = vpow2.f32 %v2260_v26 }
 0x670   : >> { %v2246_v2 = vsub.f32 %v6573_v27, %v7414_v47  ;;  %v2155_v58 = vpop.xlane.xlu1 %2154  ;;  %v2157_v42 = vpop.xlane.xlu0 %2156 }
 0x671   : >> { %v2262_v4 = vmul.f32 1.442695, %v2245_v35  ;;  %v6645_v8 = vmax.f32 %v4958_v15, %v2155_v58   ;;  %v6648_v54 = vmax.f32 %v4954_v5, %v2157_v42  }
 0x672   : >> { %v2264_v39 = vmul.f32 1.442695, %v2246_v2 }
 0x673   : >> { %7415 = vst [vmem:[#allocation66_spill] sm:$0xff] %v6645_v8  ;;  %v7416_v20 = vmov %v6645_v8  ;;  %7417 = vst [vmem:[#allocation67_spill] sm:$0xff] %v6648_v54  ;;  %v7418_v51 = vmov %v6648_v54  ;;  %4336 = vpow2.f32 %v2262_v4 }
 0x674   : >> { %v2247_v32 = vsub.f32 %v6571_v1, %v7416_v20  ;;  %v2248_v26 = vsub.f32 %v6579_v52, %v7418_v51  ;;  %v2159_v35 = vpop.xlane.xlu1 %2158  ;;  %v2161_v58 = vpop.xlane.xlu0 %2160  ;;  %4338 = vpow2.f32 %v2264_v39 }
 0x675   : >> { %v6659_v2 = vmax.f32 %v4950_v24, %v2159_v35   ;;  %v6662_v29 = vmax.f32 %v4946_v7, %v2161_v58  }
 0x676   : >> { %v2266_v8 = vmul.f32 1.442695, %v2247_v32  ;;  %v2268_v54 = vmul.f32 1.442695, %v2248_v26 }
 0x677   : >> { %7419 = vst [vmem:[#allocation68_spill] sm:$0xff] %v6659_v2  ;;  %v7420_v42 = vmov %v6659_v2  ;;  %v7421_v15 = vmov %v6662_v29 }
 0x678   : >> { %v2249_v4 = vsub.f32 %v6577_v61, %v7420_v42  ;;  %4340 = vpow2.f32 %v2266_v8  ;;  %v2250_v32 = vsub.f32 %v6585_v33, %v7421_v15  ;;  %v2163_v35 = vpop.xlane.xlu1 %2162  ;;  %v2165_v2 = vpop.xlane.xlu0 %2164 }
 0x679   : >> { %v6673_v26 = vmax.f32 %v4942_v62, %v2163_v35   ;;  %v4335_v29 = vpop.eup %4334  ;;  %4342 = vpow2.f32 %v2268_v54  ;;  %v6676_v1 = vmax.f32 %v4938_v57, %v2165_v2  }
 0x67a   : >> { %v2270_v39 = vmul.f32 1.442695, %v2249_v4  ;;  %v2272_v58 = vmul.f32 1.442695, %v2250_v32  ;;  %2308 = vadd.xlane.f32.xlu0 %v4335_v29  ;;  %3641 = vmatprep.mubr.f32.mxu1 %v4335_v29 }
 0x67b   : >> { %7422 = vst [vmem:[#allocation69_spill] sm:$0xff] %v6673_v26  ;;  %7423 = vst [vmem:[#allocation70_spill] sm:$0xff] %v6676_v1  ;;  %v2251_v8 = vsub.f32 %v6583_v0, %v6673_v26  ;;  %v2252_v4 = vsub.f32 %v6593_v3, %v6676_v1 }
 0x67c   : >> { %4344 = vpow2.f32 %v2270_v39  ;;  %v2167_v54 = vpop.xlane.xlu1 %2166  ;;  %v2169_v32 = vpop.xlane.xlu0 %2168 }
 0x67d   : >> { %v2274_v35 = vmul.f32 1.442695, %v2251_v8  ;;  %v6687_v2 = vmax.f32 %v4934_v59, %v2167_v54   ;;  %v4337_v27 = vpop.eup %4336  ;;  %4346 = vpow2.f32 %v2272_v58  ;;  %v2276_v61 = vmul.f32 1.442695, %v2252_v4 }
 0x67e   : >> { %v6690_v0 = vmax.f32 %v4930_v37, %v2169_v32   ;;  %2310 = vadd.xlane.f32.xlu1 %v4337_v27  ;;  %3642 = vmatmul.mubr.f32.vlgmr.msra.gmra.mrb[0].mxu1 %v4337_v27  ;;  %v4339_v3 = vpop.eup %4338 }
 0x67f   : >> { %7424 = vst [vmem:[#allocation71_spill] sm:$0xff] %v6687_v2  ;;  %v7425_v52 = vmov %v6687_v2  ;;  %4348 = vpow2.f32 %v2274_v35  ;;  %2312 = vadd.xlane.f32.xlu0 %v4339_v3  ;;  %3644 = vmatprep.mubr.f32.mxu1 %v4339_v3 }
 0x680   : >> { %7426 = vst [vmem:[#allocation72_spill] sm:$0xff] %v6690_v0  ;;  %v7427_v26 = vmov %v6690_v0  ;;  %v2253_v29 = vsub.f32 %v6591_v60, %v7425_v52  ;;  %v2171_v4 = vpop.xlane.xlu1 %2170  ;;  %v2173_v54 = vpop.xlane.xlu0 %2172  ;;  %4350 = vpow2.f32 %v2276_v61 }
 0x681   : >> { %v2254_v58 = vsub.f32 %v6599_v14, %v7427_v26  ;;  %v6701_v2 = vmax.f32 %v4926_v56, %v2171_v4   ;;  %v6704_v27 = vmax.f32 %v4922_v46, %v2173_v54  }
 0x682   : >> { %v2278_v32 = vmul.f32 1.442695, %v2253_v29  ;;  %v4341_v0 = vpop.eup %4340 }
 0x683   : >> { %7428 = vst [vmem:[#allocation73_spill] sm:$0xff] %v6701_v2  ;;  %v7429_v39 = vmov %v6701_v2  ;;  %v2280_v60 = vmul.f32 1.442695, %v2254_v58  ;;  %7430 = vst [vmem:[#allocation74_spill] sm:$0xff] %v6704_v27  ;;  %v7431_v35 = vmov %v6704_v27  ;;  %2314 = vadd.xlane.f32.xlu1 %v4341_v0  ;;  %3645 = vmatmul.mubr.f32.gmra.mrb[2].mxu1 %v4341_v0  ;;  %v4343_v29 = vpop.eup %4342 }
 0x684   : >> { %v2255_v14 = vsub.f32 %v6597_v10, %v7429_v39  ;;  %4352 = vpow2.f32 %v2278_v32  ;;  %v2256_v61 = vsub.f32 %v6607_v30, %v7431_v35  ;;  %v2175_v58 = vpop.xlane.xlu1 %2174  ;;  %v2177_v4 = vpop.xlane.xlu0 %2176  ;;  %2316 = vadd.xlane.f32.xlu0 %v4343_v29  ;;  %3647 = vmatprep.mubr.f32.mxu1 %v4343_v29 }
 0x685   : >> { %v6715_v2 = vmax.f32 %v4918_v49, %v2175_v58   ;;  %4354 = vpow2.f32 %v2280_v60  ;;  %v6718_v0 = vmax.f32 %v4914_v40, %v2177_v4  }
 0x686   : >> { %v2282_v54 = vmul.f32 1.442695, %v2255_v14  ;;  %v4345_v27 = vpop.eup %4344  ;;  %v2284_v10 = vmul.f32 1.442695, %v2256_v61 }
 0x687   : >> { %7432 = vst [vmem:[#allocation75_spill] sm:$0xff] %v6715_v2  ;;  %v7433_v8 = vmov %v6715_v2  ;;  %7434 = vst [vmem:[#allocation76_spill] sm:$0xff] %v6718_v0  ;;  %v7435_v33 = vmov %v6718_v0  ;;  %2318 = vadd.xlane.f32.xlu1 %v4345_v27  ;;  %3648 = vmatmul.mubr.f32.gmra.mrb[4].mxu1 %v4345_v27  ;;  %v4347_v14 = vpop.eup %4346 }
 0x688   : >> { %v2209_v32 = vsub.f32 %v4918_v49, %v7433_v8  ;;  %v2257_v30 = vsub.f32 %v6605_v36, %v7433_v8  ;;  %4356 = vpow2.f32 %v2282_v54  ;;  %v2210_v29 = vsub.f32 %v4914_v40, %v7435_v33  ;;  %v2179_v61 = vpop.xlane.xlu1 %2178  ;;  %2320 = vadd.xlane.f32.xlu0 %v4347_v14  ;;  %3650 = vmatprep.mubr.f32.mxu1 %v4347_v14 }
 0x689   : >> { %v2258_v60 = vsub.f32 %v6615_v45, %v7435_v33  ;;  %v6729_v4 = vmax.f32 %v4910_v43, %v2179_v61   ;;  %v4349_v2 = vpop.eup %4348  ;;  %4358 = vpow2.f32 %v2284_v10 }
 0x68a   : >> { %v2286_v58 = vmul.f32 1.442695, %v2257_v30  ;;  %v4351_v0 = vpop.eup %4350 }
 0x68b   : >> { %7436 = vst [vmem:[#allocation77_spill] sm:$0xff] %v6729_v4  ;;  %v7437_v3 = vmov %v6729_v4  ;;  %v2288_v36 = vmul.f32 1.442695, %v2258_v60  ;;  %2322 = vadd.xlane.f32.xlu1 %v4349_v2  ;;  %3651 = vmatmul.mubr.f32.gmra.mrb[6].mxu1 %v4349_v2  ;;  %v7438_v4 = vsub.f32 %v4970_v34, %v6625_v53 }
 0x68c   : >> { %v2259_v54 = vsub.f32 %v6613_v44, %v7437_v3  ;;  %4360 = vpow2.f32 %v2286_v58  ;;  %2324 = vadd.xlane.f32.xlu0 %v4351_v0  ;;  %3653 = vmatprep.mubr.f32.mxu1 %v4351_v0  ;;  %v7440_v0 = vsub.f32 %v4962_v31, %v7414_v47  ;;  %v7445_v31 = vsub.f32 %v4946_v7, %v7421_v15 }
 0x68d   : >> { %4362 = vpow2.f32 %v2288_v36  ;;  %v2212_v2 = vmul.f32 1.442695, %v7438_v4  ;;  %v7439_v36 = vsub.f32 %v4966_v6, %v6631_v55  ;;  %v7446_v4 = vld [vmem:[#allocation69_spill] sm:$0xff] }
 0x68e   : >> { %v2290_v45 = vmul.f32 1.442695, %v2259_v54  ;;  %v4353_v30 = vpop.eup %4352 }
 0x68f   : >> { %2326 = vadd.xlane.f32.xlu1 %v4353_v30  ;;  %3654 = vmatmul.mubr.f32.gmra.mrb[8].mxu1 %v4353_v30  ;;  %v4355_v14 = vpop.eup %4354  ;;  %v2214_v54 = vmul.f32 1.442695, %v7439_v36  ;;  %v7441_v30 = vld [vmem:[#allocation62_spill] sm:$0xff] }
 0x690   : >> { %4364 = vpow2.f32 %v2290_v45  ;;  %2328 = vadd.xlane.f32.xlu0 %v4355_v14  ;;  %3656 = vmatprep.mubr.f32.mxu1 %v4355_v14  ;;  %v2216_v45 = vmul.f32 1.442695, %v7440_v0  ;;  %v7442_v14 = vsub.f32 %v7441_v30, %v7416_v20 }
 0x691   : >> { %4366 = vpow2.f32 %v2212_v2  ;;  %v7447_v2 = vsub.f32 %v4942_v62, %v7446_v4  ;;  %v7450_v62 = vsub.f32 %v4934_v59, %v7425_v52  ;;  %v7453_v59 = vsub.f32 %v4926_v56, %v7429_v39 }
 0x692   : >> { %v4357_v10 = vpop.eup %4356  ;;  %4368 = vpow2.f32 %v2214_v54 }
 0x693   : >> { %2330 = vadd.xlane.f32.xlu1 %v4357_v10  ;;  %3657 = vmatmul.mubr.f32.gmra.mrb[10].mxu1 %v4357_v10  ;;  %v4359_v60 = vpop.eup %4358  ;;  %v2218_v10 = vmul.f32 1.442695, %v7442_v14  ;;  %4370 = vpow2.f32 %v2216_v45  ;;  %v2226_v36 = vmul.f32 1.442695, %v7447_v2  ;;  %v2234_v4 = vmul.f32 1.442695, %v7453_v59 }
 0x694   : >> { %2332 = vadd.xlane.f32.xlu0 %v4359_v60  ;;  %3659 = vmatprep.mubr.f32.mxu1 %v4359_v60  ;;  %v7443_v60 = vsub.f32 %v4954_v5, %v7418_v51 }
 0x695   : >> { %4372 = vpow2.f32 %v2218_v10  ;;  %v2230_v10 = vmul.f32 1.442695, %v7450_v62 }
 0x696   : >> { %v4361_v44 = vpop.eup %4360  ;;  %v2220_v34 = vmul.f32 1.442695, %v7443_v60 }
 0x697   : >> { %2334 = vadd.xlane.f32.xlu1 %v4361_v44  ;;  %3660 = vmatmul.mubr.f32.gmra.mrb[12].mxu1 %v4361_v44  ;;  %v4363_v61 = vpop.eup %4362  ;;  %v7444_v44 = vsub.f32 %v4950_v24, %v7420_v42  ;;  %v7448_v24 = vsub.f32 %v4938_v57, %v6676_v1  ;;  %v7451_v57 = vsub.f32 %v4930_v37, %v7427_v26 }
 0x698   : >> { %2336 = vadd.xlane.f32.xlu0 %v4363_v61  ;;  %3662 = vmatprep.mubr.f32.mxu1 %v4363_v61  ;;  %4374 = vpow2.f32 %v2220_v34 }
 0x699   : >> { %v2222_v6 = vmul.f32 1.442695, %v7444_v44  ;;  %v2228_v0 = vmul.f32 1.442695, %v7448_v24  ;;  %v2232_v44 = vmul.f32 1.442695, %v7451_v57 }
 0x69a   : >> { %v4365_v58 = vpop.eup %4364 }
 0x69b   : >> { %2338 = vadd.xlane.f32.xlu1 %v4365_v58  ;;  %3663 = vmatmul.mubr.f32.gmra.mrb[14].mxu1 %v4365_v58  ;;  %v6753_v61 = vpop.eup %4366  ;;  %v2224_v58 = vmul.f32 1.442695, %v7445_v31  ;;  %4376 = vpow2.f32 %v2222_v6 }
 0x69c   : >> { %v2292_v5 = vmul.f32 %v4906_v23, %v6753_v61  ;;  %v6763_v54 = vpop.eup %4368 }
 0x69d   : >> { %4378 = vpow2.f32 %v2224_v58  ;;  %v6770_v7 = vpop.eup %4370  ;;  %v2293_v60 = vmul.f32 %v4902_v63, %v6763_v54 }
 0x69e   : >> { %4380 = vpow2.f32 %v2226_v36 }
 0x69f   : >> { %v6777_v34 = vpop.eup %4372  ;;  %4382 = vpow2.f32 %v2228_v0 }
 0x6a0   : >> { %4384 = vpow2.f32 %v2230_v10  ;;  %v2295_v37 = vmul.f32 %v4894_v28, %v6777_v34 }
 0x6a1   : >> { %4386 = vpow2.f32 %v2232_v44 }
 0x6a2   : >> { %v6786_v31 = vpop.eup %4374  ;;  %4388 = vpow2.f32 %v2234_v4 }
 0x6a3   : >> { %v2296_v56 = vmul.f32 %v4890_v25, %v6786_v31 }
 0x6a5   : >> { %v6795_v36 = vpop.eup %4376 }
 0x6a7   : >> { %v6804_v0 = vpop.eup %4378 }
 0x6a8   : >> { %v2298_v49 = vmul.f32 %v4882_v22, %v6804_v0 }
 0x707   : >> { %v2309_v45 = vpop.xlane.xlu0 %2308 }
 0x708   : >> { %v6768_v23 = vadd.f32 %v2309_v45, %v2292_v5  }
 0x70a   : >> { %7449 = vst [vmem:[#allocation78_spill] sm:$0xff] %v6768_v23  ;;  %v2294_v23 = vmul.f32 %v4898_v11, %v6770_v7 }
 0x70b   : >> { %v2311_v6 = vpop.xlane.xlu1 %2310 }
 0x70c   : >> { %v6782_v63 = vadd.f32 %v2311_v6, %v2293_v60   ;;  %v2313_v2 = vpop.xlane.xlu0 %2312  ;;  %v6813_v60 = vpop.eup %4380 }
 0x70d   : >> { %v6791_v11 = vadd.f32 %v2313_v2, %v2294_v23   ;;  %v2299_v40 = vmul.f32 %v4878_v18, %v6813_v60 }
 0x70e   : >> { %7452 = vst [vmem:[#allocation79_spill] sm:$0xff] %v6782_v63  ;;  %v7455_v63 = vsub.f32 %v4922_v46, %v7431_v35  ;;  %v2297_v46 = vmul.f32 %v4886_v9, %v6795_v36 }
 0x70f   : >> { %7454 = vst [vmem:[#allocation80_spill] sm:$0xff] %v6791_v11  ;;  %v2238_v11 = vmul.f32 1.442695, %v2209_v32  ;;  %v6822_v32 = vpop.eup %4382 }
 0x710   : >> { %v2236_v5 = vmul.f32 1.442695, %v7455_v63  ;;  %v2315_v24 = vpop.xlane.xlu1 %2314 }
 0x711   : >> { %v6800_v28 = vadd.f32 %v2315_v24, %v2295_v37   ;;  %v2317_v62 = vpop.xlane.xlu0 %2316 }
 0x712   : >> { %v6809_v25 = vadd.f32 %v2317_v62, %v2296_v56   ;;  %4390 = vpow2.f32 %v2236_v5 }
 0x713   : >> { %7456 = vst [vmem:[#allocation81_spill] sm:$0xff] %v6800_v28  ;;  %v2240_v28 = vmul.f32 1.442695, %v2210_v29  ;;  %4392 = vpow2.f32 %v2238_v11  ;;  %v4385_v29 = vpop.eup %4384 }
 0x714   : >> { %7457 = vst [vmem:[#allocation82_spill] sm:$0xff] %v6809_v25  ;;  %v2319_v57 = vpop.xlane.xlu1 %2318  ;;  %v7459_v25 = vsub.f32 %v4910_v43, %v7437_v3  ;;  %v4387_v4 = vpop.eup %4386  ;;  %v2301_v43 = vmul.f32 %v4870_v48, %v4385_v29 }
 0x715   : >> { %v6818_v9 = vadd.f32 %v2319_v57, %v2297_v46   ;;  %v2321_v23 = vpop.xlane.xlu0 %2320  ;;  %4394 = vpow2.f32 %v2240_v28  ;;  %v4389_v37 = vpop.eup %4388  ;;  %v2302_v63 = vmul.f32 %v4866_v19, %v4387_v4 }
 0x716   : >> { %v2242_v6 = vmul.f32 1.442695, %v7459_v25  ;;  %v6827_v22 = vadd.f32 %v2321_v23, %v2298_v49   ;;  %v2356_v23 = vmul.f32 %v4842_v41, %v6753_v61 }
 0x717   : >> { %7458 = vst [vmem:[#allocation83_spill] sm:$0xff] %v6818_v9  ;;  %v2300_v9 = vmul.f32 %v4874_v50, %v6822_v32 }
 0x718   : >> { %7460 = vst [vmem:[#allocation84_spill] sm:$0xff] %v6827_v22  ;;  %v2323_v59 = vpop.xlane.xlu1 %2322  ;;  %4396 = vpow2.f32 %v2242_v6  ;;  %v2357_v6 = vmul.f32 %v4838_v38, %v6763_v54 }
 0x719   : >> { %v6831_v18 = vadd.f32 %v2323_v59, %v2299_v40   ;;  %v2325_v2 = vpop.xlane.xlu0 %2324  ;;  %v7472_v40 = vld [vmem:[#allocation61_spill] sm:$0xff] }
 0x71a   : >> { %v6835_v50 = vadd.f32 %v2325_v2, %v2300_v9   ;;  %v7473_v9 = vld [vmem:[#allocation52_spill] sm:$0xff] }
 0x71b   : >> { %7461 = vst [vmem:[#allocation85_spill] sm:$0xff] %v6831_v18  ;;  %v2303_v18 = vmul.f32 %v4862_v16, %v4389_v37  ;;  %v2358_v2 = vmul.f32 %v7473_v9, %v6770_v7  ;;  %v7496_v9 = vld [vmem:[#allocation55_spill] sm:$0xff] }
 0x71c   : >> { %7462 = vst [vmem:[#allocation86_spill] sm:$0xff] %v6835_v50  ;;  %v2327_v22 = vpop.xlane.xlu1 %2326  ;;  %v4391_v5 = vpop.eup %4390 }
 0x71d   : >> { %v6838_v48 = vadd.f32 %v2327_v22, %v2301_v43   ;;  %v2329_v24 = vpop.xlane.xlu0 %2328  ;;  %v4393_v56 = vpop.eup %4392  ;;  %v2304_v50 = vmul.f32 %v4858_v21, %v4391_v5  ;;  %v7476_v22 = vld [vmem:[#allocation51_spill] sm:$0xff] }
 0x71e   : >> { %v6841_v19 = vadd.f32 %v2329_v24, %v2302_v63   ;;  %v2361_v61 = vmul.f32 %v7476_v22, %v6795_v36 }
 0x71f   : >> { %7463 = vst [vmem:[#allocation87_spill] sm:$0xff] %v6838_v48  ;;  %v4395_v62 = vpop.eup %4394  ;;  %v2305_v48 = vmul.f32 %v4854_v13, %v4393_v56 }
 0x720   : >> { %7464 = vst [vmem:[#allocation88_spill] sm:$0xff] %v6841_v19  ;;  %v2331_v11 = vpop.xlane.xlu1 %2330  ;;  %v2306_v19 = vmul.f32 %v4850_v17, %v4395_v62 }
 0x721   : >> { %v6844_v16 = vadd.f32 %v2331_v11, %v2303_v18   ;;  %v2333_v46 = vpop.xlane.xlu0 %2332  ;;  %v7481_v11 = vld [vmem:[#allocation58_spill] sm:$0xff] }
 0x722   : >> { %v6847_v21 = vadd.f32 %v2333_v46, %v2304_v50   ;;  %v4397_v28 = vpop.eup %4396  ;;  %v2363_v7 = vmul.f32 %v7481_v11, %v6813_v60  ;;  %v7491_v60 = vld [vmem:[#allocation56_spill] sm:$0xff]  ;;  %v7538_v11 = vld [vmem:[#allocation80_spill] sm:$0xff] }
 0x723   : >> { %v7465_v42 = vmov %v6844_v16  ;;  %v2307_v25 = vmul.f32 %v4846_v12, %v4397_v28 }
 0x724   : >> { %v7466_v30 = vmov %v6847_v21  ;;  %v2335_v57 = vpop.xlane.xlu1 %2334 }
 0x725   : >> { %v6850_v13 = vadd.f32 %v2335_v57, %v2305_v48   ;;  %v2337_v49 = vpop.xlane.xlu0 %2336  ;;  %v7487_v57 = vld [vmem:[#allocation49_spill] sm:$0xff] }
 0x726   : >> { %v6853_v17 = vadd.f32 %v2337_v49, %v2306_v19   ;;  %v2365_v19 = vmul.f32 %v7487_v57, %v4385_v29  ;;  %v7488_v49 = vld [vmem:[#allocation50_spill] sm:$0xff]  ;;  %v7548_v57 = vld [vmem:[#allocation70_spill] sm:$0xff] }
 0x727   : >> { %v7467_v1 = vmov %v6850_v13 }
 0x728   : >> { %v7468_v52 = vmov %v6853_v17  ;;  %v2339_v16 = vpop.xlane.xlu1 %2338  ;;  %v2359_v17 = vmul.f32 %v7472_v40, %v6777_v34 }
 0x729   : >> { %v6856_v12 = vadd.f32 %v2339_v16, %v2307_v25   ;;  %v2364_v25 = vmul.f32 %v7488_v49, %v6822_v32  ;;  %v2368_v32 = vmul.f32 %v7496_v9, %v4391_v5  ;;  %v7535_v9 = vld [vmem:[#allocation83_spill] sm:$0xff] }
 0x72a   : >> { %v7543_v49 = vld [vmem:[#allocation75_spill] sm:$0xff] }
 0x72b   : >> { %v7469_v26 = vmov %v6856_v12  ;;  %v7552_v5 = vld [vmem:[#allocation67_spill] sm:$0xff] }
 0x72c   : > { %v7561_v5 = vld [vmem:[#allocation79_spill] sm:$0xff] (%p6918_p7) }
 0x751   : >> { %v3643_v21 = vpop.f32.mrb[0].mxu1 }
 0x752   : >> { %v6862_v38 = vadd.f32 %v3643_v21, %v2357_v6   ;;  %v2438_v13 = vpop.f32.mrb[1].mxu1 }
 0x753   : >> { %v6864_v41 = vadd.f32 %v2438_v13, %v2356_v23   ;;  %v2367_v23 = vmul.f32 %v7491_v60, %v4389_v37 }
 0x754   : >> { %v7470_v39 = vmov %v6862_v38  ;;  %v7477_v38 = vld [vmem:[#allocation60_spill] sm:$0xff] }
 0x755   : >> { %v7471_v35 = vmov %v6864_v41  ;;  %v2360_v24 = vmul.f32 %v7477_v38, %v6786_v31 }
 0x756   : >> { %v3646_v59 = vpop.f32.mrb[2].mxu1 }
 0x757   : >> { %v6870_v54 = vadd.f32 %v3646_v59, %v2359_v17   ;;  %v2448_v12 = vpop.f32.mrb[3].mxu1 }
 0x758   : >> { %v6872_v43 = vadd.f32 %v2448_v12, %v2358_v2  }
 0x759   : >> { %v7474_v8 = vmov %v6870_v54  ;;  %v7482_v54 = vld [vmem:[#allocation59_spill] sm:$0xff] }
 0x75a   : >> { %v7475_v33 = vmov %v6872_v43  ;;  %v3649_v63 = vpop.f32.mrb[4].mxu1  ;;  %v2362_v46 = vmul.f32 %v7482_v54, %v6804_v0  ;;  %v7492_v0 = vld [vmem:[#allocation57_spill] sm:$0xff]  ;;  %v7521_v54 = vmov %v7474_v8 }
 0x75b   : >> { %v6878_v41 = vadd.f32 %v3649_v63, %v2361_v61   ;;  %v2458_v18 = vpop.f32.mrb[5].mxu1  ;;  %v2366_v40 = vmul.f32 %v7492_v0, %v4387_v4  ;;  %v7500_v43 = vld [vmem:[#allocation53_spill] sm:$0xff]  ;;  %7522 = vst [vmem:[#allocation52_spill] sm:$0xff] %v7475_v33 }
 0x75c   : >> { %v6880_v34 = vadd.f32 %v2458_v18, %v2360_v24   ;;  %v2371_v37 = vmul.f32 %v7500_v43, %v4397_v28  ;;  %v7533_v18 = vld [vmem:[#allocation85_spill] sm:$0xff]  ;;  %v7551_v24 = vld [vmem:[#allocation68_spill] sm:$0xff] }
 0x75d   : >> { %7478 = vst [vmem:[#allocation89_spill] sm:$0xff] %v6878_v41  ;;  %v7479_v3 = vmov %v6878_v41  ;;  %v7524_v41 = vmov %v7471_v35  ;;  %v7537_v28 = vld [vmem:[#allocation81_spill] sm:$0xff] }
 0x75e   : >> { %v7480_v14 = vmov %v6880_v34  ;;  %v3652_v50 = vpop.f32.mrb[6].mxu1  ;;  %7519 = vst [vmem:[#allocation51_spill] sm:$0xff] %v7479_v3  ;;  %v7541_v43 = vld [vmem:[#allocation77_spill] sm:$0xff]  ;;  %v7556_v34 = vld [vmem:[#allocation63_spill] sm:$0xff]  ;;  %v7560_v3 = vld [vmem:[#allocation86_spill] sm:$0xff] (%p6918_p7) }
 0x75f   : >> { %v6886_v61 = vadd.f32 %v3652_v50, %v2363_v7   ;;  %v2468_v48 = vpop.f32.mrb[7].mxu1  ;;  %v7532_v50 = vld [vmem:[#allocation86_spill] sm:$0xff]  ;;  %v7550_v7 = vmov %v7421_v15  ;;  %v7568_v41 = vld [vmem:[#allocation84_spill] sm:$0xff] (%p6918_p7) }
 0x760   : >> { %v6888_v36 = vadd.f32 %v2468_v48, %v2362_v46   ;;  %v7531_v48 = vld [vmem:[#allocation87_spill] sm:$0xff]  ;;  %v7544_v46 = vld [vmem:[#allocation74_spill] sm:$0xff]  ;;  %v7577_v43 = vld [vmem:[#allocation18_spill] sm:$0xff] (%p6918_p7) }
 0x761   : >> { %7483 = vst [vmem:[#allocation90_spill] sm:$0xff] %v6886_v61  ;;  %v7484_v58 = vmov %v6886_v61  ;;  %v7501_v61 = vld [vmem:[#allocation48_spill] sm:$0xff] }
 0x762   : >> { %7485 = vst [vmem:[#allocation91_spill] sm:$0xff] %v6888_v36  ;;  %v7486_v45 = vmov %v6888_v36  ;;  %v3655_v31 = vpop.f32.mrb[8].mxu1  ;;  %v7495_v36 = vld [vmem:[#allocation54_spill] sm:$0xff]  ;;  %v2370_v4 = vmul.f32 %v7501_v61, %v4395_v62  ;;  %v7517_v61 = vmov %v7484_v58  ;;  %v7549_v62 = vld [vmem:[#allocation69_spill] sm:$0xff]  ;;  %v7553_v15 = vld [vmem:[#allocation66_spill] sm:$0xff] }
 0x763   : >> { %v6893_v16 = vadd.f32 %v3655_v31, %v2365_v19   ;;  %v2478_v6 = vpop.f32.mrb[9].mxu1  ;;  %v2369_v29 = vmul.f32 %v7495_v36, %v4393_v56  ;;  %v7518_v36 = vmov %v7486_v45  ;;  %v7530_v19 = vld [vmem:[#allocation88_spill] sm:$0xff]  ;;  %v7545_v56 = vld [vmem:[#allocation73_spill] sm:$0xff]  ;;  %v2582_v58 = vld [vmem:[%s7558_s29 + $0x8] sm:$0xff] (%p6918_p7) }
 0x764   : >> { %v6895_v21 = vadd.f32 %v2478_v6, %v2364_v25   ;;  %v7536_v25 = vld [vmem:[#allocation82_spill] sm:$0xff]  ;;  %v7554_v31 = vld [vmem:[#allocation65_spill] sm:$0xff]  ;;  %v7555_v6 = vld [vmem:[#allocation64_spill] sm:$0xff] }
 0x765   : >> { %v7489_v10 = vmov %v6893_v16  ;;  %v7529_v16 = vmov %v7465_v42  ;;  %v7559_v45 = vld [vmem:[#allocation78_spill] sm:$0xff] (%p6918_p7)  ;;  %v7562_v56 = vld [vmem:[#allocation87_spill] sm:$0xff] (%p6918_p7)  ;;  %v7563_v62 = vld [vmem:[#allocation80_spill] sm:$0xff] (%p6918_p7) }
 0x766   : >> { %v7490_v44 = vmov %v6895_v21  ;;  %v3658_v13 = vpop.f32.mrb[10].mxu1  ;;  %7515 = vst [vmem:[#allocation49_spill] sm:$0xff] %v7489_v10  ;;  %v7528_v21 = vmov %v7466_v30  ;;  %4398 = vrcp.f32 (%p6918_p7), %v7559_v45  ;;  %v7570_v57 = vld [vmem:[#allocation89_spill] sm:$0xff] (%p6918_p7) }
 0x767   : >> { %v6899_v0 = vadd.f32 %v3658_v13, %v2367_v23   ;;  %v2488_v17 = vpop.f32.mrb[11].mxu1  ;;  %7516 = vst [vmem:[#allocation50_spill] sm:$0xff] %v7490_v44  ;;  %v7527_v13 = vmov %v7467_v1  ;;  %v7540_v23 = vld [vmem:[#allocation78_spill] sm:$0xff]  ;;  %4400 = vrcp.f32 (%p6918_p7), %v7560_v3  ;;  %v7567_v3 = vld [vmem:[#allocation83_spill] sm:$0xff] (%p6918_p7)  ;;  %v7578_v61 = vld [vmem:[#allocation19_spill] sm:$0xff] (%p6918_p7) }
 0x768   : >> { %v6901_v2 = vadd.f32 %v2488_v17, %v2366_v40   ;;  %v7526_v17 = vmov %v7468_v52  ;;  %v7542_v40 = vld [vmem:[#allocation76_spill] sm:$0xff]  ;;  %4402 = vrcp.f32 (%p6918_p7), %v7561_v5 }
 0x769   : >> { %v7493_v27 = vmov %v6899_v0  ;;  %4404 = vrcp.f32 (%p6918_p7), %v7562_v56  ;;  %v7572_v25 = vld [vmem:[#allocation91_spill] sm:$0xff] (%p6918_p7)  ;;  %v3209_v40 = vld [vmem:[%s7576_s24] ss:$0 sm:$0xff] (%p6918_p7)  ;;  %s7595_s24 = sand.u32 (%p6918_p7), 1, %s4742_s18  }
 0x76a   : >> { %v7494_v53 = vmov %v6901_v2  ;;  %v3661_v59 = vpop.f32.mrb[12].mxu1  ;;  %v7513_v0 = vmov %v7493_v27  ;;  %4406 = vrcp.f32 (%p6918_p7), %v7563_v62  ;;  %s7195_s15 = scalar_lea.sflag (%p6918_p7), [#allocation7], %s7595_s24 }
 0x76b   : >> { %v6905_v29 = vadd.f32 %v3661_v59, %v2369_v29   ;;  %v2498_v12 = vpop.f32.mrb[13].mxu1  ;;  %v7514_v2 = vmov %v7494_v53  ;;  %v7547_v59 = vld [vmem:[#allocation71_spill] sm:$0xff] }
 0x76c   : >> { %v6907_v32 = vadd.f32 %v2498_v12, %v2368_v32   ;;  %v7525_v12 = vmov %v7469_v26 }
 0x76d   : >> { %7497 = vst [vmem:[#allocation92_spill] sm:$0xff] %v6905_v29  ;;  %v7510_v55 = vmov %v6905_v29  ;;  %1822 = sbr.rel (!%p6918_p7) target bundleno = 1214 (0x4be), region = 123 }
 0x76e   : >> { %v7499_v47 = vmov %v6907_v32  ;;  %v3664_v22 = vpop.f32.mrb[14].mxu1  ;;  %v7511_v29 = vmov %v7510_v55  ;;  %v2584_v55 = vld [vmem:[%s7558_s29 + $0x18] sm:$0xff] (%p6918_p7) }
 0x76f   : >> { %v6911_v60 = vadd.f32 %v3664_v22, %v2371_v37   ;;  %v2508_v63 = vpop.f32.mrb[15].mxu1  ;;  %v7512_v32 = vmov %v7499_v47  ;;  %v7534_v22 = vld [vmem:[#allocation84_spill] sm:$0xff] }
 0x770   : >> { %v6913_v38 = vadd.f32 %v2508_v63, %v2370_v4   ;;  %v7520_v4 = vmov %v7480_v14  ;;  %v7539_v63 = vld [vmem:[#allocation79_spill] sm:$0xff]  ;;  %v7546_v37 = vld [vmem:[#allocation72_spill] sm:$0xff] }
 0x771   : >> { %7502 = vst [vmem:[#allocation93_spill] sm:$0xff] %v6911_v60  ;;  %v7503_v20 = vmov %v6911_v60  ;;  %v7579_v63 = vld [vmem:[#allocation16_spill] sm:$0xff] (%p6918_p7) }
 0x772   : >> { %7504 = vst [vmem:[#allocation94_spill] sm:$0xff] %v6913_v38  ;;  %v7507_v60 = vmov %v7503_v20  ;;  %v7508_v51 = vmov %v6913_v38  ;;  %v7523_v38 = vmov %v7470_v39  ;;  %v2581_v20 = vld [vmem:[%s7558_s29] sm:$0xff] (%p6918_p7) }
 0x773   : >> { %7509 = vst [vmem:[#allocation48_spill] sm:$0xff] %v7508_v51  ;;  %v2583_v51 = vld [vmem:[%s7558_s29 + $0x10] sm:$0xff] (%p6918_p7)  ;;  %v3801_v34 = vpack.c.bf16 (%p6918_p7), %v2582_v58, %v2581_v20  ;;  %v7565_v58 = vld [vmem:[#allocation81_spill] sm:$0xff] (%p6918_p7)  ;;  %v7574_v60 = vld [vmem:[#allocation90_spill] sm:$0xff] (%p6918_p7) }
 0x774   : > { %v3805_v15 = vpack.c.bf16 %v2584_v55, %v2583_v51  ;;  %v7564_v20 = vld [vmem:[#allocation88_spill] sm:$0xff]  ;;  %v7566_v55 = vld [vmem:[#allocation82_spill] sm:$0xff]  ;;  %v4399_v51 = vpop.eup %4398 }
 0x775   : > { %3802 = vmatprep.subr.bf16.mxu0 %v3801_v34  ;;  %3813 = vmatprep.subr.bf16.mxu1 %v3801_v34  ;;  %4408 = vrcp.f32 %v7564_v20  ;;  %v4401_v45 = vpop.eup %4400  ;;  %v2565_v28 = vmul.f32 %v4399_v51, %v7471_v35  ;;  %v7569_v35 = vld [vmem:[#allocation85_spill] sm:$0xff]  ;;  %v7571_v31 = vld [vmem:[#allocation92_spill] sm:$0xff] }
 0x776   : > { %3804 = vmatpush3.bf16.msra.mxu0 %v3801_v34  ;;  %3815 = vmatpush3.bf16.msra.mxu1 %v3801_v34  ;;  %4410 = vrcp.f32 %v7565_v58  ;;  %v4403_v2 = vpop.eup %4402  ;;  %v2573_v24 = vmul.f32 %v4401_v45, %v7490_v44 }
 0x777   : > { %3806 = vmatprep.subr.bf16.mxu0 %v3805_v15  ;;  %3814 = vmatprep.subr.bf16.mxu1 %v3805_v15  ;;  %4412 = vrcp.f32 %v7465_v42  ;;  %v4405_v42 = vpop.eup %4404  ;;  %v2566_v18 = vmul.f32 %v4403_v2, %v7470_v39  ;;  %v7583_v2 = vld [vmem:[#allocation23_spill] sm:$0xff] }
 0x778   : > { %4414 = vrcp.f32 %v7566_v55  ;;  %3673 = vmatprep.mubr.msk.f32.mxu0 %vm1608_vm12, %v2565_v28  ;;  %3685 = vmatprep.mubr.msk.f32.mxu1 %vm1608_vm12, %v2573_v24  ;;  %v2574_v11 = vmul.f32 %v4405_v42, %v7489_v10  ;;  %v7575_v13 = vld [vmem:[#allocation93_spill] sm:$0xff] }
 0x779   : > { %4416 = vrcp.f32 %v7466_v30  ;;  %v4407_v30 = vpop.eup %4406  ;;  %v7573_v6 = vld [vmem:[#allocation94_spill] sm:$0xff] }
 0x77a   : > { %3808 = vmatpush3.bf16.msra.mxu0 %v3805_v15  ;;  %3816 = vmatpush3.bf16.msra.mxu1 %v3805_v15  ;;  %4418 = vrcp.f32 %v7567_v3  ;;  %v2567_v44 = vmul.f32 %v4407_v30, %v7475_v33  ;;  %v7581_v15 = vld [vmem:[#allocation17_spill] sm:$0xff]  ;;  %v7582_v3 = vld [vmem:[#allocation22_spill] sm:$0xff] }
 0x77b   : > { %4420 = vrcp.f32 %v7467_v1  ;;  %v7585_v30 = vld [vmem:[#allocation21_spill] sm:$0xff] }
 0x77c   : > { %4422 = vrcp.f32 %v7568_v41  ;;  %v7584_v41 = vld [vmem:[#allocation20_spill] sm:$0xff] }
 0x77d   : > { %4424 = vrcp.f32 %v7468_v52  ;;  %3674 = vmatmul.mubr.msk.f32.vlgmr.msra.gmra.mrb[0].mxu0 %vm1608_vm12, %v2566_v18  ;;  %3686 = vmatmul.mubr.msk.f32.vlgmr.msra.gmra.mrb[0].mxu1 %vm1608_vm12, %v2574_v11 }
 0x77e   : > { %4426 = vrcp.f32 %v7569_v35  ;;  %3676 = vmatprep.mubr.msk.f32.mxu0 %vm1608_vm12, %v2567_v44 }
 0x77f   : > { %v4409_v1 = vpop.eup %4408  ;;  %4428 = vrcp.f32 %v7469_v26 }
 0x780   : > { %v4411_v7 = vpop.eup %4410  ;;  %v2575_v39 = vmul.f32 %v4409_v1, %v7494_v53 }
 0x781   : > { %v4413_v52 = vpop.eup %4412  ;;  %v2568_v50 = vmul.f32 %v4411_v7, %v7474_v8 }
 0x782   : > { %v4415_v10 = vpop.eup %4414  ;;  %3688 = vmatprep.mubr.msk.f32.mxu1 %vm1608_vm12, %v2575_v39  ;;  %v2576_v54 = vmul.f32 %v4413_v52, %v7493_v27 }
 0x783   : > { %v4417_v46 = vpop.eup %4416  ;;  %3677 = vmatmul.mubr.msk.f32.gmra.mrb[2].mxu0 %vm1608_vm12, %v2568_v50  ;;  %v2569_v26 = vmul.f32 %v4415_v10, %v7480_v14  ;;  %v7586_v50 = vld [vmem:[#allocation26_spill] sm:$0xff] }
 0x784   : > { %v4419_v33 = vpop.eup %4418  ;;  %3689 = vmatmul.mubr.msk.f32.gmra.mrb[2].mxu1 %vm1608_vm12, %v2576_v54  ;;  %v2577_v53 = vmul.f32 %v4417_v46, %v7499_v47  ;;  %v7587_v46 = vld [vmem:[#allocation27_spill] sm:$0xff] }
 0x785   : > { %v4421_v48 = vpop.eup %4420  ;;  %3679 = vmatprep.mubr.msk.f32.mxu0 %vm1608_vm12, %v2569_v26  ;;  %v2570_v8 = vmul.f32 %v4419_v33, %v7570_v57  ;;  %v7588_v33 = vld [vmem:[#allocation24_spill] sm:$0xff]  ;;  %v7589_v57 = vld [vmem:[#allocation25_spill] sm:$0xff] }
 0x786   : > { %v4423_v19 = vpop.eup %4422  ;;  %3691 = vmatprep.mubr.msk.f32.mxu1 %vm1608_vm12, %v2577_v53  ;;  %v2578_v27 = vmul.f32 %v4421_v48, %v7571_v31 }
 0x787   : > { %v4425_v49 = vpop.eup %4424  ;;  %3680 = vmatmul.mubr.msk.f32.gmra.mrb[4].mxu0 %vm1608_vm12, %v2570_v8  ;;  %v2571_v14 = vmul.f32 %v4423_v19, %v7572_v25 }
 0x788   : > { %v4427_v16 = vpop.eup %4426  ;;  %3692 = vmatmul.mubr.msk.f32.gmra.mrb[4].mxu1 %vm1608_vm12, %v2578_v27  ;;  %v2579_v47 = vmul.f32 %v4425_v49, %v7573_v6 }
 0x789   : > { %v4429_v21 = vpop.eup %4428  ;;  %3682 = vmatprep.mubr.msk.f32.mxu0 %vm1608_vm12, %v2571_v14  ;;  %v2572_v23 = vmul.f32 %v4427_v16, %v7574_v60  ;;  %v7590_v16 = vld [vmem:[#allocation30_spill] sm:$0xff] }
 0x78a   : > { %3694 = vmatprep.mubr.msk.f32.mxu1 %vm1608_vm12, %v2579_v47  ;;  %v2580_v0 = vmul.f32 %v4429_v21, %v7575_v13  ;;  %v7591_v21 = vld [vmem:[#allocation31_spill] sm:$0xff] }
 0x78b   : > { %3683 = vmatmul.mubr.msk.f32.gmra.mrb[6].mxu0 %vm1608_vm12, %v2572_v23  ;;  %v7592_v23 = vld [vmem:[#allocation28_spill] sm:$0xff] }
 0x78c   : > { %3695 = vmatmul.mubr.msk.f32.gmra.mrb[6].mxu1 %vm1608_vm12, %v2580_v0  ;;  %v7594_v0 = vld [vmem:[#allocation29_spill] sm:$0xff] }
 0x850   : > { %v3675_v17 = vpop.f32.mrb[0].mxu0  ;;  %v3687_v29 = vpop.f32.mrb[0].mxu1 }
 0x851   : > { %v2712_v36 = vadd.f32 %v3675_v17, %v3209_v40  ;;  %v2706_v59 = vpop.f32.mrb[1].mxu0  ;;  %v2752_v9 = vadd.f32 %v3687_v29, %v3209_v40  ;;  %v2746_v12 = vpop.f32.mrb[1].mxu1 }
 0x852   : > { %v2707_v32 = vadd.f32 %v3209_v40, %v2706_v59  ;;  %v2747_v22 = vadd.f32 %v3209_v40, %v2746_v12 }
 0x853   : > { %v2786_v37 = vadd.f32 %v2712_v36, %v7577_v43  ;;  %v2794_v4 = vadd.f32 %v2752_v9, %v7578_v61 }
 0x854   : > { %v2785_v38 = vadd.f32 %v2707_v32, %v7579_v63  ;;  %v2793_v5 = vadd.f32 %v2747_v22, %v7581_v15 }
 0x855   : > { %2802 = vst.msk [vmem:[%s5199_s26 + $0x8] sm:$0xff] %vm1608_vm12, %v2786_v37  ;;  %2810 = vst.msk [vmem:[%s5199_s26 + $0x48] sm:$0xff] %vm1608_vm12, %v2794_v4 }
 0x856   : > { %v3678_v34 = vpop.f32.mrb[2].mxu0  ;;  %2801 = vst.msk [vmem:[%s5199_s26] sm:$0xff] %vm1608_vm12, %v2785_v38  ;;  %2809 = vst.msk [vmem:[%s5199_s26 + $0x40] sm:$0xff] %vm1608_vm12, %v2793_v5 }
 0x857   : > { %v2722_v56 = vadd.f32 %v3678_v34, %v3209_v40  ;;  %v3690_v62 = vpop.f32.mrb[2].mxu1  ;;  %v2716_v20 = vpop.f32.mrb[3].mxu0 }
 0x858   : > { %v2762_v58 = vadd.f32 %v3690_v62, %v3209_v40  ;;  %v2717_v55 = vadd.f32 %v3209_v40, %v2716_v20  ;;  %v2756_v51 = vpop.f32.mrb[3].mxu1 }
 0x859   : > { %v2788_v45 = vadd.f32 %v2722_v56, %v7582_v3  ;;  %v2757_v28 = vadd.f32 %v3209_v40, %v2756_v51 }
 0x85a   : > { %v2796_v24 = vadd.f32 %v2762_v58, %v7583_v2  ;;  %v2787_v42 = vadd.f32 %v2717_v55, %v7584_v41  ;;  %v3681_v18 = vpop.f32.mrb[4].mxu0 }
 0x85b   : > { %2804 = vst.msk [vmem:[%s5199_s26 + $0x18] sm:$0xff] %vm1608_vm12, %v2788_v45  ;;  %v2795_v11 = vadd.f32 %v2757_v28, %v7585_v30  ;;  %v2732_v35 = vadd.f32 %v3681_v18, %v3209_v40  ;;  %v3693_v1 = vpop.f32.mrb[4].mxu1  ;;  %v2726_v44 = vpop.f32.mrb[5].mxu0 }
 0x85c   : > { %2812 = vst.msk [vmem:[%s5199_s26 + $0x58] sm:$0xff] %vm1608_vm12, %v2796_v24  ;;  %2803 = vst.msk [vmem:[%s5199_s26 + $0x10] sm:$0xff] %vm1608_vm12, %v2787_v42  ;;  %v2772_v7 = vadd.f32 %v3693_v1, %v3209_v40  ;;  %v2727_v39 = vadd.f32 %v3209_v40, %v2726_v44  ;;  %v2766_v52 = vpop.f32.mrb[5].mxu1 }
 0x85d   : > { %2811 = vst.msk [vmem:[%s5199_s26 + $0x50] sm:$0xff] %vm1608_vm12, %v2795_v11  ;;  %v2790_v10 = vadd.f32 %v2732_v35, %v7586_v50  ;;  %v2767_v54 = vadd.f32 %v3209_v40, %v2766_v52 }
 0x85e   : > { %v2798_v26 = vadd.f32 %v2772_v7, %v7587_v46  ;;  %v2789_v53 = vadd.f32 %v2727_v39, %v7588_v33  ;;  %v3684_v48 = vpop.f32.mrb[6].mxu0 }
 0x85f   : > { %2806 = vst.msk [vmem:[%s5199_s26 + $0x28] sm:$0xff] %vm1608_vm12, %v2790_v10  ;;  %v2797_v8 = vadd.f32 %v2767_v54, %v7589_v57  ;;  %v2742_v19 = vadd.f32 %v3684_v48, %v3209_v40  ;;  %v3696_v31 = vpop.f32.mrb[6].mxu1  ;;  %v2736_v27 = vpop.f32.mrb[7].mxu0 }
 0x860   : > { %2814 = vst.msk [vmem:[%s5199_s26 + $0x68] sm:$0xff] %vm1608_vm12, %v2798_v26  ;;  %2805 = vst.msk [vmem:[%s5199_s26 + $0x20] sm:$0xff] %vm1608_vm12, %v2789_v53  ;;  %v2782_v49 = vadd.f32 %v3696_v31, %v3209_v40  ;;  %v2737_v25 = vadd.f32 %v3209_v40, %v2736_v27  ;;  %v2776_v14 = vpop.f32.mrb[7].mxu1 }
 0x861   : > { %2813 = vst.msk [vmem:[%s5199_s26 + $0x60] sm:$0xff] %vm1608_vm12, %v2797_v8  ;;  %v2792_v6 = vadd.f32 %v2742_v19, %v7590_v16  ;;  %v2777_v47 = vadd.f32 %v3209_v40, %v2776_v14 }
 0x862   : > { %v2800_v60 = vadd.f32 %v2782_v49, %v7591_v21  ;;  %v2791_v13 = vadd.f32 %v2737_v25, %v7592_v23 }
 0x863   : > { %2808 = vst.msk [vmem:[%s5199_s26 + $0x38] sm:$0xff] %vm1608_vm12, %v2792_v6  ;;  %v2799_v17 = vadd.f32 %v2777_v47, %v7594_v0 }
 0x864   : > { %2816 = vst.msk [vmem:[%s5199_s26 + $0x78] sm:$0xff] %vm1608_vm12, %v2800_v60  ;;  %2807 = vst.msk [vmem:[%s5199_s26 + $0x30] sm:$0xff] %vm1608_vm12, %v2791_v13 }
 0x865   : > { %2815 = vst.msk [vmem:[%s5199_s26 + $0x70] sm:$0xff] %vm1608_vm12, %v2799_v17 }
 0x866   : > { %4473 = shalt.err (!%p4470_p11)
}
 0x867   : > { %s4474_s26 = scalar_lea.hbm %s7180_s28, 2048  ;;  %s4478_s24 = scalar_lea.hbm %s7593_s13, 8192 }
 0x868   : > { %p4475_p13 = scmp.ne.s32.totalorder %s7180_s28, %s4474_s26  ;;  %p4479_p10 = scmp.lt.u32.totalorder %s7180_s28, %s7593_s13 }
 0x869   : > { %p4480_p12 = scmp.lt.u32.totalorder %s4478_s24, %s4474_s26  ;;  %p4482_p2 = scmp.lt.u32.totalorder %s4474_s26, %s7180_s28 }
 0x86a   : > { %p4476_p5 = pnand %p4475_p13, %p7596_p4 }
 0x86b   : > { %p4481_p7 = por %p4480_p12, %p4479_p10 }
 0x86c   : > { %p4477_p8 = pneg %p4476_p5 }
 0x86d   : > { %p4483_p0 = por %p4482_p2, %p4481_p7 }
 0x86f   : > { %p4484_p1 = pnand %p4483_p0, %p4477_p8 }
 0x871   : > { %4487 = shalt.err (!%p4484_p1)
}
 0x872   : > { %s4981_s4 = smov 128   ;;  %s4982_s20 = smov 8  }
 0x873   : > { %3835 = dma.vmem_to_hbm [thread:$0]  (%p7596_p4), %s7182_s12, 2048, %s7180_s28, %s7195_s15, %s4981_s4, %s4981_s4, %s4982_s20  }
 0x874 PF: > { %p3846_p6 = scmp.ge.s32.totalorder %s4778_s27, 2  ;;  %s2848_s16 = sand.u32 1, %s4738_s17  }
 0x875   : > { %p7597_p9 = scmp.ne.s32.totalorder %s7327_s9, 0  ;;  %s2849_s26 = scalar_lea.sflag [#allocation7], %s2848_s16 }
 0x877   : > { %p3842_p3 = pnand %p3846_p6, %p7597_p9 }
 0x879   : > { %4733 = dma.done.wait (!%p3842_p3), %s2849_s26, 2048  }
 0x87a   : > { %4735 = vsyncadd (!%p3842_p3), %s2849_s26, 4294965248  ;;  %s27_s27 = sadd.s32 1, %s4778_s27   ;;  %s7598_s23 = sld [smem:[#allocation12_spill]] }
 0x87b   : > { %p24_p11 = scmp.ge.s32.totalorder %s27_s27, 6   ;;  %s7599_s24 = sld [smem:[#allocation13_spill]] }
 0x87c   : > { %s7600_s30 = sld [smem:[#allocation14_spill]]  ;;  %s7601_s26 = sld [smem:[#allocation15_spill]] }
 0x87d   : > { %s7602_s17 = smov %s4742_s18  ;;  %s7603_s18 = smov %s4746_s19 }
 0x87e   : > { %s7604_s19 = smov %s5133_s10  ;;  %s7605_s20 = smov %s4754_s21 }
 0x87f   : > { %s7606_s21 = smov %s4758_s22  ;;  %s7607_s22 = smov %s5130_s25 }
 0x880   :  { %26 = sbr.rel (!%p24_p11) target bundleno = 14 (0xe), region = 134 }
 0x882   : > { %s7608_s25 = smov %s7600_s30 }
 0x887   :  { %2854 = vsyncpa [#allocation6], 1 }
 0x888   :  { %2856 = vsyncpa [#allocation6 + $0x1], 1 }
 0x889   :  { %2857 = vsyncpa [#allocation7], 1 }
 0x88a   :  { %2859 = vsyncpa [#allocation7 + $0x1], 1 }

</bundles_post_ra>
